<compile_context>
chip_gen: v7x
topology: tpu7x:2x2x1
jax: 0.10.0
libtpu: 0.0.40
codegen_flags: <defaults>
</compile_context>

<pallas_src>
import jax
import jax.numpy as jnp
from jax.experimental import pallas as pl
from jax.experimental.pallas import tpu as pltpu

LANE = 128
_PADL = 8  # left-pad columns inside the conv scratch; column _PADL-1 is the semantic
           # zero pad. 8 keeps the interior store sublane-aligned (perf only).


def _round_up(x, m):
    return (x + m - 1) // m * m


# ----------------------------------------------------------------------------
# Kernel 1: fused channel-concat + zero-pad + 3x3 conv (BN folded) + ReLU.
# One grid step per image; single deep-K im2col matmul on the MXU.
# ----------------------------------------------------------------------------
def _concat_pad_conv3x3_bn_relu_kernel(xu_ref, skip_ref, w_ref, b_ref, o_ref,
                                       p_ref, patches_ref):
    # xu_ref      : (1, H, W, Cx)    upsampled input (NHWC)
    # skip_ref    : (1, H, W, Cs)    skip connection (NHWC)
    # w_ref       : (9*Cp, Coutp)    im2col-reordered, BN-folded conv weights
    # b_ref       : (1, Coutp)       BN-folded bias (zero in padded channels)
    # o_ref       : (1, H, W, Coutp)
    # p_ref       : VMEM (H+2, W+_PADL+1, Cp)  padded, concatenated conv input
    # patches_ref : VMEM (H, W, 9*Cp)          im2col patches
    H = o_ref.shape[1]
    W = o_ref.shape[2]
    Cx = xu_ref.shape[3]
    Cs = skip_ref.shape[3]
    Cp = p_ref.shape[2]

    # Fused zero-pad + torch.cat([x, skip], dim=1), assembled in VMEM:
    # image pixel (i2, i3) lives at P[1 + i2, _PADL + i3, :]; everything else is zero.
    p_ref[...] = jnp.zeros_like(p_ref)
    p_ref[1:H + 1, _PADL:_PADL + W, 0:Cx] = xu_ref[0]
    p_ref[1:H + 1, _PADL:_PADL + W, Cx:Cx + Cs] = skip_ref[0]

    # im2col: tap (dy, dx) occupies lane block [t*Cp, (t+1)*Cp), t = dy*3 + dx.
    for dy in range(3):
        for dx in range(3):
            t = dy * 3 + dx
            patches_ref[:, :, t * Cp:(t + 1) * Cp] = (
                p_ref[dy:dy + H, _PADL - 1 + dx:_PADL - 1 + dx + W, :])

    # One deep matmul: (H, W, 9*Cp) x (9*Cp, Coutp), f32 accumulation on the MXU.
    acc = jax.lax.dot_general(
        patches_ref[...], w_ref[...],
        dimension_numbers=(((2,), (0,)), ((), ())),
        preferred_element_type=jnp.float32)            # (H, W, Coutp)
    acc = acc + b_ref[0][None, None, :]
    o_ref[0] = jnp.maximum(acc, 0.0).astype(o_ref.dtype)


def concat_pad_conv3x3_bn_relu(xu_nhwc, skip_nhwc, w9, bias2d):
    """xu: (N,H,W,Cx), skip: (N,H,W,Cs), w9: (9*Cp, Coutp), bias2d: (1, Coutp)."""
    N, H, W, Cx = xu_nhwc.shape
    Cs = skip_nhwc.shape[3]
    Cp = w9.shape[0] // 9
    Coutp = w9.shape[1]

    flops = 2 * N * H * W * 9 * Cp * Coutp
    bytes_accessed = 4 * (N * H * W * (Cx + Cs + Coutp) + 9 * Cp * Coutp + Coutp)

    return pl.pallas_call(
        _concat_pad_conv3x3_bn_relu_kernel,
        out_shape=jax.ShapeDtypeStruct((N, H, W, Coutp), jnp.float32),
        grid=(N,),
        in_specs=[
            pl.BlockSpec((1, H, W, Cx), lambda n: (n, 0, 0, 0)),
            pl.BlockSpec((1, H, W, Cs), lambda n: (n, 0, 0, 0)),
            pl.BlockSpec((9 * Cp, Coutp), lambda n: (0, 0)),
            pl.BlockSpec((1, Coutp), lambda n: (0, 0)),
        ],
        out_specs=pl.BlockSpec((1, H, W, Coutp), lambda n: (n, 0, 0, 0)),
        scratch_shapes=[
            pltpu.VMEM((H + 2, W + _PADL + 1, Cp), jnp.float32),
            pltpu.VMEM((H, W, 9 * Cp), jnp.float32),
        ],
        compiler_params=pltpu.CompilerParams(
            dimension_semantics=("parallel",),
            vmem_limit_bytes=32 * 1024 * 1024),
        cost_estimate=pl.CostEstimate(flops=flops, transcendentals=0,
                                      bytes_accessed=bytes_accessed),
    )(xu_nhwc, skip_nhwc, w9, bias2d)


# ----------------------------------------------------------------------------
# Kernel 2: fused MHSA (per head) + folded BatchNorm + ReLU.
# One grid step per (image, head).
# ----------------------------------------------------------------------------
def _mhsa_bn_relu_kernel(x_ref, wq_ref, wk_ref, wv_ref, bq_ref, bk_ref, bv_ref,
                         rel_ref, s_ref, t_ref, o_ref):
    # x_ref    : (1, HW, Cp)   conv1 output, positions flattened, channels 128-padded
    # w*_ref   : (1, Cp, d)    per-head q/k/v 1x1-conv weights (zero rows beyond C)
    # b*_ref   : (1, 1, d)     per-head q/k/v biases
    # rel_ref  : (1, HW, d)    per-head relative-position term (rel_h + rel_w)
    # s_ref/t_ref : (1, 1, d)  folded BatchNorm scale / bias for this head's channels
    # o_ref    : (1, 1, HW, d)
    f32 = jnp.float32
    x = x_ref[0]                                                        # (HW, Cp)
    q = jnp.dot(x, wq_ref[0], preferred_element_type=f32) + bq_ref[0]   # (HW, d)
    k = jnp.dot(x, wk_ref[0], preferred_element_type=f32) + bk_ref[0]
    v = jnp.dot(x, wv_ref[0], preferred_element_type=f32) + bv_ref[0]

    # energy[i, j] = sum_d q[i,d]*k[j,d]  +  sum_d rel[i,d]*q[j,d]
    cc = jax.lax.dot_general(q, k, (((1,), (1,)), ((), ())),
                             preferred_element_type=f32)                # (HW, HW)
    cp = jax.lax.dot_general(rel_ref[0], q, (((1,), (1,)), ((), ())),
                             preferred_element_type=f32)                # (HW, HW)
    e = cc + cp

    # softmax over the last (lane) axis
    m = jnp.max(e, axis=-1, keepdims=True)
    p = jnp.exp(e - m)
    a = p * pl.reciprocal(jnp.sum(p, axis=-1, keepdims=True), approx=True)

    o = jnp.dot(a, v, preferred_element_type=f32)                       # (HW, d)
    o_ref[0, 0] = jnp.maximum(o * s_ref[0] + t_ref[0], 0.0).astype(o_ref.dtype)


def mhsa_bn_relu(x_flat, wq, wk, wv, bq, bk, bv, rel, bn_s, bn_t):
    """x_flat: (N, HW, Cp).  Returns (N, heads, HW, d)."""
    N, HW, Cp = x_flat.shape
    heads, _, d = wq.shape

    flops = N * heads * (6 * HW * Cp * d + 6 * HW * HW * d + 4 * HW * HW)
    bytes_accessed = 4 * (N * HW * Cp + heads * (3 * Cp * d + HW * d + 5 * d)
                          + N * heads * HW * d)

    head_spec = pl.BlockSpec((1, Cp, d), lambda n, h: (h, 0, 0))
    vec_spec = pl.BlockSpec((1, 1, d), lambda n, h: (h, 0, 0))

    return pl.pallas_call(
        _mhsa_bn_relu_kernel,
        out_shape=jax.ShapeDtypeStruct((N, heads, HW, d), jnp.float32),
        grid=(N, heads),
        in_specs=[
            pl.BlockSpec((1, HW, Cp), lambda n, h: (n, 0, 0)),
            head_spec, head_spec, head_spec,
            vec_spec, vec_spec, vec_spec,
            pl.BlockSpec((1, HW, d), lambda n, h: (h, 0, 0)),
            vec_spec, vec_spec,
        ],
        out_specs=pl.BlockSpec((1, 1, HW, d), lambda n, h: (n, h, 0, 0)),
        compiler_params=pltpu.CompilerParams(
            dimension_semantics=("parallel", "parallel"),
            vmem_limit_bytes=32 * 1024 * 1024),
        cost_estimate=pl.CostEstimate(flops=flops,
                                      transcendentals=N * heads * HW * HW,
                                      bytes_accessed=bytes_accessed),
    )(x_flat, wq, wk, wv, bq, bk, bv, rel, bn_s, bn_t)


# ----------------------------------------------------------------------------
# Deterministic synthetic parameters (BN folded) in kernel layout + a raw copy
# for the pure-JAX reference.
# ----------------------------------------------------------------------------
def make_m_decoder_block_params(in_channels, skip_channels, out_channels, w, heads, key):
    assert out_channels % heads == 0
    cin = in_channels + skip_channels
    d = out_channels // heads
    hw = w * w
    cp = _round_up(cin, LANE)
    coutp = _round_up(out_channels, LANE)
    eps = 1e-5

    keys = jax.random.split(key, 8)

    # ---- conv1: 3x3 conv (no bias) + BatchNorm (running stats) ----
    w1 = jax.random.normal(keys[0], (3, 3, cin, out_channels), jnp.float32) / (cin * 9) ** 0.5
    g1 = 1.0 + 0.1 * jax.random.normal(keys[1], (out_channels,), jnp.float32)
    beta1 = 0.05 * jnp.arange(out_channels, dtype=jnp.float32)
    mean1 = 0.01 * jnp.arange(out_channels, dtype=jnp.float32)
    var1 = 1.0 + 0.1 * jnp.arange(out_channels, dtype=jnp.float32) / out_channels
    s1 = g1 / jnp.sqrt(var1 + eps)
    w1f = w1 * s1[None, None, None, :]           # folded weight, HWIO
    b1f = beta1 - mean1 * s1                     # folded bias

    w9 = jnp.zeros((3, 3, cp, coutp), jnp.float32)
    w9 = w9.at[:, :, :cin, :out_channels].set(w1f)
    w9 = w9.reshape(9 * cp, coutp)
    b1k = jnp.zeros((1, coutp), jnp.float32).at[0, :out_channels].set(b1f)

    # ---- conv2: MHSA(out_channels, w, w) + BatchNorm + ReLU ----
    def conv1x1(k):
        kw, kb = jax.random.split(k)
        wt = jax.random.normal(kw, (out_channels, out_channels), jnp.float32) / out_channels ** 0.5
        bs = 0.02 * jax.random.normal(kb, (out_channels,), jnp.float32)
        return wt, bs

    wq, bq = conv1x1(keys[2])
    wk, bk = conv1x1(keys[3])
    wv, bv = conv1x1(keys[4])
    rel_h = jax.random.normal(keys[5], (1, heads, d, 1, w), jnp.float32)
    rel_w = jax.random.normal(keys[6], (1, heads, d, w, 1), jnp.float32)

    g2 = 1.0 + 0.1 * jax.random.normal(keys[7], (out_channels,), jnp.float32)
    beta2 = 0.03 * jnp.arange(out_channels, dtype=jnp.float32)
    mean2 = 0.02 * jnp.arange(out_channels, dtype=jnp.float32)
    var2 = 1.0 + 0.05 * jnp.arange(out_channels, dtype=jnp.float32) / out_channels
    s2 = g2 / jnp.sqrt(var2 + eps)
    t2 = beta2 - mean2 * s2

    def qkv_heads(wmat):
        # (C_out, C_in) 1x1-conv weight -> (heads, coutp, d) rhs layout for X @ W.
        wt = jnp.transpose(wmat)                      # (C_in, C_out)
        wt = wt.reshape(out_channels, heads, d)       # split c_out = h*d + dd
        wt = jnp.transpose(wt, (1, 0, 2))             # (heads, C_in, d)
        return jnp.zeros((heads, coutp, d), jnp.float32).at[:, :out_channels, :].set(wt)

    def per_head_vec(vec):
        return vec.reshape(heads, 1, d)

    rel = (rel_h + rel_w).reshape(heads, d, hw)       # (heads, d, HW), p = i2*w + i3
    rel_t = jnp.transpose(rel, (0, 2, 1))             # (heads, HW, d)

    params = {
        "w1": w9, "b1": b1k,
        "wq": qkv_heads(wq), "wk": qkv_heads(wk), "wv": qkv_heads(wv),
        "bq": per_head_vec(bq), "bk": per_head_vec(bk), "bv": per_head_vec(bv),
        "rel": rel_t,
        "bn2_s": per_head_vec(s2), "bn2_t": per_head_vec(t2),
    }
    raw = {
        "w1f": w1f, "b1f": b1f,
        "wq": wq, "bq": bq, "wk": wk, "bk": bk, "wv": wv, "bv": bv,
        "rel_h": rel_h, "rel_w": rel_w, "bn2_s": s2, "bn2_t": t2,
    }
    return params, raw


# ----------------------------------------------------------------------------
# MDecoderBlock forward (public interface is NCHW, like PyTorch).
# ----------------------------------------------------------------------------
@jax.jit
def m_decoder_block_forward(params, x_nchw, skip_nchw):
    # TODO(synk): skip=None path (skip_channels == 0) is not wired into the fused conv1 kernel.
    x = jnp.transpose(x_nchw, (0, 2, 3, 1))          # NCHW -> NHWC
    skip = jnp.transpose(skip_nchw, (0, 2, 3, 1))

    # F.interpolate(scale_factor=2, mode='nearest') -- kept in XLA (see TODO at top);
    # concat + pad are fused into the conv kernel.
    x = jnp.repeat(jnp.repeat(x, 2, axis=1), 2, axis=2)

    # conv1: fused concat + pad + 3x3 conv + BN + ReLU (lane-padded output channels).
    y = concat_pad_conv3x3_bn_relu(x, skip, params["w1"], params["b1"])   # (N,H,W,Coutp)

    N, H, W, coutp = y.shape
    heads, _, d = params["wq"].shape
    c = heads * d

    # conv2: fused MHSA + BN + ReLU, one grid step per (image, head).
    y_flat = y.reshape(N, H * W, coutp)
    o4 = mhsa_bn_relu(y_flat, params["wq"], params["wk"], params["wv"],
                      params["bq"], params["bk"], params["bv"],
                      params["rel"], params["bn2_s"], params["bn2_t"])    # (N,heads,HW,d)

    # (N, heads, HW, d) -> (N, C, H, W)  == torch's out.view(B, C, width, height)
    return jnp.transpose(o4, (0, 1, 3, 2)).reshape(N, c, H, W)


# ----------------------------------------------------------------------------
# Pure-JAX (XLA) reference mirroring the PyTorch forward, for a numerical check.
# ----------------------------------------------------------------------------
def m_decoder_block_reference(raw, x_nchw, skip_nchw):
    hi = jax.lax.Precision.HIGHEST
    x = jnp.repeat(jnp.repeat(x_nchw, 2, axis=2), 2, axis=3)
    x = jnp.concatenate([x, skip_nchw], axis=1)
    y = jax.lax.conv_general_dilated(
        x, raw["w1f"], window_strides=(1, 1), padding=((1, 1), (1, 1)),
        dimension_numbers=("NCHW", "HWIO", "NCHW"), precision=hi)
    y = jnp.maximum(y + raw["b1f"][None, :, None, None], 0.0)

    B, C, A2, A3 = y.shape
    heads = raw["rel_h"].shape[1]
    d = C // heads
    hw = A2 * A3
    yf = y.reshape(B, C, hw)
    q = jnp.einsum("oc,bcp->bop", raw["wq"], yf, precision=hi) + raw["bq"][None, :, None]
    k = jnp.einsum("oc,bcp->bop", raw["wk"], yf, precision=hi) + raw["bk"][None, :, None]
    v = jnp.einsum("oc,bcp->bop", raw["wv"], yf, precision=hi) + raw["bv"][None, :, None]
    q = q.reshape(B, heads, d, hw)
    k = k.reshape(B, heads, d, hw)
    v = v.reshape(B, heads, d, hw)
    rel = (raw["rel_h"] + raw["rel_w"]).reshape(heads, d, hw)
    cc = jnp.einsum("bhdi,bhdj->bhij", q, k, precision=hi)
    cpos = jnp.einsum("hdi,bhdj->bhij", rel, q, precision=hi)
    attn = jax.nn.softmax(cc + cpos, axis=-1)
    out = jnp.einsum("bhdj,bhij->bhdi", v, attn, precision=hi)
    out = out.reshape(B, C, A2, A3)
    out = out * raw["bn2_s"][None, :, None, None] + raw["bn2_t"][None, :, None, None]
    return jnp.maximum(out, 0.0)


if __name__ == "__main__":
    in_channels, skip_channels, out_channels, heads = 4, 4, 8, 4
    N, h, w_half = 2, 8, 8
    w_full = 2 * h          # MHSA is constructed for the post-upsample spatial size

    key = jax.random.PRNGKey(0)
    kx, ks, kp = jax.random.split(key, 3)
    x = jax.random.normal(kx, (N, in_channels, h, w_half), jnp.float32)              # NCHW
    skip = jax.random.normal(ks, (N, skip_channels, 2 * h, 2 * w_half), jnp.float32)  # NCHW

    params, raw = make_m_decoder_block_params(in_channels, skip_channels,
                                              out_channels, w_full, heads, kp)

    out = m_decoder_block_forward(params, x, skip)
    out = jax.block_until_ready(out)

    assert out.shape == (N, out_channels, 2 * h, 2 * w_half), out.shape
    assert out.dtype == jnp.float32
    assert bool(jnp.all(out >= 0.0))                 # ReLU output
    assert bool(jnp.all(jnp.isfinite(out)))

    ref = m_decoder_block_reference(raw, x, skip)
    err = float(jnp.max(jnp.abs(out - ref)))
    assert err < 1e-1, f"mismatch vs pure-JAX reference: max abs err {err}"

    print("KERNEL_OK")
</pallas_src>

<mosaic_0001>
module attributes {stable_mosaic.version = 11 : i64} {
  func.func @_concat_pad_conv3x3_bn_relu_kernel(%arg0: i32, %arg1: memref<1x16x16x4xf32, #tpu.memory_space<vmem>>, %arg2: memref<1x16x16x4xf32, #tpu.memory_space<vmem>>, %arg3: memref<1152x128xf32, #tpu.memory_space<vmem>>, %arg4: memref<1x128xf32, #tpu.memory_space<vmem>>, %arg5: memref<1x16x16x128xf32, #tpu.memory_space<vmem>>, %arg6: memref<18x25x128xf32, #tpu.memory_space<vmem>>, %arg7: memref<16x16x1152xf32, #tpu.memory_space<vmem>>) attributes {dimension_semantics = [#tpu.dimension_semantics<parallel>], iteration_bounds = array<i64: 2>, scalar_prefetch = 0 : i64, scratch_operands = 2 : i64, tpu.core_type = #tpu.core_type<tc>, window_params = [{transform_indices = @transform_0, window_bounds = array<i64: 1, 16, 16, 4>}, {transform_indices = @transform_1, window_bounds = array<i64: 1, 16, 16, 4>}, {pipeline_mode = #tpu.pipeline_mode<synchronous>, transform_indices = @transform_2, window_bounds = array<i64: 1152, 128>}, {pipeline_mode = #tpu.pipeline_mode<synchronous>, transform_indices = @transform_3, window_bounds = array<i64: 1, 128>}, {transform_indices = @transform_4, window_bounds = array<i64: 1, 16, 16, 128>}]} {
    %cst = arith.constant 0.000000e+00 : f32
    %0 = vector.broadcast %cst : f32 to vector<18x25x128xf32>
    %c0 = arith.constant 0 : index
    %c0_0 = arith.constant 0 : index
    %c0_1 = arith.constant 0 : index
    %1 = vector.load %arg6[%c0, %c0_0, %c0_1] : memref<18x25x128xf32, #tpu.memory_space<vmem>>, vector<18x25x128xf32>
    tpu.vector_store %arg6[%c0, %c0_0, %c0_1], %0 {strides = array<i32>} : memref<18x25x128xf32, #tpu.memory_space<vmem>>, vector<18x25x128xf32>,
    %c0_2 = arith.constant 0 : index
    %c0_3 = arith.constant 0 : index
    %c0_4 = arith.constant 0 : index
    %c0_5 = arith.constant 0 : index
    %2 = vector.load %arg1[%c0_2, %c0_3, %c0_4, %c0_5] : memref<1x16x16x4xf32, #tpu.memory_space<vmem>>, vector<1x16x16x4xf32>
    %3 = vector.shape_cast %2 : vector<1x16x16x4xf32> to vector<16x16x4xf32>
    %c1 = arith.constant 1 : index
    %c8 = arith.constant 8 : index
    %c0_6 = arith.constant 0 : index
    %4 = vector.load %arg6[%c1, %c8, %c0_6] : memref<18x25x128xf32, #tpu.memory_space<vmem>>, vector<16x16x4xf32>
    tpu.vector_store %arg6[%c1, %c8, %c0_6], %3 {strides = array<i32>} : memref<18x25x128xf32, #tpu.memory_space<vmem>>, vector<16x16x4xf32>,
    %c0_7 = arith.constant 0 : index
    %c0_8 = arith.constant 0 : index
    %c0_9 = arith.constant 0 : index
    %c0_10 = arith.constant 0 : index
    %5 = vector.load %arg2[%c0_7, %c0_8, %c0_9, %c0_10] : memref<1x16x16x4xf32, #tpu.memory_space<vmem>>, vector<1x16x16x4xf32>
    %6 = vector.shape_cast %5 : vector<1x16x16x4xf32> to vector<16x16x4xf32>
    %c1_11 = arith.constant 1 : index
    %c8_12 = arith.constant 8 : index
    %c4 = arith.constant 4 : index
    %7 = vector.load %arg6[%c1_11, %c8_12, %c4] : memref<18x25x128xf32, #tpu.memory_space<vmem>>, vector<16x16x4xf32>
    tpu.vector_store %arg6[%c1_11, %c8_12, %c4], %6 {strides = array<i32>} : memref<18x25x128xf32, #tpu.memory_space<vmem>>, vector<16x16x4xf32>,
    %c0_13 = arith.constant 0 : index
    %c7 = arith.constant 7 : index
    %c0_14 = arith.constant 0 : index
    %8 = vector.load %arg6[%c0_13, %c7, %c0_14] : memref<18x25x128xf32, #tpu.memory_space<vmem>>, vector<16x16x128xf32>
    %c0_15 = arith.constant 0 : index
    %c0_16 = arith.constant 0 : index
    %c0_17 = arith.constant 0 : index
    %9 = vector.load %arg7[%c0_15, %c0_16, %c0_17] : memref<16x16x1152xf32, #tpu.memory_space<vmem>>, vector<16x16x128xf32>
    tpu.vector_store %arg7[%c0_15, %c0_16, %c0_17], %8 {strides = array<i32>} : memref<16x16x1152xf32, #tpu.memory_space<vmem>>, vector<16x16x128xf32>,
    %c0_18 = arith.constant 0 : index
    %c8_19 = arith.constant 8 : index
    %c0_20 = arith.constant 0 : index
    %10 = vector.load %arg6[%c0_18, %c8_19, %c0_20] : memref<18x25x128xf32, #tpu.memory_space<vmem>>, vector<16x16x128xf32>
    %c0_21 = arith.constant 0 : index
    %c0_22 = arith.constant 0 : index
    %c128 = arith.constant 128 : index
    %11 = vector.load %arg7[%c0_21, %c0_22, %c128] : memref<16x16x1152xf32, #tpu.memory_space<vmem>>, vector<16x16x128xf32>
    tpu.vector_store %arg7[%c0_21, %c0_22, %c128], %10 {strides = array<i32>} : memref<16x16x1152xf32, #tpu.memory_space<vmem>>, vector<16x16x128xf32>,
    %c0_23 = arith.constant 0 : index
    %c9 = arith.constant 9 : index
    %c0_24 = arith.constant 0 : index
    %12 = vector.load %arg6[%c0_23, %c9, %c0_24] : memref<18x25x128xf32, #tpu.memory_space<vmem>>, vector<16x16x128xf32>
    %c0_25 = arith.constant 0 : index
    %c0_26 = arith.constant 0 : index
    %c256 = arith.constant 256 : index
    %13 = vector.load %arg7[%c0_25, %c0_26, %c256] : memref<16x16x1152xf32, #tpu.memory_space<vmem>>, vector<16x16x128xf32>
    tpu.vector_store %arg7[%c0_25, %c0_26, %c256], %12 {strides = array<i32>} : memref<16x16x1152xf32, #tpu.memory_space<vmem>>, vector<16x16x128xf32>,
    %c1_27 = arith.constant 1 : index
    %c7_28 = arith.constant 7 : index
    %c0_29 = arith.constant 0 : index
    %14 = vector.load %arg6[%c1_27, %c7_28, %c0_29] : memref<18x25x128xf32, #tpu.memory_space<vmem>>, vector<16x16x128xf32>
    %c0_30 = arith.constant 0 : index
    %c0_31 = arith.constant 0 : index
    %c384 = arith.constant 384 : index
    %15 = vector.load %arg7[%c0_30, %c0_31, %c384] : memref<16x16x1152xf32, #tpu.memory_space<vmem>>, vector<16x16x128xf32>
    tpu.vector_store %arg7[%c0_30, %c0_31, %c384], %14 {strides = array<i32>} : memref<16x16x1152xf32, #tpu.memory_space<vmem>>, vector<16x16x128xf32>,
    %c1_32 = arith.constant 1 : index
    %c8_33 = arith.constant 8 : index
    %c0_34 = arith.constant 0 : index
    %16 = vector.load %arg6[%c1_32, %c8_33, %c0_34] : memref<18x25x128xf32, #tpu.memory_space<vmem>>, vector<16x16x128xf32>
    %c0_35 = arith.constant 0 : index
    %c0_36 = arith.constant 0 : index
    %c512 = arith.constant 512 : index
    %17 = vector.load %arg7[%c0_35, %c0_36, %c512] : memref<16x16x1152xf32, #tpu.memory_space<vmem>>, vector<16x16x128xf32>
    tpu.vector_store %arg7[%c0_35, %c0_36, %c512], %16 {strides = array<i32>} : memref<16x16x1152xf32, #tpu.memory_space<vmem>>, vector<16x16x128xf32>,
    %c1_37 = arith.constant 1 : index
    %c9_38 = arith.constant 9 : index
    %c0_39 = arith.constant 0 : index
    %18 = vector.load %arg6[%c1_37, %c9_38, %c0_39] : memref<18x25x128xf32, #tpu.memory_space<vmem>>, vector<16x16x128xf32>
    %c0_40 = arith.constant 0 : index
    %c0_41 = arith.constant 0 : index
    %c640 = arith.constant 640 : index
    %19 = vector.load %arg7[%c0_40, %c0_41, %c640] : memref<16x16x1152xf32, #tpu.memory_space<vmem>>, vector<16x16x128xf32>
    tpu.vector_store %arg7[%c0_40, %c0_41, %c640], %18 {strides = array<i32>} : memref<16x16x1152xf32, #tpu.memory_space<vmem>>, vector<16x16x128xf32>,
    %c2 = arith.constant 2 : index
    %c7_42 = arith.constant 7 : index
    %c0_43 = arith.constant 0 : index
    %20 = vector.load %arg6[%c2, %c7_42, %c0_43] : memref<18x25x128xf32, #tpu.memory_space<vmem>>, vector<16x16x128xf32>
    %c0_44 = arith.constant 0 : index
    %c0_45 = arith.constant 0 : index
    %c768 = arith.constant 768 : index
    %21 = vector.load %arg7[%c0_44, %c0_45, %c768] : memref<16x16x1152xf32, #tpu.memory_space<vmem>>, vector<16x16x128xf32>
    tpu.vector_store %arg7[%c0_44, %c0_45, %c768], %20 {strides = array<i32>} : memref<16x16x1152xf32, #tpu.memory_space<vmem>>, vector<16x16x128xf32>,
    %c2_46 = arith.constant 2 : index
    %c8_47 = arith.constant 8 : index
    %c0_48 = arith.constant 0 : index
    %22 = vector.load %arg6[%c2_46, %c8_47, %c0_48] : memref<18x25x128xf32, #tpu.memory_space<vmem>>, vector<16x16x128xf32>
    %c0_49 = arith.constant 0 : index
    %c0_50 = arith.constant 0 : index
    %c896 = arith.constant 896 : index
    %23 = vector.load %arg7[%c0_49, %c0_50, %c896] : memref<16x16x1152xf32, #tpu.memory_space<vmem>>, vector<16x16x128xf32>
    tpu.vector_store %arg7[%c0_49, %c0_50, %c896], %22 {strides = array<i32>} : memref<16x16x1152xf32, #tpu.memory_space<vmem>>, vector<16x16x128xf32>,
    %c2_51 = arith.constant 2 : index
    %c9_52 = arith.constant 9 : index
    %c0_53 = arith.constant 0 : index
    %24 = vector.load %arg6[%c2_51, %c9_52, %c0_53] : memref<18x25x128xf32, #tpu.memory_space<vmem>>, vector<16x16x128xf32>
    %c0_54 = arith.constant 0 : index
    %c0_55 = arith.constant 0 : index
    %c1024 = arith.constant 1024 : index
    %25 = vector.load %arg7[%c0_54, %c0_55, %c1024] : memref<16x16x1152xf32, #tpu.memory_space<vmem>>, vector<16x16x128xf32>
    tpu.vector_store %arg7[%c0_54, %c0_55, %c1024], %24 {strides = array<i32>} : memref<16x16x1152xf32, #tpu.memory_space<vmem>>, vector<16x16x128xf32>,
    %c0_56 = arith.constant 0 : index
    %c0_57 = arith.constant 0 : index
    %c0_58 = arith.constant 0 : index
    %26 = vector.load %arg7[%c0_56, %c0_57, %c0_58] : memref<16x16x1152xf32, #tpu.memory_space<vmem>>, vector<16x16x1152xf32>
    %c0_59 = arith.constant 0 : index
    %c0_60 = arith.constant 0 : index
    %27 = vector.load %arg3[%c0_59, %c0_60] : memref<1152x128xf32, #tpu.memory_space<vmem>>, vector<1152x128xf32>
    %cst_61 = arith.constant dense<0.000000e+00> : vector<16x16x128xf32>
    %28 = tpu.matmul %26, %27, %cst_61 {dimension_numbers = #tpu.dot_dimension_numbers<[2], [0], [0, 1], [1], [0, 0, 0, 1, 1, 1], [], []>} : vector<16x16x1152xf32>, vector<1152x128xf32>, vector<16x16x128xf32> -> vector<16x16x128xf32>
    %c0_62 = arith.constant 0 : index
    %c0_63 = arith.constant 0 : index
    %29 = vector.load %arg4[%c0_62, %c0_63] : memref<1x128xf32, #tpu.memory_space<vmem>>, vector<1x128xf32>
    %30 = vector.shape_cast %29 : vector<1x128xf32> to vector<128xf32>
    %31 = vector.shape_cast %30 : vector<128xf32> to vector<1x1x128xf32>
    %32 = vector.broadcast %31 : vector<1x1x128xf32> to vector<16x16x128xf32>
    %33 = arith.addf %28, %32 : vector<16x16x128xf32>
    %cst_64 = arith.constant 0.000000e+00 : f32
    %34 = vector.broadcast %cst_64 : f32 to vector<16x16x128xf32>
    %35 = arith.maximumf %33, %34 : vector<16x16x128xf32>
    %c0_65 = arith.constant 0 : index
    %c0_66 = arith.constant 0 : index
    %c0_67 = arith.constant 0 : index
    %c0_68 = arith.constant 0 : index
    %36 = vector.load %arg5[%c0_65, %c0_66, %c0_67, %c0_68] : memref<1x16x16x128xf32, #tpu.memory_space<vmem>>, vector<1x16x16x128xf32>
    %37 = vector.shape_cast %36 : vector<1x16x16x128xf32> to vector<16x16x128xf32>
    %38 = vector.shape_cast %35 : vector<16x16x128xf32> to vector<1x16x16x128xf32>
    tpu.vector_store %arg5[%c0_65, %c0_66, %c0_67, %c0_68], %38 {strides = array<i32>} : memref<1x16x16x128xf32, #tpu.memory_space<vmem>>, vector<1x16x16x128xf32>,
    return
  }
  func.func @transform_0(%arg0: i32) -> (i32, i32, i32, i32) {
    %c0_i32 = arith.constant 0 : i32
    %c0_i32_0 = arith.constant 0 : i32
    %c0_i32_1 = arith.constant 0 : i32
    %c0_i32_2 = arith.constant 0 : i32
    return %arg0, %c0_i32, %c0_i32_0, %c0_i32_1 : i32, i32, i32, i32
  }
  func.func @transform_1(%arg0: i32) -> (i32, i32, i32, i32) {
    %c0_i32 = arith.constant 0 : i32
    %c0_i32_0 = arith.constant 0 : i32
    %c0_i32_1 = arith.constant 0 : i32
    %c0_i32_2 = arith.constant 0 : i32
    return %arg0, %c0_i32, %c0_i32_0, %c0_i32_1 : i32, i32, i32, i32
  }
  func.func @transform_2(%arg0: i32) -> (i32, i32) {
    %c0_i32 = arith.constant 0 : i32
    %c0_i32_0 = arith.constant 0 : i32
    %c0_i32_1 = arith.constant 0 : i32
    return %c0_i32, %c0_i32_0 : i32, i32
  }
  func.func @transform_3(%arg0: i32) -> (i32, i32) {
    %c0_i32 = arith.constant 0 : i32
    %c0_i32_0 = arith.constant 0 : i32
    %c0_i32_1 = arith.constant 0 : i32
    return %c0_i32, %c0_i32_0 : i32, i32
  }
  func.func @transform_4(%arg0: i32) -> (i32, i32, i32, i32) {
    %c0_i32 = arith.constant 0 : i32
    %c0_i32_0 = arith.constant 0 : i32
    %c0_i32_1 = arith.constant 0 : i32
    %c0_i32_2 = arith.constant 0 : i32
    return %arg0, %c0_i32, %c0_i32_0, %c0_i32_1 : i32, i32, i32, i32
  }
}

module attributes {stable_mosaic.version = 11 : i64} {
  func.func @_mhsa_bn_relu_kernel(%arg0: i32, %arg1: i32, %arg2: memref<1x256x128xf32, #tpu.memory_space<vmem>>, %arg3: memref<1x128x2xf32, #tpu.memory_space<vmem>>, %arg4: memref<1x128x2xf32, #tpu.memory_space<vmem>>, %arg5: memref<1x128x2xf32, #tpu.memory_space<vmem>>, %arg6: memref<1x1x2xf32, #tpu.memory_space<vmem>>, %arg7: memref<1x1x2xf32, #tpu.memory_space<vmem>>, %arg8: memref<1x1x2xf32, #tpu.memory_space<vmem>>, %arg9: memref<1x256x2xf32, #tpu.memory_space<vmem>>, %arg10: memref<1x1x2xf32, #tpu.memory_space<vmem>>, %arg11: memref<1x1x2xf32, #tpu.memory_space<vmem>>, %arg12: memref<1x1x256x2xf32, #tpu.memory_space<vmem>>) attributes {dimension_semantics = [#tpu.dimension_semantics<parallel>, #tpu.dimension_semantics<parallel>], iteration_bounds = array<i64: 2, 4>, scalar_prefetch = 0 : i64, scratch_operands = 0 : i64, tpu.core_type = #tpu.core_type<tc>, window_params = [{transform_indices = @transform_0, window_bounds = array<i64: 1, 256, 128>}, {transform_indices = @transform_1, window_bounds = array<i64: 1, 128, 2>}, {transform_indices = @transform_2, window_bounds = array<i64: 1, 128, 2>}, {transform_indices = @transform_3, window_bounds = array<i64: 1, 128, 2>}, {transform_indices = @transform_4, window_bounds = array<i64: 1, 1, 2>}, {transform_indices = @transform_5, window_bounds = array<i64: 1, 1, 2>}, {transform_indices = @transform_6, window_bounds = array<i64: 1, 1, 2>}, {transform_indices = @transform_7, window_bounds = array<i64: 1, 256, 2>}, {transform_indices = @transform_8, window_bounds = array<i64: 1, 1, 2>}, {transform_indices = @transform_9, window_bounds = array<i64: 1, 1, 2>}, {transform_indices = @transform_10, window_bounds = array<i64: 1, 1, 256, 2>}]} {
    %c0 = arith.constant 0 : index
    %c0_0 = arith.constant 0 : index
    %c0_1 = arith.constant 0 : index
    %0 = vector.load %arg2[%c0, %c0_0, %c0_1] : memref<1x256x128xf32, #tpu.memory_space<vmem>>, vector<1x256x128xf32>
    %1 = vector.shape_cast %0 : vector<1x256x128xf32> to vector<256x128xf32>
    %c0_2 = arith.constant 0 : index
    %c0_3 = arith.constant 0 : index
    %c0_4 = arith.constant 0 : index
    %2 = vector.load %arg3[%c0_2, %c0_3, %c0_4] : memref<1x128x2xf32, #tpu.memory_space<vmem>>, vector<1x128x2xf32>
    %3 = vector.shape_cast %2 : vector<1x128x2xf32> to vector<128x2xf32>
    %cst = arith.constant dense<0.000000e+00> : vector<256x2xf32>
    %4 = tpu.matmul %1, %3, %cst {dimension_numbers = #tpu.dot_dimension_numbers<[1], [0], [0], [1], [0, 0, 1, 1], [], []>} : vector<256x128xf32>, vector<128x2xf32>, vector<256x2xf32> -> vector<256x2xf32>
    %c0_5 = arith.constant 0 : index
    %c0_6 = arith.constant 0 : index
    %c0_7 = arith.constant 0 : index
    %5 = vector.load %arg6[%c0_5, %c0_6, %c0_7] : memref<1x1x2xf32, #tpu.memory_space<vmem>>, vector<1x1x2xf32>
    %6 = vector.shape_cast %5 : vector<1x1x2xf32> to vector<1x2xf32>
    %7 = vector.broadcast %6 : vector<1x2xf32> to vector<256x2xf32>
    %8 = arith.addf %4, %7 : vector<256x2xf32>
    %c0_8 = arith.constant 0 : index
    %c0_9 = arith.constant 0 : index
    %c0_10 = arith.constant 0 : index
    %9 = vector.load %arg4[%c0_8, %c0_9, %c0_10] : memref<1x128x2xf32, #tpu.memory_space<vmem>>, vector<1x128x2xf32>
    %10 = vector.shape_cast %9 : vector<1x128x2xf32> to vector<128x2xf32>
    %cst_11 = arith.constant dense<0.000000e+00> : vector<256x2xf32>
    %11 = tpu.matmul %1, %10, %cst_11 {dimension_numbers = #tpu.dot_dimension_numbers<[1], [0], [0], [1], [0, 0, 1, 1], [], []>} : vector<256x128xf32>, vector<128x2xf32>, vector<256x2xf32> -> vector<256x2xf32>
    %c0_12 = arith.constant 0 : index
    %c0_13 = arith.constant 0 : index
    %c0_14 = arith.constant 0 : index
    %12 = vector.load %arg7[%c0_12, %c0_13, %c0_14] : memref<1x1x2xf32, #tpu.memory_space<vmem>>, vector<1x1x2xf32>
    %13 = vector.shape_cast %12 : vector<1x1x2xf32> to vector<1x2xf32>
    %14 = vector.broadcast %13 : vector<1x2xf32> to vector<256x2xf32>
    %15 = arith.addf %11, %14 : vector<256x2xf32>
    %c0_15 = arith.constant 0 : index
    %c0_16 = arith.constant 0 : index
    %c0_17 = arith.constant 0 : index
    %16 = vector.load %arg5[%c0_15, %c0_16, %c0_17] : memref<1x128x2xf32, #tpu.memory_space<vmem>>, vector<1x128x2xf32>
    %17 = vector.shape_cast %16 : vector<1x128x2xf32> to vector<128x2xf32>
    %cst_18 = arith.constant dense<0.000000e+00> : vector<256x2xf32>
    %18 = tpu.matmul %1, %17, %cst_18 {dimension_numbers = #tpu.dot_dimension_numbers<[1], [0], [0], [1], [0, 0, 1, 1], [], []>} : vector<256x128xf32>, vector<128x2xf32>, vector<256x2xf32> -> vector<256x2xf32>
    %c0_19 = arith.constant 0 : index
    %c0_20 = arith.constant 0 : index
    %c0_21 = arith.constant 0 : index
    %19 = vector.load %arg8[%c0_19, %c0_20, %c0_21] : memref<1x1x2xf32, #tpu.memory_space<vmem>>, vector<1x1x2xf32>
    %20 = vector.shape_cast %19 : vector<1x1x2xf32> to vector<1x2xf32>
    %21 = vector.broadcast %20 : vector<1x2xf32> to vector<256x2xf32>
    %22 = arith.addf %18, %21 : vector<256x2xf32>
    %cst_22 = arith.constant dense<0.000000e+00> : vector<256x256xf32>
    %23 = tpu.matmul %8, %15, %cst_22 {dimension_numbers = #tpu.dot_dimension_numbers<[1], [1], [0], [0], [0, 0, 1, 0], [], []>} : vector<256x2xf32>, vector<256x2xf32>, vector<256x256xf32> -> vector<256x256xf32>
    %c0_23 = arith.constant 0 : index
    %c0_24 = arith.constant 0 : index
    %c0_25 = arith.constant 0 : index
    %24 = vector.load %arg9[%c0_23, %c0_24, %c0_25] : memref<1x256x2xf32, #tpu.memory_space<vmem>>, vector<1x256x2xf32>
    %25 = vector.shape_cast %24 : vector<1x256x2xf32> to vector<256x2xf32>
    %cst_26 = arith.constant dense<0.000000e+00> : vector<256x256xf32>
    %26 = tpu.matmul %25, %8, %cst_26 {dimension_numbers = #tpu.dot_dimension_numbers<[1], [1], [0], [0], [0, 0, 1, 0], [], []>} : vector<256x2xf32>, vector<256x2xf32>, vector<256x256xf32> -> vector<256x256xf32>
    %27 = arith.addf %23, %26 : vector<256x256xf32>
    %cst_27 = arith.constant dense<0xFF800000> : vector<256xf32>
    %28 = vector.multi_reduction <maximumf>, %27, %cst_27 [1] : vector<256x256xf32> to vector<256xf32>
    %29 = vector.shape_cast %28 : vector<256xf32> to vector<256x1xf32>
    %30 = vector.broadcast %29 : vector<256x1xf32> to vector<256x256xf32>
    %31 = arith.subf %27, %30 : vector<256x256xf32>
    %32 = math.exp %31 : vector<256x256xf32>
    %cst_28 = arith.constant dense<0.000000e+00> : vector<256xf32>
    %33 = vector.multi_reduction <add>, %32, %cst_28 [1] : vector<256x256xf32> to vector<256xf32>
    %34 = vector.shape_cast %33 : vector<256xf32> to vector<256x1xf32>
    %35 = tpu.reciprocal %34 {approx = true} : vector<256x1xf32> -> vector<256x1xf32>
    %36 = vector.broadcast %35 : vector<256x1xf32> to vector<256x256xf32>
    %37 = arith.mulf %32, %36 : vector<256x256xf32>
    %cst_29 = arith.constant dense<0.000000e+00> : vector<256x2xf32>
    %38 = tpu.matmul %37, %22, %cst_29 {dimension_numbers = #tpu.dot_dimension_numbers<[1], [0], [0], [1], [0, 0, 1, 1], [], []>} : vector<256x256xf32>, vector<256x2xf32>, vector<256x2xf32> -> vector<256x2xf32>
    %c0_30 = arith.constant 0 : index
    %c0_31 = arith.constant 0 : index
    %c0_32 = arith.constant 0 : index
    %39 = vector.load %arg10[%c0_30, %c0_31, %c0_32] : memref<1x1x2xf32, #tpu.memory_space<vmem>>, vector<1x1x2xf32>
    %40 = vector.shape_cast %39 : vector<1x1x2xf32> to vector<1x2xf32>
    %41 = vector.broadcast %40 : vector<1x2xf32> to vector<256x2xf32>
    %42 = arith.mulf %38, %41 : vector<256x2xf32>
    %c0_33 = arith.constant 0 : index
    %c0_34 = arith.constant 0 : index
    %c0_35 = arith.constant 0 : index
    %43 = vector.load %arg11[%c0_33, %c0_34, %c0_35] : memref<1x1x2xf32, #tpu.memory_space<vmem>>, vector<1x1x2xf32>
    %44 = vector.shape_cast %43 : vector<1x1x2xf32> to vector<1x2xf32>
    %45 = vector.broadcast %44 : vector<1x2xf32> to vector<256x2xf32>
    %46 = arith.addf %42, %45 : vector<256x2xf32>
    %cst_36 = arith.constant 0.000000e+00 : f32
    %47 = vector.broadcast %cst_36 : f32 to vector<256x2xf32>
    %48 = arith.maximumf %46, %47 : vector<256x2xf32>
    %c0_37 = arith.constant 0 : index
    %c0_38 = arith.constant 0 : index
    %c0_39 = arith.constant 0 : index
    %c0_40 = arith.constant 0 : index
    %49 = vector.load %arg12[%c0_37, %c0_38, %c0_39, %c0_40] : memref<1x1x256x2xf32, #tpu.memory_space<vmem>>, vector<1x1x256x2xf32>
    %50 = vector.shape_cast %49 : vector<1x1x256x2xf32> to vector<256x2xf32>
    %51 = vector.shape_cast %48 : vector<256x2xf32> to vector<1x1x256x2xf32>
    tpu.vector_store %arg12[%c0_37, %c0_38, %c0_39, %c0_40], %51 {strides = array<i32>} : memref<1x1x256x2xf32, #tpu.memory_space<vmem>>, vector<1x1x256x2xf32>,
    return
  }
  func.func @transform_0(%arg0: i32, %arg1: i32) -> (i32, i32, i32) {
    %c0_i32 = arith.constant 0 : i32
    %c0_i32_0 = arith.constant 0 : i32
    %c0_i32_1 = arith.constant 0 : i32
    return %arg0, %c0_i32, %c0_i32_0 : i32, i32, i32
  }
  func.func @transform_1(%arg0: i32, %arg1: i32) -> (i32, i32, i32) {
    %c0_i32 = arith.constant 0 : i32
    %c0_i32_0 = arith.constant 0 : i32
    %c0_i32_1 = arith.constant 0 : i32
    return %arg1, %c0_i32, %c0_i32_0 : i32, i32, i32
  }
  func.func @transform_2(%arg0: i32, %arg1: i32) -> (i32, i32, i32) {
    %c0_i32 = arith.constant 0 : i32
    %c0_i32_0 = arith.constant 0 : i32
    %c0_i32_1 = arith.constant 0 : i32
    return %arg1, %c0_i32, %c0_i32_0 : i32, i32, i32
  }
  func.func @transform_3(%arg0: i32, %arg1: i32) -> (i32, i32, i32) {
    %c0_i32 = arith.constant 0 : i32
    %c0_i32_0 = arith.constant 0 : i32
    %c0_i32_1 = arith.constant 0 : i32
    return %arg1, %c0_i32, %c0_i32_0 : i32, i32, i32
  }
  func.func @transform_4(%arg0: i32, %arg1: i32) -> (i32, i32, i32) {
    %c0_i32 = arith.constant 0 : i32
    %c0_i32_0 = arith.constant 0 : i32
    %c0_i32_1 = arith.constant 0 : i32
    return %arg1, %c0_i32, %c0_i32_0 : i32, i32, i32
  }
  func.func @transform_5(%arg0: i32, %arg1: i32) -> (i32, i32, i32) {
    %c0_i32 = arith.constant 0 : i32
    %c0_i32_0 = arith.constant 0 : i32
    %c0_i32_1 = arith.constant 0 : i32
    return %arg1, %c0_i32, %c0_i32_0 : i32, i32, i32
  }
  func.func @transform_6(%arg0: i32, %arg1: i32) -> (i32, i32, i32) {
    %c0_i32 = arith.constant 0 : i32
    %c0_i32_0 = arith.constant 0 : i32
    %c0_i32_1 = arith.constant 0 : i32
    return %arg1, %c0_i32, %c0_i32_0 : i32, i32, i32
  }
  func.func @transform_7(%arg0: i32, %arg1: i32) -> (i32, i32, i32) {
    %c0_i32 = arith.constant 0 : i32
    %c0_i32_0 = arith.constant 0 : i32
    %c0_i32_1 = arith.constant 0 : i32
    return %arg1, %c0_i32, %c0_i32_0 : i32, i32, i32
  }
  func.func @transform_8(%arg0: i32, %arg1: i32) -> (i32, i32, i32) {
    %c0_i32 = arith.constant 0 : i32
    %c0_i32_0 = arith.constant 0 : i32
    %c0_i32_1 = arith.constant 0 : i32
    return %arg1, %c0_i32, %c0_i32_0 : i32, i32, i32
  }
  func.func @transform_9(%arg0: i32, %arg1: i32) -> (i32, i32, i32) {
    %c0_i32 = arith.constant 0 : i32
    %c0_i32_0 = arith.constant 0 : i32
    %c0_i32_1 = arith.constant 0 : i32
    return %arg1, %c0_i32, %c0_i32_0 : i32, i32, i32
  }
  func.func @transform_10(%arg0: i32, %arg1: i32) -> (i32, i32, i32, i32) {
    %c0_i32 = arith.constant 0 : i32
    %c0_i32_0 = arith.constant 0 : i32
    %c0_i32_1 = arith.constant 0 : i32
    return %arg0, %arg1, %c0_i32, %c0_i32_0 : i32, i32, i32, i32
  }
}

</mosaic_0001>

<bundles_post_ra>
// kernel: m_decoder_block_forward.3
= control target key start
LH: loop header
LB: loop body
LE: loop exit
PB: predicated region body
PF: predicated region fallthrough
CT: control target
= control target key end

     0   :  { %s4536_s13 = smov 0   ;;  %s4538_s14 = smov 0   ;;  %s6227_s0 = inlined_call_operand.vmem [shape: f32[2,256,128], index: 0, kind: input, shape index: {}]   ;;  %s6228_s1 = inlined_call_operand.vmem [shape: f32[4,128,2], index: 1, kind: input, shape index: {}]   ;;  %s6229_s2 = inlined_call_operand.vmem [shape: f32[4,128,2], index: 2, kind: input, shape index: {}]   ;;  %s6230_s3 = inlined_call_operand.vmem [shape: f32[4,128,2], index: 3, kind: input, shape index: {}]   ;;  %s6231_s4 = inlined_call_operand.vmem [shape: f32[4,1,2], index: 4, kind: input, shape index: {}]   ;;  %s6232_s5 = inlined_call_operand.vmem [shape: f32[4,1,2], index: 5, kind: input, shape index: {}]   ;;  %s6233_s6 = inlined_call_operand.vmem [shape: f32[4,1,2], index: 6, kind: input, shape index: {}]   ;;  %s6234_s7 = inlined_call_operand.vmem [shape: f32[4,256,2], index: 7, kind: input, shape index: {}]   ;;  %s6235_s8 = inlined_call_operand.vmem [shape: f32[4,1,2], index: 8, kind: input, shape index: {}]   ;;  %s6236_s9 = inlined_call_operand.vmem [shape: f32[4,1,2], index: 9, kind: input, shape index: {}]   ;;  %s6237_s10 = inlined_call_operand.vmem [shape: f32[2,4,256,2], index: 10, kind: output, shape index: {}]  }
   0x1   :  { %s4540_s15 = smov 0   ;;  %s4542_s16 = smov 0  }
   0x2   :  { %s4544_s17 = smov 0  }
   0x3 LB: > { %s29_s18 = sadd.s32 1, %s4470_s15  ;;  %s32_s19 = sadd.s32 1, %s4474_s16  ;;  %s4478_s17 = sphi %s4544_s17, %s20_s17   ;;  %s4474_s16 = sphi %s4542_s16, %s6478_s16   ;;  %s4470_s15 = sphi %s4540_s15, %s6477_s15   ;;  %s4466_s14 = sphi %s4538_s14, %s6476_s14   ;;  %s4462_s13 = sphi %s4536_s13, %s6475_s13  }
   0x4   : > { %p30_p0 = scmp.ge.s32.totalorder %s29_s18, 4  ;;  %p3173_p1 = scmp.ge.s32.totalorder %s4478_s17, 1 }
   0x5   : > { %p406_p2 = scmp.lt.s32.totalorder %s4478_s17, 9 }
   0x6   : > { %s6480_s18 = smov (%p30_p0, %s29_s18), 0  ;;  %s6482_s19 = smov (!%p30_p0, %s32_s19), %s4474_s16 }
   0x7   : > { %p407_p3 = pnand %p3173_p1, %p406_p2  ;;  %p34_p4 = scmp.ge.s32.totalorder %s6482_s19, 2 }
   0x9   : > { %s6484_s19 = smov (%p34_p4, %s6482_s19), 0  ;;  %410 = sbr.rel (%p407_p3) target bundleno = 1371 (0x55b), region = 60 }
  0x10   : > { %p488_p5 = scmp.lt.s32.totalorder %s4462_s13, 3  ;;  %p483_p6 = scmp.lt.s32.totalorder %s4466_s14, 1  ;;  %vm1340_vm0 = vcmask 15360  }
  0x11   : > { %vm4895_vm1 = vmpackc.low %vm1340_vm0, %vm1340_vm0 }
  0x12   : > { %s6486_s13 = smov (!%p488_p5, %s4462_s13), 3  ;;  %s6488_s14 = smov (!%p483_p6, %s4466_s14), 1 }
  0x13   : > { %s4571_s20 = sshll.u32 %s6486_s13, 7  ;;  %s3322_s24 = sshll.u32 %s6488_s14, 8 }
  0x14   : > { %s4577_s23 = scalar_lea.vmem %s6228_s1, %s4571_s20  ;;  %s4589_s27 = scalar_lea.vmem %s6227_s0, %s3322_s24 }
  0x15   : > { %v564_v0 = vld [vmem:[%s4577_s23] sm:$0xff]  ;;  %v565_v1 = vld [vmem:[%s4577_s23 + $0x8] sm:$0xff]  ;;  %v566_v2 = vld [vmem:[%s4577_s23 + $0x10] sm:$0xff]  ;;  %s4602_s30 = scalar_lea.vmem %s6229_s2, %s4571_s20  ;;  %s3326_s11 = sshll.u32 %s6486_s13, 8 }
  0x16   : > { %v3903_v3 = vpack.c.bf16 %v565_v1, %v564_v0  ;;  %v567_v4 = vld [vmem:[%s4577_s23 + $0x18] sm:$0xff]  ;;  %v568_v6 = vld [vmem:[%s4577_s23 + $0x20] sm:$0xff]  ;;  %v569_v7 = vld [vmem:[%s4577_s23 + $0x28] sm:$0xff]  ;;  %s4788_s22 = scalar_lea.vmem %s6234_s7, %s3326_s11  ;;  %s508_s25 = scalar_lea.vmem %s6232_s5, %s6486_s13 }
  0x17   : > { %v3907_v5 = vpack.c.bf16 %v567_v4, %v566_v2  ;;  %v3911_v8 = vpack.c.bf16 %v569_v7, %v568_v6  ;;  %v4592_v9 = vld [vmem:[%s4589_s27] sm:$0xff]  ;;  %v570_v10 = vld [vmem:[%s4577_s23 + $0x30] sm:$0xff]  ;;  %v571_v11 = vld [vmem:[%s4577_s23 + $0x38] sm:$0xff]  ;;  %s505_s28 = scalar_lea.vmem %s6231_s4, %s6486_s13  ;;  %s5322_s11 = scalar_lea.vmem %s6230_s3, %s4571_s20 }
  0x18   : > { %3904 = vmatprep.subr.bf16.mxu0 %v3903_v3  ;;  %3695 = vmatprep.mubr.f32.mxu0 %v4592_v9  ;;  %v3915_v12 = vpack.c.bf16 %v571_v11, %v570_v10  ;;  %v572_v13 = vld [vmem:[%s4577_s23 + $0x40] sm:$0xff]  ;;  %v573_v14 = vld [vmem:[%s4577_s23 + $0x48] sm:$0xff]  ;;  %v814_v18 = vld [vmem:[%s4602_s30 + $0x10] sm:$0xff]  ;;  %s511_s21 = scalar_lea.vmem %s6233_s6, %s6486_s13  ;;  %s519_s24 = scalar_lea.vmem %s6235_s8, %s6486_s13 }
  0x19   : > { %3906 = vmatpush3.bf16.msra.mxu0 %v3903_v3  ;;  %3775 = vmatprep.mubr.f32.mxu1 %v4592_v9  ;;  %v812_v15 = vld [vmem:[%s4602_s30] sm:$0xff]  ;;  %v813_v16 = vld [vmem:[%s4602_s30 + $0x8] sm:$0xff]  ;;  %v815_v19 = vld [vmem:[%s4602_s30 + $0x18] sm:$0xff]  ;;  %v3919_v20 = vpack.c.bf16 %v573_v14, %v572_v13  ;;  %s3185_s26 = sshll.u32 %s6488_s14, 7  ;;  %s522_s29 = scalar_lea.vmem %s6236_s9, %s6486_s13 }
  0x1a   : > { %3908 = vmatprep.subr.bf16.mxu0 %v3907_v5  ;;  %v3935_v17 = vpack.c.bf16 %v813_v16, %v812_v15  ;;  %v3939_v21 = vpack.c.bf16 %v815_v19, %v814_v18  ;;  %v816_v22 = vld [vmem:[%s4602_s30 + $0x20] sm:$0xff]  ;;  %v817_v23 = vld [vmem:[%s4602_s30 + $0x28] sm:$0xff]  ;;  %v574_v24 = vld [vmem:[%s4577_s23 + $0x50] sm:$0xff] }
  0x1b   : > { %v575_v25 = vld [vmem:[%s4577_s23 + $0x58] sm:$0xff]  ;;  %v3943_v26 = vpack.c.bf16 %v817_v23, %v816_v22  ;;  %v818_v28 = vld [vmem:[%s4602_s30 + $0x30] sm:$0xff]  ;;  %v576_v30 = vld [vmem:[%s4577_s23 + $0x60] sm:$0xff] }
  0x1c   : > { %3936 = vmatprep.subr.bf16.mxu1 %v3935_v17  ;;  %v3923_v27 = vpack.c.bf16 %v575_v25, %v574_v24  ;;  %v819_v29 = vld [vmem:[%s4602_s30 + $0x38] sm:$0xff]  ;;  %v577_v31 = vld [vmem:[%s4577_s23 + $0x68] sm:$0xff]  ;;  %v820_v34 = vld [vmem:[%s4602_s30 + $0x40] sm:$0xff] }
  0x1d   : > { %3910 = vmatpush3.bf16.msra.mxu0 %v3907_v5  ;;  %3938 = vmatpush3.bf16.msra.mxu1 %v3935_v17  ;;  %v3947_v32 = vpack.c.bf16 %v819_v29, %v818_v28  ;;  %v3927_v33 = vpack.c.bf16 %v577_v31, %v576_v30  ;;  %v821_v35 = vld [vmem:[%s4602_s30 + $0x48] sm:$0xff]  ;;  %v578_v36 = vld [vmem:[%s4577_s23 + $0x70] sm:$0xff]  ;;  %v579_v37 = vld [vmem:[%s4577_s23 + $0x78] sm:$0xff] }
  0x1e   : > { %3912 = vmatprep.subr.bf16.mxu0 %v3911_v8  ;;  %3940 = vmatprep.subr.bf16.mxu1 %v3939_v21  ;;  %v3951_v38 = vpack.c.bf16 %v821_v35, %v820_v34  ;;  %v3931_v39 = vpack.c.bf16 %v579_v37, %v578_v36  ;;  %v822_v40 = vld [vmem:[%s4602_s30 + $0x50] sm:$0xff]  ;;  %v823_v41 = vld [vmem:[%s4602_s30 + $0x58] sm:$0xff]  ;;  %v824_v43 = vld [vmem:[%s4602_s30 + $0x60] sm:$0xff] }
  0x1f   : > { %v3955_v42 = vpack.c.bf16 %v823_v41, %v822_v40  ;;  %v825_v44 = vld [vmem:[%s4602_s30 + $0x68] sm:$0xff]  ;;  %v4630_v47 = vld [vmem:[%s4589_s27 + $0x10] sm:$0xff]  ;;  %v827_v49 = vld [vmem:[%s4602_s30 + $0x78] sm:$0xff] }
  0x20   : > { %v4627_v45 = vld [vmem:[%s4589_s27 + $0x8] sm:$0xff]  ;;  %v3959_v46 = vpack.c.bf16 %v825_v44, %v824_v43  ;;  %6319 = vst [vmem:[#allocation3_spill] sm:$0xff] %v4630_v47  ;;  %v826_v48 = vld [vmem:[%s4602_s30 + $0x70] sm:$0xff]  ;;  %v4637_v50 = vld [vmem:[%s4589_s27 + $0x18] sm:$0xff] }
  0x21   : > { %3914 = vmatpush3.bf16.msra.mxu0 %v3911_v8  ;;  %3942 = vmatpush3.bf16.msra.mxu1 %v3939_v21  ;;  %6318 = vst [vmem:[#allocation2_spill] sm:$0xff] %v4627_v45  ;;  %6320 = vst [vmem:[#allocation4_spill] sm:$0xff] %v4637_v50  ;;  %v3963_v51 = vpack.c.bf16 %v827_v49, %v826_v48  ;;  %v4640_v52 = vld [vmem:[%s4589_s27 + $0x20] sm:$0xff]  ;;  %v4645_v53 = vld [vmem:[%s4589_s27 + $0x28] sm:$0xff] }
  0x22   : > { %3916 = vmatprep.subr.bf16.mxu0 %v3915_v12  ;;  %3944 = vmatprep.subr.bf16.mxu1 %v3943_v26  ;;  %6321 = vst [vmem:[#allocation5_spill] sm:$0xff] %v4640_v52  ;;  %6322 = vst [vmem:[#allocation6_spill] sm:$0xff] %v4645_v53  ;;  %v4648_v54 = vld [vmem:[%s4589_s27 + $0x30] sm:$0xff]  ;;  %v4653_v55 = vld [vmem:[%s4589_s27 + $0x38] sm:$0xff] }
  0x23   : > { %6323 = vst [vmem:[#allocation7_spill] sm:$0xff] %v4648_v54  ;;  %6324 = vst [vmem:[#allocation8_spill] sm:$0xff] %v4653_v55  ;;  %v4656_v56 = vld [vmem:[%s4589_s27 + $0x40] sm:$0xff]  ;;  %v4663_v57 = vld [vmem:[%s4589_s27 + $0x48] sm:$0xff] }
  0x24   : > { %6325 = vst [vmem:[#allocation9_spill] sm:$0xff] %v4656_v56  ;;  %6326 = vst [vmem:[#allocation10_spill] sm:$0xff] %v4663_v57  ;;  %v4666_v58 = vld [vmem:[%s4589_s27 + $0x50] sm:$0xff]  ;;  %v4673_v59 = vld [vmem:[%s4589_s27 + $0x58] sm:$0xff] }
  0x25   : > { %3918 = vmatpush3.bf16.msra.mxu0 %v3915_v12  ;;  %3946 = vmatpush3.bf16.msra.mxu1 %v3943_v26  ;;  %6327 = vst [vmem:[#allocation11_spill] sm:$0xff] %v4666_v58  ;;  %6328 = vst [vmem:[#allocation12_spill] sm:$0xff] %v4673_v59  ;;  %v4676_v60 = vld [vmem:[%s4589_s27 + $0x60] sm:$0xff]  ;;  %v4683_v61 = vld [vmem:[%s4589_s27 + $0x68] sm:$0xff] }
  0x26   : > { %3920 = vmatprep.subr.bf16.mxu0 %v3919_v20  ;;  %3948 = vmatprep.subr.bf16.mxu1 %v3947_v32  ;;  %6329 = vst [vmem:[#allocation13_spill] sm:$0xff] %v4676_v60  ;;  %6330 = vst [vmem:[#allocation14_spill] sm:$0xff] %v4683_v61  ;;  %v4686_v62 = vld [vmem:[%s4589_s27 + $0x70] sm:$0xff]  ;;  %v4693_v63 = vld [vmem:[%s4589_s27 + $0x78] sm:$0xff] }
  0x27   : > { %6331 = vst [vmem:[#allocation15_spill] sm:$0xff] %v4686_v62  ;;  %6332 = vst [vmem:[#allocation16_spill] sm:$0xff] %v4693_v63  ;;  %v4696_v0 = vld [vmem:[%s4589_s27 + $0x80] sm:$0xff]  ;;  %v4703_v1 = vld [vmem:[%s4589_s27 + $0x88] sm:$0xff] }
  0x28   : > { %6333 = vst [vmem:[#allocation17_spill] sm:$0xff] %v4696_v0  ;;  %6334 = vst [vmem:[#allocation18_spill] sm:$0xff] %v4703_v1  ;;  %v4706_v2 = vld [vmem:[%s4589_s27 + $0x90] sm:$0xff]  ;;  %v4713_v3 = vld [vmem:[%s4589_s27 + $0x98] sm:$0xff] }
  0x29   : > { %3922 = vmatpush3.bf16.msra.mxu0 %v3919_v20  ;;  %3950 = vmatpush3.bf16.msra.mxu1 %v3947_v32  ;;  %6335 = vst [vmem:[#allocation19_spill] sm:$0xff] %v4706_v2  ;;  %6336 = vst [vmem:[#allocation20_spill] sm:$0xff] %v4713_v3  ;;  %v4716_v4 = vld [vmem:[%s4589_s27 + $0xa0] sm:$0xff]  ;;  %v4723_v5 = vld [vmem:[%s4589_s27 + $0xa8] sm:$0xff] }
  0x2a   : > { %3924 = vmatprep.subr.bf16.mxu0 %v3923_v27  ;;  %3952 = vmatprep.subr.bf16.mxu1 %v3951_v38  ;;  %6337 = vst [vmem:[#allocation21_spill] sm:$0xff] %v4716_v4  ;;  %6338 = vst [vmem:[#allocation22_spill] sm:$0xff] %v4723_v5  ;;  %v4726_v6 = vld [vmem:[%s4589_s27 + $0xb0] sm:$0xff]  ;;  %v4733_v7 = vld [vmem:[%s4589_s27 + $0xb8] sm:$0xff] }
  0x2b   : > { %6339 = vst [vmem:[#allocation23_spill] sm:$0xff] %v4726_v6  ;;  %6340 = vst [vmem:[#allocation24_spill] sm:$0xff] %v4733_v7  ;;  %v4736_v8 = vld [vmem:[%s4589_s27 + $0xc0] sm:$0xff]  ;;  %v4743_v10 = vld [vmem:[%s4589_s27 + $0xc8] sm:$0xff] }
  0x2c   : > { %6341 = vst [vmem:[#allocation25_spill] sm:$0xff] %v4736_v8  ;;  %6342 = vst [vmem:[#allocation26_spill] sm:$0xff] %v4743_v10  ;;  %v4746_v11 = vld [vmem:[%s4589_s27 + $0xd0] sm:$0xff]  ;;  %v4753_v12 = vld [vmem:[%s4589_s27 + $0xd8] sm:$0xff] }
  0x2d   : > { %3926 = vmatpush3.bf16.msra.mxu0 %v3923_v27  ;;  %3954 = vmatpush3.bf16.msra.mxu1 %v3951_v38  ;;  %6343 = vst [vmem:[#allocation27_spill] sm:$0xff] %v4746_v11  ;;  %6344 = vst [vmem:[#allocation28_spill] sm:$0xff] %v4753_v12  ;;  %v4756_v13 = vld [vmem:[%s4589_s27 + $0xe0] sm:$0xff]  ;;  %v4763_v14 = vld [vmem:[%s4589_s27 + $0xe8] sm:$0xff] }
  0x2e   : > { %3928 = vmatprep.subr.bf16.mxu0 %v3927_v33  ;;  %3956 = vmatprep.subr.bf16.mxu1 %v3955_v42  ;;  %6345 = vst [vmem:[#allocation29_spill] sm:$0xff] %v4756_v13  ;;  %6346 = vst [vmem:[#allocation30_spill] sm:$0xff] %v4763_v14  ;;  %v4766_v15 = vld [vmem:[%s4589_s27 + $0xf0] sm:$0xff]  ;;  %v4773_v16 = vld [vmem:[%s4589_s27 + $0xf8] sm:$0xff] }
  0x2f   : > { %6347 = vst [vmem:[#allocation31_spill] sm:$0xff] %v4766_v15  ;;  %6348 = vst [vmem:[#allocation32_spill] sm:$0xff] %v4773_v16  ;;  %v4791_v17 = vld [vmem:[%s4788_s22] sm:$0xff] }
  0x30   : > { %v4807_v23 = vld [vmem:[%s508_s25] ss:$0 sm:$0xff]  ;;  %s3184_s25 = sshll.u32 %s6486_s13, 5 }
  0x31   : > { %3930 = vmatpush3.bf16.msra.mxu0 %v3927_v33  ;;  %3958 = vmatpush3.bf16.msra.mxu1 %v3955_v42  ;;  %s529_s30 = sadd.s32 %s3185_s26, %s3184_s25 }
  0x32   : > { %3932 = vmatprep.subr.bf16.mxu0 %v3931_v39  ;;  %3960 = vmatprep.subr.bf16.mxu1 %v3959_v46 }
  0x35   : > { %3934 = vmatpush3.bf16.msra.mxu0 %v3931_v39  ;;  %3962 = vmatpush3.bf16.msra.mxu1 %v3959_v46 }
  0x36   : > { %3964 = vmatprep.subr.bf16.mxu1 %v3963_v51 }
  0x38   : > { %3696 = vmatmul.mubr.f32.vlgmr.msra.gmra.mrb[0].mxu0 %v4627_v45 }
  0x39   : > { %3698 = vmatprep.mubr.f32.mxu0 %v4630_v47  ;;  %3966 = vmatpush3.bf16.msra.mxu1 %v3963_v51 }
  0x3c   : > { %3699 = vmatmul.mubr.f32.gmra.mrb[2].mxu0 %v4637_v50  ;;  %3776 = vmatmul.mubr.f32.vlgmr.msra.gmra.mrb[0].mxu1 %v4627_v45 }
  0x3d   : > { %3701 = vmatprep.mubr.f32.mxu0 %v4640_v52  ;;  %3778 = vmatprep.mubr.f32.mxu1 %v4630_v47 }
  0x40   : > { %3702 = vmatmul.mubr.f32.gmra.mrb[4].mxu0 %v4645_v53  ;;  %3779 = vmatmul.mubr.f32.gmra.mrb[2].mxu1 %v4637_v50 }
  0x41   : > { %3704 = vmatprep.mubr.f32.mxu0 %v4648_v54  ;;  %3781 = vmatprep.mubr.f32.mxu1 %v4640_v52 }
  0x44   : > { %3705 = vmatmul.mubr.f32.gmra.mrb[6].mxu0 %v4653_v55  ;;  %3782 = vmatmul.mubr.f32.gmra.mrb[4].mxu1 %v4645_v53 }
  0x45   : > { %3707 = vmatprep.mubr.f32.mxu0 %v4656_v56  ;;  %3784 = vmatprep.mubr.f32.mxu1 %v4648_v54 }
  0x48   : > { %3708 = vmatmul.mubr.f32.gmra.mrb[8].mxu0 %v4663_v57  ;;  %3785 = vmatmul.mubr.f32.gmra.mrb[6].mxu1 %v4653_v55 }
  0x49   : > { %3710 = vmatprep.mubr.f32.mxu0 %v4666_v58  ;;  %3787 = vmatprep.mubr.f32.mxu1 %v4656_v56 }
  0x4c   : > { %3711 = vmatmul.mubr.f32.gmra.mrb[10].mxu0 %v4673_v59  ;;  %3788 = vmatmul.mubr.f32.gmra.mrb[8].mxu1 %v4663_v57 }
  0x4d   : > { %3713 = vmatprep.mubr.f32.mxu0 %v4676_v60  ;;  %3790 = vmatprep.mubr.f32.mxu1 %v4666_v58 }
  0x50   : > { %3714 = vmatmul.mubr.f32.gmra.mrb[12].mxu0 %v4683_v61  ;;  %3791 = vmatmul.mubr.f32.gmra.mrb[10].mxu1 %v4673_v59 }
  0x51   : > { %3716 = vmatprep.mubr.f32.mxu0 %v4686_v62  ;;  %3793 = vmatprep.mubr.f32.mxu1 %v4676_v60 }
  0x54   : > { %3717 = vmatmul.mubr.f32.gmra.mrb[14].mxu0 %v4693_v63  ;;  %3794 = vmatmul.mubr.f32.gmra.mrb[12].mxu1 %v4683_v61 }
  0x55   : > { %3719 = vmatprep.mubr.f32.mxu0 %v4696_v0  ;;  %3796 = vmatprep.mubr.f32.mxu1 %v4686_v62 }
  0x58   : > { %3720 = vmatmul.mubr.f32.gmra.mrb[16].mxu0 %v4703_v1  ;;  %3797 = vmatmul.mubr.f32.gmra.mrb[14].mxu1 %v4693_v63 }
  0x59   : > { %3722 = vmatprep.mubr.f32.mxu0 %v4706_v2  ;;  %3799 = vmatprep.mubr.f32.mxu1 %v4696_v0 }
  0x5c   : > { %3723 = vmatmul.mubr.f32.gmra.mrb[18].mxu0 %v4713_v3  ;;  %3800 = vmatmul.mubr.f32.gmra.mrb[16].mxu1 %v4703_v1 }
  0x5d   : > { %3725 = vmatprep.mubr.f32.mxu0 %v4716_v4  ;;  %3802 = vmatprep.mubr.f32.mxu1 %v4706_v2 }
  0x60   : > { %3726 = vmatmul.mubr.f32.gmra.mrb[20].mxu0 %v4723_v5  ;;  %3803 = vmatmul.mubr.f32.gmra.mrb[18].mxu1 %v4713_v3 }
  0x61   : > { %3728 = vmatprep.mubr.f32.mxu0 %v4726_v6  ;;  %3805 = vmatprep.mubr.f32.mxu1 %v4716_v4 }
  0x64   : > { %3729 = vmatmul.mubr.f32.gmra.mrb[22].mxu0 %v4733_v7  ;;  %3806 = vmatmul.mubr.f32.gmra.mrb[20].mxu1 %v4723_v5 }
  0x65   : > { %3731 = vmatprep.mubr.f32.mxu0 %v4736_v8  ;;  %3808 = vmatprep.mubr.f32.mxu1 %v4726_v6 }
  0x68   : > { %3732 = vmatmul.mubr.f32.gmra.mrb[24].mxu0 %v4743_v10  ;;  %3809 = vmatmul.mubr.f32.gmra.mrb[22].mxu1 %v4733_v7 }
  0x69   : > { %3734 = vmatprep.mubr.f32.mxu0 %v4746_v11  ;;  %3811 = vmatprep.mubr.f32.mxu1 %v4736_v8 }
  0x6c   : > { %3735 = vmatmul.mubr.f32.gmra.mrb[26].mxu0 %v4753_v12  ;;  %3812 = vmatmul.mubr.f32.gmra.mrb[24].mxu1 %v4743_v10 }
  0x6d   : > { %3737 = vmatprep.mubr.f32.mxu0 %v4756_v13  ;;  %3814 = vmatprep.mubr.f32.mxu1 %v4746_v11 }
  0x70   : > { %3738 = vmatmul.mubr.f32.gmra.mrb[28].mxu0 %v4763_v14  ;;  %3815 = vmatmul.mubr.f32.gmra.mrb[26].mxu1 %v4753_v12 }
  0x71   : > { %3740 = vmatprep.mubr.f32.mxu0 %v4766_v15  ;;  %3817 = vmatprep.mubr.f32.mxu1 %v4756_v13 }
  0x74   : > { %3741 = vmatmul.mubr.f32.gmra.mrb[30].mxu0 %v4773_v16  ;;  %3818 = vmatmul.mubr.f32.gmra.mrb[28].mxu1 %v4763_v14 }
  0x75   : > { %3855 = vmatprep.mubr.f32.mxu0 %v4592_v9  ;;  %3820 = vmatprep.mubr.f32.mxu1 %v4766_v15 }
  0x78   : > { %3821 = vmatmul.mubr.f32.gmra.mrb[30].mxu1 %v4773_v16 }
  0x79   : > { %3503 = vmatprep.mubr.msk.f32.mxu1 %vm1340_vm0, %v4791_v17 }
 0x10b   : > { %v3697_v9 = vpop.f32.mrb[0].mxu0 }
 0x10c   : > { %v653_v18 = vpop.f32.mrb[1].mxu0 }
 0x10f   : > { %v4795_v19 = vpop.f32.mrb[2].mxu0  ;;  %v3777_v24 = vpop.f32.mrb[0].mxu1 }
 0x110   : > { %v4797_v20 = vpop.f32.mrb[3].mxu0  ;;  %v4812_v26 = vadd.f32 %v3777_v24, %v4807_v23  ;;  %v901_v27 = vpop.f32.mrb[1].mxu1 }
 0x111   : > { %v4817_v29 = vadd.f32 %v4807_v23, %v901_v27 }
 0x113   : > { %v4803_v21 = vpop.f32.mrb[4].mxu0  ;;  %v3780_v31 = vpop.f32.mrb[2].mxu1 }
 0x114   : > { %v4805_v22 = vpop.f32.mrb[5].mxu0  ;;  %v4824_v33 = vadd.f32 %v3780_v31, %v4807_v23  ;;  %v911_v34 = vpop.f32.mrb[3].mxu1 }
 0x115   : > { %v4829_v36 = vadd.f32 %v4807_v23, %v911_v34 }
 0x117   : > { %v4809_v25 = vpop.f32.mrb[6].mxu0  ;;  %v3783_v38 = vpop.f32.mrb[4].mxu1 }
 0x118   : > { %v4814_v28 = vpop.f32.mrb[7].mxu0  ;;  %v4836_v40 = vadd.f32 %v3783_v38, %v4807_v23  ;;  %v921_v41 = vpop.f32.mrb[5].mxu1 }
 0x119   : > { %v4841_v43 = vadd.f32 %v4807_v23, %v921_v41 }
 0x11b   : > { %v4821_v32 = vpop.f32.mrb[8].mxu0  ;;  %v3786_v46 = vpop.f32.mrb[6].mxu1 }
 0x11c   : > { %v4826_v35 = vpop.f32.mrb[9].mxu0  ;;  %v4848_v49 = vadd.f32 %v3786_v46, %v4807_v23  ;;  %v931_v51 = vpop.f32.mrb[7].mxu1 }
 0x11d   : > { %v4853_v27 = vadd.f32 %v4807_v23, %v931_v51  ;;  %v4871_v51 = vld [vmem:[%s505_s28] ss:$0 sm:$0xff] }
 0x11e   : > { %v4882_v13 = vadd.f32 %v4871_v51, %v653_v18 }
 0x11f   : > { %v4833_v39 = vpop.f32.mrb[10].mxu0  ;;  %v3789_v34 = vpop.f32.mrb[8].mxu1 }
 0x120   : > { %v4838_v42 = vpop.f32.mrb[11].mxu0  ;;  %v4864_v41 = vadd.f32 %v3789_v34, %v4807_v23  ;;  %v941_v46 = vpop.f32.mrb[9].mxu1  ;;  %v4879_v34 = vadd.f32 %v3697_v9, %v4871_v51 }
 0x121   : > { %v4869_v37 = vadd.f32 %v4807_v23, %v941_v46 }
 0x123   : > { %v4845_v48 = vpop.f32.mrb[12].mxu0  ;;  %v3792_v16 = vpop.f32.mrb[10].mxu1 }
 0x124   : > { %v4850_v24 = vpop.f32.mrb[13].mxu0  ;;  %v4876_v31 = vadd.f32 %v3792_v16, %v4807_v23  ;;  %v951_v14 = vpop.f32.mrb[11].mxu1  ;;  %v1328_v16 = vld [vmem:[%s4788_s22 + $0xa0] sm:$0xff] }
 0x125   : > { %v4888_v11 = vadd.f32 %v4807_v23, %v951_v14 }
 0x127   : > { %v4861_v38 = vpop.f32.mrb[14].mxu0  ;;  %v3795_v18 = vpop.f32.mrb[12].mxu1 }
 0x128   : > { %v4866_v44 = vpop.f32.mrb[15].mxu0  ;;  %v4904_v14 = vadd.f32 %v3795_v18, %v4807_v23  ;;  %v961_v8 = vpop.f32.mrb[13].mxu1 }
 0x129   : > { %v4912_v5 = vadd.f32 %v4807_v23, %v961_v8 }
 0x12b   : > { %v3721_v15 = vpop.f32.mrb[16].mxu0  ;;  %v3798_v4 = vpop.f32.mrb[14].mxu1 }
 0x12c   : > { %v4885_v46 = vadd.f32 %v3721_v15, %v4871_v51  ;;  %v733_v12 = vpop.f32.mrb[17].mxu0  ;;  %v4926_v8 = vadd.f32 %v3798_v4, %v4807_v23  ;;  %v971_v2 = vpop.f32.mrb[15].mxu1 }
 0x12d   : > { %v4891_v30 = vadd.f32 %v4871_v51, %v733_v12  ;;  %v4002_v12 = vpack.c.bf16 %v4879_v34, %v4882_v13  ;;  %v4940_v1 = vadd.f32 %v4807_v23, %v971_v2 }
 0x12f   : > { %v3999_v15 = vpack.c.bf16 %v4885_v46, %v4891_v30  ;;  %v3724_v10 = vpop.f32.mrb[18].mxu0  ;;  %v3801_v0 = vpop.f32.mrb[16].mxu1 }
 0x130   : > { %v4909_v7 = vadd.f32 %v3724_v10, %v4871_v51  ;;  %v743_v6 = vpop.f32.mrb[19].mxu0  ;;  %v981_v62 = vpop.f32.mrb[17].mxu1 }
 0x131   : > { %4001 = vmatprep.subr.msk.bf16.mxu1 %vm4895_vm1, %v3999_v15  ;;  %v4917_v9 = vadd.f32 %v4871_v51, %v743_v6  ;;  %v4930_v15 = vadd.f32 %v4795_v19, %v4871_v51  ;;  %v4934_v6 = vadd.f32 %v4871_v51, %v4797_v20 }
 0x132   : > { %6351 = vst [vmem:[#allocation33_spill] sm:$0xff] %v4909_v7  ;;  %4004 = vmatpush3.bf16.xpose.msk.msra.mxu1 %vm4895_vm1, %v4002_v12 }
 0x133   : > { %6352 = vst [vmem:[#allocation34_spill] sm:$0xff] %v4917_v9  ;;  %v4005_v10 = vpack.c.bf16 %v4909_v7, %v4917_v9  ;;  %v3727_v3 = vpop.f32.mrb[20].mxu0  ;;  %v4008_v2 = vpack.c.bf16 %v4930_v15, %v4934_v6  ;;  %v3804_v19 = vpop.f32.mrb[18].mxu1 }
 0x134   : > { %v4937_v12 = vadd.f32 %v3727_v3, %v4871_v51  ;;  %v753_v18 = vpop.f32.mrb[21].mxu0  ;;  %v4952_v3 = vadd.f32 %v3801_v0, %v4807_v23  ;;  %v991_v58 = vpop.f32.mrb[19].mxu1 }
 0x135   : > { %4007 = vmatprep.subr.msk.bf16.mxu1 %vm4895_vm1, %v4005_v10  ;;  %v4945_v4 = vadd.f32 %v4871_v51, %v753_v18  ;;  %v4957_v10 = vadd.f32 %v4807_v23, %v981_v62  ;;  %v4972_v62 = vadd.f32 %v3804_v19, %v4807_v23  ;;  %v4980_v18 = vadd.f32 %v4871_v51, %v4805_v22 }
 0x136   : > { %6353 = vst [vmem:[#allocation35_spill] sm:$0xff] %v4937_v12 }
 0x137   : > { %6354 = vst [vmem:[#allocation36_spill] sm:$0xff] %v4945_v4  ;;  %v4011_v20 = vpack.c.bf16 %v4937_v12, %v4945_v4  ;;  %v3730_v63 = vpop.f32.mrb[22].mxu0  ;;  %v3807_v57 = vpop.f32.mrb[20].mxu1 }
 0x138   : > { %v763_v61 = vpop.f32.mrb[23].mxu0  ;;  %v4966_v0 = vadd.f32 %v3730_v63, %v4871_v51  ;;  %v4983_v63 = vadd.f32 %v4807_v23, %v991_v58  ;;  %v4990_v55 = vadd.f32 %v3807_v57, %v4807_v23  ;;  %v5018_v58 = vadd.f32 %v4871_v51, %v4814_v28 }
 0x139   : > { %v4969_v60 = vadd.f32 %v4871_v51, %v763_v61 }
 0x13a   : > { %4010 = vmatpush3.bf16.xpose.msk.msra.mxu1 %vm4895_vm1, %v4008_v2  ;;  %6355 = vst [vmem:[#allocation37_spill] sm:$0xff] %v4966_v0  ;;  %v4976_v2 = vadd.f32 %v4803_v21, %v4871_v51  ;;  %v1001_v21 = vpop.f32.mrb[21].mxu1 }
 0x13b   : > { %4013 = vmatprep.subr.msk.bf16.mxu1 %vm4895_vm1, %v4011_v20  ;;  %6356 = vst [vmem:[#allocation38_spill] sm:$0xff] %v4969_v60  ;;  %v3733_v59 = vpop.f32.mrb[24].mxu0  ;;  %v4017_v19 = vpack.c.bf16 %v4966_v0, %v4969_v60  ;;  %v4995_v53 = vadd.f32 %v4807_v23, %v1001_v21  ;;  %v3810_v61 = vpop.f32.mrb[22].mxu1 }
 0x13c   : > { %v773_v20 = vpop.f32.mrb[25].mxu0  ;;  %v4014_v22 = vpack.c.bf16 %v4976_v2, %v4980_v18  ;;  %v5004_v57 = vadd.f32 %v3733_v59, %v4871_v51  ;;  %v5010_v21 = vadd.f32 %v3810_v61, %v4807_v23  ;;  %v1011_v47 = vpop.f32.mrb[23].mxu1 }
 0x13d   : > { %v5007_v52 = vadd.f32 %v4871_v51, %v773_v20  ;;  %v5021_v59 = vadd.f32 %v4807_v23, %v1011_v47  ;;  %v5056_v47 = vadd.f32 %v4871_v51, %v4826_v35 }
 0x13e   : > { %6357 = vst [vmem:[#allocation39_spill] sm:$0xff] %v5004_v57 }
 0x13f   : > { %v3736_v56 = vpop.f32.mrb[26].mxu0  ;;  %6358 = vst [vmem:[#allocation40_spill] sm:$0xff] %v5007_v52  ;;  %v3813_v45 = vpop.f32.mrb[24].mxu1  ;;  %v4023_v61 = vpack.c.bf16 %v5004_v57, %v5007_v52 }
 0x140   : > { %v783_v54 = vpop.f32.mrb[27].mxu0  ;;  %v5028_v60 = vadd.f32 %v3813_v45, %v4807_v23  ;;  %v5042_v45 = vadd.f32 %v3736_v56, %v4871_v51 }
 0x141   : > { %v5045_v57 = vadd.f32 %v4871_v51, %v783_v54 }
 0x142   : > { %4016 = vmatpush3.bf16.xpose.msk.msra.mxu1 %vm4895_vm1, %v4014_v22  ;;  %v5014_v22 = vadd.f32 %v4809_v25, %v4871_v51  ;;  %v1021_v25 = vpop.f32.mrb[25].mxu1  ;;  %6359 = vst [vmem:[#allocation41_spill] sm:$0xff] %v5042_v45 }
 0x143   : > { %4019 = vmatprep.subr.msk.bf16.mxu1 %vm4895_vm1, %v4017_v19  ;;  %v3739_v50 = vpop.f32.mrb[28].mxu0  ;;  %v5033_v4 = vadd.f32 %v4807_v23, %v1021_v25  ;;  %v3816_v20 = vpop.f32.mrb[26].mxu1  ;;  %6360 = vst [vmem:[#allocation42_spill] sm:$0xff] %v5045_v57 }
 0x144   : > { %v793_v19 = vpop.f32.mrb[29].mxu0  ;;  %v4020_v28 = vpack.c.bf16 %v5014_v22, %v5018_v58  ;;  %v5048_v52 = vadd.f32 %v3816_v20, %v4807_v23  ;;  %v1031_v25 = vpop.f32.mrb[27].mxu1  ;;  %v4029_v20 = vpack.c.bf16 %v5042_v45, %v5045_v57 }
 0x145   : > { %v5083_v45 = vadd.f32 %v4871_v51, %v793_v19 }
 0x147   : > { %v3742_v0 = vpop.f32.mrb[30].mxu0  ;;  %v3819_v54 = vpop.f32.mrb[28].mxu1 }
 0x148   : > { %v803_v12 = vpop.f32.mrb[31].mxu0  ;;  %v5066_v7 = vadd.f32 %v3819_v54, %v4807_v23  ;;  %v1041_v9 = vpop.f32.mrb[29].mxu1  ;;  %v5080_v54 = vadd.f32 %v3739_v50, %v4871_v51 }
 0x149   : > { %v5071_v35 = vadd.f32 %v4807_v23, %v1041_v9 }
 0x14a   : > { %4022 = vmatpush3.bf16.xpose.msk.msra.mxu1 %vm4895_vm1, %v4020_v28  ;;  %v5052_v28 = vadd.f32 %v4821_v32, %v4871_v51  ;;  %v4035_v19 = vpack.c.bf16 %v5080_v54, %v5083_v45 }
 0x14b   : > { %4025 = vmatprep.subr.msk.bf16.mxu1 %vm4895_vm1, %v4023_v61  ;;  %v5059_v61 = vadd.f32 %v4807_v23, %v1031_v25  ;;  %v3822_v56 = vpop.f32.mrb[30].mxu1  ;;  %v5094_v25 = vadd.f32 %v4871_v51, %v4838_v42  ;;  %v5117_v42 = vadd.f32 %v4845_v48, %v4871_v51  ;;  %v5133_v48 = vadd.f32 %v4861_v38, %v4871_v51  ;;  %v1310_v38 = vld [vmem:[%s4788_s22 + $0x10] sm:$0xff] }
 0x14c   : > { %v4026_v32 = vpack.c.bf16 %v5052_v28, %v5056_v47  ;;  %v5086_v57 = vadd.f32 %v3822_v56, %v4807_v23  ;;  %v1051_v9 = vpop.f32.mrb[31].mxu1 }
 0x152   : > { %4028 = vmatpush3.bf16.xpose.msk.msra.mxu1 %vm4895_vm1, %v4026_v32  ;;  %v5090_v32 = vadd.f32 %v4833_v39, %v4871_v51  ;;  %v5110_v39 = vadd.f32 %v3742_v0, %v4871_v51  ;;  %v6361_v0 = vpack.c.bf16 %v4952_v3, %v4957_v10  ;;  %v6365_v3 = vpack.c.bf16 %v4990_v55, %v4995_v53  ;;  %v1313_v10 = vld [vmem:[%s4788_s22 + $0x28] sm:$0xff]  ;;  %v1314_v53 = vld [vmem:[%s4788_s22 + $0x30] sm:$0xff] }
 0x153   : > { %4031 = vmatprep.subr.msk.bf16.mxu1 %vm4895_vm1, %v4029_v20  ;;  %v5097_v20 = vadd.f32 %v4807_v23, %v1051_v9  ;;  %v5113_v23 = vadd.f32 %v4871_v51, %v803_v12  ;;  %v5121_v9 = vadd.f32 %v4871_v51, %v4850_v24  ;;  %v5137_v24 = vadd.f32 %v4871_v51, %v4866_v44 }
 0x154   : > { %v4032_v56 = vpack.c.bf16 %v5090_v32, %v5094_v25  ;;  %v6362_v44 = vpack.c.bf16 %v4812_v26, %v4817_v29  ;;  %v6363_v51 = vpack.c.bf16 %v4972_v62, %v4983_v63  ;;  %v6364_v26 = vpack.c.bf16 %v4824_v33, %v4829_v36  ;;  %v1312_v29 = vld [vmem:[%s4788_s22 + $0x20] sm:$0xff]  ;;  %v1315_v36 = vld [vmem:[%s4788_s22 + $0x38] sm:$0xff]  ;;  %v1317_v63 = vld [vmem:[%s4788_s22 + $0x48] sm:$0xff] }
 0x155   : > { %v4089_v50 = vpack.c.bf16 %v5086_v57, %v5097_v20  ;;  %v4044_v12 = vpack.c.bf16 %v5133_v48, %v5137_v24  ;;  %v6366_v33 = vpack.c.bf16 %v4836_v40, %v4841_v43  ;;  %v6367_v55 = vpack.c.bf16 %v5010_v21, %v5021_v59  ;;  %v1316_v43 = vld [vmem:[%s4788_s22 + $0x40] sm:$0xff]  ;;  %v1321_v21 = vld [vmem:[%s4788_s22 + $0x68] sm:$0xff]  ;;  %v1326_v59 = vld [vmem:[%s4788_s22 + $0x90] sm:$0xff] }
 0x156   : > { %v6368_v40 = vpack.c.bf16 %v4848_v49, %v4853_v27  ;;  %v6369_v62 = vpack.c.bf16 %v5028_v60, %v5033_v4  ;;  %v6370_v49 = vpack.c.bf16 %v4864_v41, %v4869_v37  ;;  %v1318_v60 = vld [vmem:[%s4788_s22 + $0x50] sm:$0xff]  ;;  %v6371_v27 = vpack.c.bf16 %v5048_v52, %v5059_v61  ;;  %v1319_v4 = vld [vmem:[%s4788_s22 + $0x58] sm:$0xff]  ;;  %v1320_v52 = vld [vmem:[%s4788_s22 + $0x60] sm:$0xff] }
 0x157   : > { %v6372_v37 = vpack.c.bf16 %v4876_v31, %v4888_v11  ;;  %v6373_v41 = vpack.c.bf16 %v5066_v7, %v5071_v35  ;;  %v6374_v11 = vpack.c.bf16 %v4904_v14, %v4912_v5  ;;  %v1322_v7 = vld [vmem:[%s4788_s22 + $0x70] sm:$0xff]  ;;  %v1323_v31 = vld [vmem:[%s4788_s22 + $0x78] sm:$0xff]  ;;  %v6375_v5 = vpack.c.bf16 %v4926_v8, %v4940_v1  ;;  %v1324_v14 = vld [vmem:[%s4788_s22 + $0x80] sm:$0xff] }
 0x158   : > { %v1325_v57 = vld [vmem:[%s4788_s22 + $0x88] sm:$0xff]  ;;  %v1327_v1 = vld [vmem:[%s4788_s22 + $0x98] sm:$0xff]  ;;  %v1330_v61 = vld [vmem:[%s4788_s22 + $0xb0] sm:$0xff] }
 0x159   : > { %v1329_v8 = vld [vmem:[%s4788_s22 + $0xa8] sm:$0xff]  ;;  %v1331_v35 = vld [vmem:[%s4788_s22 + $0xb8] sm:$0xff]  ;;  %v1332_v20 = vld [vmem:[%s4788_s22 + $0xc0] sm:$0xff] }
 0x15a   : > { %4034 = vmatpush3.bf16.xpose.msk.msra.mxu1 %vm4895_vm1, %v4032_v56  ;;  %v4041_v56 = vpack.c.bf16 %v5110_v39, %v5113_v23 }
 0x15b   : > { %4037 = vmatprep.subr.msk.bf16.mxu1 %vm4895_vm1, %v4035_v19  ;;  %v4038_v19 = vpack.c.bf16 %v5117_v42, %v5121_v9 }
 0x162   : > { %4040 = vmatpush3.bf16.xpose.msk.msra.mxu1 %vm4895_vm1, %v4038_v19  ;;  %v1334_v19 = vld [vmem:[%s4788_s22 + $0xd0] sm:$0xff] }
 0x163   : > { %4043 = vmatprep.subr.msk.bf16.mxu1 %vm4895_vm1, %v4041_v56  ;;  %v1309_v56 = vld [vmem:[%s4788_s22 + $0x8] sm:$0xff] }
 0x16a   : > { %4046 = vmatpush3.bf16.xpose.msk.msra.mxu1 %vm4895_vm1, %v4044_v12  ;;  %v1335_v12 = vld [vmem:[%s4788_s22 + $0xd8] sm:$0xff] }
 0x16b   : > { %4049 = vmatprep.subr.msk.bf16.mxu1 %vm4895_vm1, %v6361_v0  ;;  %v1336_v0 = vld [vmem:[%s4788_s22 + $0xe0] sm:$0xff] }
 0x171   : > { %3504 = vmatmul.mubr.msk.f32.vlgmr.msra.gmra.mrb[32].mxu1 %vm1340_vm0, %v4791_v17  ;;  %v1311_v17 = vld [vmem:[%s4788_s22 + $0x18] sm:$0xff] }
 0x172   : > { %4052 = vmatpush3.bf16.xpose.msk.msra.mxu1 %vm4895_vm1, %v6362_v44  ;;  %3505 = vmatprep.mubr.msk.f32.mxu1 %vm1340_vm0, %v1309_v56  ;;  %v1338_v44 = vld [vmem:[%s4788_s22 + $0xf0] sm:$0xff] }
 0x173   : > { %4055 = vmatprep.subr.msk.bf16.mxu1 %vm4895_vm1, %v6363_v51  ;;  %v1060_v51 = vld [vmem:[%s5322_s11] sm:$0xff] }
 0x175   : > { %3506 = vmatmul.mubr.msk.f32.gmra.mrb[34].mxu1 %vm1340_vm0, %v1309_v56  ;;  %v1337_v56 = vld [vmem:[%s4788_s22 + $0xe8] sm:$0xff] }
 0x176   : > { %3507 = vmatprep.mubr.msk.f32.mxu1 %vm1340_vm0, %v1310_v38 }
 0x179   : > { %3508 = vmatmul.mubr.msk.f32.gmra.mrb[36].mxu1 %vm1340_vm0, %v1310_v38  ;;  %v1339_v38 = vld [vmem:[%s4788_s22 + $0xf8] sm:$0xff] }
 0x17a   : > { %4058 = vmatpush3.bf16.xpose.msk.msra.mxu1 %vm4895_vm1, %v6364_v26  ;;  %3509 = vmatprep.mubr.msk.f32.mxu1 %vm1340_vm0, %v1311_v17  ;;  %v1062_v26 = vld [vmem:[%s5322_s11 + $0x10] sm:$0xff] }
 0x17b   : > { %4061 = vmatprep.subr.msk.bf16.mxu1 %vm4895_vm1, %v6365_v3  ;;  %v1063_v3 = vld [vmem:[%s5322_s11 + $0x18] sm:$0xff] }
 0x17d   : > { %3510 = vmatmul.mubr.msk.f32.gmra.mrb[38].mxu1 %vm1340_vm0, %v1311_v17  ;;  %v1061_v17 = vld [vmem:[%s5322_s11 + $0x8] sm:$0xff] }
 0x17e   : > { %3511 = vmatprep.mubr.msk.f32.mxu1 %vm1340_vm0, %v1312_v29 }
 0x181   : > { %3512 = vmatmul.mubr.msk.f32.gmra.mrb[40].mxu1 %vm1340_vm0, %v1312_v29  ;;  %v3967_v29 = vpack.c.bf16 %v1061_v17, %v1060_v51  ;;  %v6416_v51 = vld [vmem:[#allocation32_spill] sm:$0xff] }
 0x182   : > { %4064 = vmatpush3.bf16.xpose.msk.msra.mxu1 %vm4895_vm1, %v6366_v33  ;;  %3513 = vmatprep.mubr.msk.f32.mxu1 %vm1340_vm0, %v1313_v10  ;;  %v1064_v33 = vld [vmem:[%s5322_s11 + $0x20] sm:$0xff] }
 0x183   : > { %4067 = vmatprep.subr.msk.bf16.mxu1 %vm4895_vm1, %v6367_v55  ;;  %3968 = vmatprep.subr.bf16.mxu0 %v3967_v29 }
 0x184   : > { %3970 = vmatpush3.bf16.msra.mxu0 %v3967_v29 }
 0x185   : > { %3514 = vmatmul.mubr.msk.f32.gmra.mrb[42].mxu1 %vm1340_vm0, %v1313_v10  ;;  %v3971_v10 = vpack.c.bf16 %v1063_v3, %v1062_v26 }
 0x186   : > { %3515 = vmatprep.mubr.msk.f32.mxu1 %vm1340_vm0, %v1314_v53 }
 0x187   : > { %3972 = vmatprep.subr.bf16.mxu0 %v3971_v10 }
 0x188   : > { %3974 = vmatpush3.bf16.msra.mxu0 %v3971_v10 }
 0x189   : > { %3516 = vmatmul.mubr.msk.f32.gmra.mrb[44].mxu1 %vm1340_vm0, %v1314_v53  ;;  %v1065_v53 = vld [vmem:[%s5322_s11 + $0x28] sm:$0xff] }
 0x18a   : > { %4070 = vmatpush3.bf16.xpose.msk.msra.mxu1 %vm4895_vm1, %v6368_v40  ;;  %3517 = vmatprep.mubr.msk.f32.mxu1 %vm1340_vm0, %v1315_v36  ;;  %v3975_v55 = vpack.c.bf16 %v1065_v53, %v1064_v33  ;;  %v1067_v40 = vld [vmem:[%s5322_s11 + $0x38] sm:$0xff] }
 0x18b   : > { %4073 = vmatprep.subr.msk.bf16.mxu1 %vm4895_vm1, %v6369_v62 }
 0x18c   : > { %3976 = vmatprep.subr.bf16.mxu0 %v3975_v55 }
 0x18d   : > { %3518 = vmatmul.mubr.msk.f32.gmra.mrb[46].mxu1 %vm1340_vm0, %v1315_v36  ;;  %v1066_v36 = vld [vmem:[%s5322_s11 + $0x30] sm:$0xff]  ;;  %3978 = vmatpush3.bf16.msra.mxu0 %v3975_v55 }
 0x18e   : > { %3519 = vmatprep.mubr.msk.f32.mxu1 %vm1340_vm0, %v1316_v43 }
 0x191   : > { %3520 = vmatmul.mubr.msk.f32.gmra.mrb[48].mxu1 %vm1340_vm0, %v1316_v43  ;;  %v3979_v43 = vpack.c.bf16 %v1067_v40, %v1066_v36 }
 0x192   : > { %4076 = vmatpush3.bf16.xpose.msk.msra.mxu1 %vm4895_vm1, %v6370_v49  ;;  %3521 = vmatprep.mubr.msk.f32.mxu1 %vm1340_vm0, %v1317_v63  ;;  %v1075_v49 = vld [vmem:[%s5322_s11 + $0x78] sm:$0xff] }
 0x193   : > { %4079 = vmatprep.subr.msk.bf16.mxu1 %vm4895_vm1, %v6371_v27  ;;  %3980 = vmatprep.subr.bf16.mxu0 %v3979_v43  ;;  %v6386_v27 = vld [vmem:[#allocation2_spill] sm:$0xff] }
 0x194   : > { %3982 = vmatpush3.bf16.msra.mxu0 %v3979_v43 }
 0x195   : > { %3522 = vmatmul.mubr.msk.f32.gmra.mrb[50].mxu1 %vm1340_vm0, %v1317_v63  ;;  %v1074_v63 = vld [vmem:[%s5322_s11 + $0x70] sm:$0xff] }
 0x196   : > { %3523 = vmatprep.mubr.msk.f32.mxu1 %vm1340_vm0, %v1318_v60 }
 0x199   : > { %3524 = vmatmul.mubr.msk.f32.gmra.mrb[52].mxu1 %vm1340_vm0, %v1318_v60  ;;  %v3995_v60 = vpack.c.bf16 %v1075_v49, %v1074_v63 }
 0x19a   : > { %4082 = vmatpush3.bf16.xpose.msk.msra.mxu1 %vm4895_vm1, %v6372_v37  ;;  %3525 = vmatprep.mubr.msk.f32.mxu1 %vm1340_vm0, %v1319_v4  ;;  %v6390_v37 = vld [vmem:[#allocation6_spill] sm:$0xff] }
 0x19b   : > { %4085 = vmatprep.subr.msk.bf16.mxu1 %vm4895_vm1, %v6373_v41  ;;  %v6392_v41 = vld [vmem:[#allocation8_spill] sm:$0xff] }
 0x19d   : > { %3526 = vmatmul.mubr.msk.f32.gmra.mrb[54].mxu1 %vm1340_vm0, %v1319_v4  ;;  %v6388_v4 = vld [vmem:[#allocation4_spill] sm:$0xff] }
 0x19e   : > { %3527 = vmatprep.mubr.msk.f32.mxu1 %vm1340_vm0, %v1320_v52 }
 0x1a1   : > { %3528 = vmatmul.mubr.msk.f32.gmra.mrb[56].mxu1 %vm1340_vm0, %v1320_v52  ;;  %v6391_v52 = vld [vmem:[#allocation7_spill] sm:$0xff] }
 0x1a2   : > { %4088 = vmatpush3.bf16.xpose.msk.msra.mxu1 %vm4895_vm1, %v6374_v11  ;;  %3529 = vmatprep.mubr.msk.f32.mxu1 %vm1340_vm0, %v1321_v21  ;;  %v6395_v11 = vld [vmem:[#allocation11_spill] sm:$0xff] }
 0x1a3   : > { %4091 = vmatprep.subr.msk.bf16.mxu1 %vm4895_vm1, %v4089_v50  ;;  %v1333_v50 = vld [vmem:[%s4788_s22 + $0xc8] sm:$0xff] }
 0x1a5   : > { %3530 = vmatmul.mubr.msk.f32.gmra.mrb[58].mxu1 %vm1340_vm0, %v1321_v21  ;;  %v6393_v21 = vld [vmem:[#allocation9_spill] sm:$0xff] }
 0x1a6   : > { %3531 = vmatprep.mubr.msk.f32.mxu1 %vm1340_vm0, %v1322_v7 }
 0x1a9   : > { %3532 = vmatmul.mubr.msk.f32.gmra.mrb[60].mxu1 %vm1340_vm0, %v1322_v7  ;;  %v6396_v7 = vld [vmem:[#allocation12_spill] sm:$0xff] }
 0x1aa   : > { %4094 = vmatpush3.bf16.xpose.msk.msra.mxu1 %vm4895_vm1, %v6375_v5  ;;  %3533 = vmatprep.mubr.msk.f32.mxu1 %vm1340_vm0, %v1323_v31  ;;  %v6398_v5 = vld [vmem:[#allocation14_spill] sm:$0xff] }
 0x1ad   : > { %3534 = vmatmul.mubr.msk.f32.gmra.mrb[62].mxu1 %vm1340_vm0, %v1323_v31  ;;  %v6397_v31 = vld [vmem:[#allocation13_spill] sm:$0xff] }
 0x1ae   : > { %3535 = vmatprep.mubr.msk.f32.mxu1 %vm1340_vm0, %v1324_v14 }
 0x1b1   : > { %3536 = vmatmul.mubr.msk.f32.gmra.mrb[64].mxu1 %vm1340_vm0, %v1324_v14  ;;  %v6400_v14 = vld [vmem:[#allocation16_spill] sm:$0xff] }
 0x1b2   : > { %3537 = vmatprep.mubr.msk.f32.mxu1 %vm1340_vm0, %v1325_v57 }
 0x1b5   : > { %3538 = vmatmul.mubr.msk.f32.gmra.mrb[66].mxu1 %vm1340_vm0, %v1325_v57  ;;  %v6401_v57 = vld [vmem:[#allocation17_spill] sm:$0xff] }
 0x1b6   : > { %3539 = vmatprep.mubr.msk.f32.mxu1 %vm1340_vm0, %v1326_v59 }
 0x1b9   : > { %3540 = vmatmul.mubr.msk.f32.gmra.mrb[68].mxu1 %vm1340_vm0, %v1326_v59  ;;  %v6402_v59 = vld [vmem:[#allocation18_spill] sm:$0xff] }
 0x1ba   : > { %3541 = vmatprep.mubr.msk.f32.mxu1 %vm1340_vm0, %v1327_v1 }
 0x1bd   : > { %3542 = vmatmul.mubr.msk.f32.gmra.mrb[70].mxu1 %vm1340_vm0, %v1327_v1  ;;  %v6403_v1 = vld [vmem:[#allocation19_spill] sm:$0xff] }
 0x1be   : > { %3543 = vmatprep.mubr.msk.f32.mxu1 %vm1340_vm0, %v1328_v16 }
 0x1c1   : > { %3544 = vmatmul.mubr.msk.f32.gmra.mrb[72].mxu1 %vm1340_vm0, %v1328_v16  ;;  %v6404_v16 = vld [vmem:[#allocation20_spill] sm:$0xff] }
 0x1c2   : > { %3545 = vmatprep.mubr.msk.f32.mxu1 %vm1340_vm0, %v1329_v8 }
 0x1c5   : > { %3546 = vmatmul.mubr.msk.f32.gmra.mrb[74].mxu1 %vm1340_vm0, %v1329_v8  ;;  %v6405_v8 = vld [vmem:[#allocation21_spill] sm:$0xff] }
 0x1c6   : > { %3547 = vmatprep.mubr.msk.f32.mxu1 %vm1340_vm0, %v1330_v61 }
 0x1c9   : > { %3548 = vmatmul.mubr.msk.f32.gmra.mrb[76].mxu1 %vm1340_vm0, %v1330_v61  ;;  %v6406_v61 = vld [vmem:[#allocation22_spill] sm:$0xff] }
 0x1ca   : > { %3549 = vmatprep.mubr.msk.f32.mxu1 %vm1340_vm0, %v1331_v35 }
 0x1cd   : > { %3550 = vmatmul.mubr.msk.f32.gmra.mrb[78].mxu1 %vm1340_vm0, %v1331_v35  ;;  %v6407_v35 = vld [vmem:[#allocation23_spill] sm:$0xff] }
 0x1ce   : > { %3551 = vmatprep.mubr.msk.f32.mxu1 %vm1340_vm0, %v1332_v20 }
 0x1d1   : > { %3552 = vmatmul.mubr.msk.f32.gmra.mrb[80].mxu1 %vm1340_vm0, %v1332_v20  ;;  %v6408_v20 = vld [vmem:[#allocation24_spill] sm:$0xff] }
 0x1d2   : > { %3553 = vmatprep.mubr.msk.f32.mxu1 %vm1340_vm0, %v1333_v50 }
 0x1d5   : > { %3554 = vmatmul.mubr.msk.f32.gmra.mrb[82].mxu1 %vm1340_vm0, %v1333_v50  ;;  %v6409_v50 = vld [vmem:[#allocation25_spill] sm:$0xff] }
 0x1d6   : > { %3555 = vmatprep.mubr.msk.f32.mxu1 %vm1340_vm0, %v1334_v19 }
 0x1d9   : > { %3556 = vmatmul.mubr.msk.f32.gmra.mrb[84].mxu1 %vm1340_vm0, %v1334_v19  ;;  %v6410_v19 = vld [vmem:[#allocation26_spill] sm:$0xff] }
 0x1da   : > { %3557 = vmatprep.mubr.msk.f32.mxu1 %vm1340_vm0, %v1335_v12 }
 0x1dd   : > { %3558 = vmatmul.mubr.msk.f32.gmra.mrb[86].mxu1 %vm1340_vm0, %v1335_v12  ;;  %v6411_v12 = vld [vmem:[#allocation27_spill] sm:$0xff] }
 0x1de   : > { %3559 = vmatprep.mubr.msk.f32.mxu1 %vm1340_vm0, %v1336_v0 }
 0x1e1   : > { %3560 = vmatmul.mubr.msk.f32.gmra.mrb[88].mxu1 %vm1340_vm0, %v1336_v0  ;;  %v6412_v0 = vld [vmem:[#allocation28_spill] sm:$0xff] }
 0x1e2   : > { %3561 = vmatprep.mubr.msk.f32.mxu1 %vm1340_vm0, %v1337_v56 }
 0x1e5   : > { %3562 = vmatmul.mubr.msk.f32.gmra.mrb[90].mxu1 %vm1340_vm0, %v1337_v56  ;;  %v6413_v56 = vld [vmem:[#allocation29_spill] sm:$0xff] }
 0x1e6   : > { %3563 = vmatprep.mubr.msk.f32.mxu1 %vm1340_vm0, %v1338_v44 }
 0x1e9   : > { %3564 = vmatmul.mubr.msk.f32.gmra.mrb[92].mxu1 %vm1340_vm0, %v1338_v44  ;;  %v6414_v44 = vld [vmem:[#allocation30_spill] sm:$0xff] }
 0x1ea   : > { %3565 = vmatprep.mubr.msk.f32.mxu1 %vm1340_vm0, %v1339_v38 }
 0x1ed   : > { %3566 = vmatmul.mubr.msk.f32.gmra.mrb[94].mxu1 %vm1340_vm0, %v1339_v38  ;;  %v6415_v38 = vld [vmem:[#allocation31_spill] sm:$0xff] }
 0x1ee   : > { %3599 = vmatprep.mubr.msk.f32.mxu1 %vm1340_vm0, %v4882_v13 }
 0x1f1   : > { %3600 = vmatmul.mubr.msk.f32.vlgmr.msra.gmra.mrb[32].mxu1 %vm1340_vm0, %v4882_v13  ;;  %v6376_v13 = vld [vmem:[#allocation34_spill] sm:$0xff] }
 0x1f2   : > { %3601 = vmatprep.mubr.msk.f32.mxu1 %vm1340_vm0, %v4879_v34 }
 0x1f5   : > { %3602 = vmatmul.mubr.msk.f32.gmra.mrb[34].mxu1 %vm1340_vm0, %v4879_v34  ;;  %v6377_v34 = vld [vmem:[#allocation33_spill] sm:$0xff] }
 0x1f6   : > { %3603 = vmatprep.mubr.msk.f32.mxu1 %vm1340_vm0, %v4934_v6 }
 0x1f9   : > { %3604 = vmatmul.mubr.msk.f32.gmra.mrb[36].mxu1 %vm1340_vm0, %v4934_v6  ;;  %v1068_v6 = vld [vmem:[%s5322_s11 + $0x40] sm:$0xff] }
 0x1fa   : > { %3605 = vmatprep.mubr.msk.f32.mxu1 %vm1340_vm0, %v4930_v15 }
 0x1fd   : > { %3606 = vmatmul.mubr.msk.f32.gmra.mrb[38].mxu1 %vm1340_vm0, %v4930_v15  ;;  %v6378_v15 = vld [vmem:[#allocation36_spill] sm:$0xff] }
 0x1fe   : > { %3607 = vmatprep.mubr.msk.f32.mxu1 %vm1340_vm0, %v4980_v18 }
 0x201   : > { %3608 = vmatmul.mubr.msk.f32.gmra.mrb[40].mxu1 %vm1340_vm0, %v4980_v18  ;;  %v1069_v18 = vld [vmem:[%s5322_s11 + $0x48] sm:$0xff] }
 0x202   : > { %3609 = vmatprep.mubr.msk.f32.mxu1 %vm1340_vm0, %v4976_v2 }
 0x205   : > { %3610 = vmatmul.mubr.msk.f32.gmra.mrb[42].mxu1 %vm1340_vm0, %v4976_v2  ;;  %v6381_v2 = vld [vmem:[#allocation37_spill] sm:$0xff] }
 0x206   : > { %3611 = vmatprep.mubr.msk.f32.mxu1 %vm1340_vm0, %v5018_v58 }
 0x209   : > { %3612 = vmatmul.mubr.msk.f32.gmra.mrb[44].mxu1 %vm1340_vm0, %v5018_v58  ;;  %v3983_v58 = vpack.c.bf16 %v1069_v18, %v1068_v6 }
 0x20a   : > { %3613 = vmatprep.mubr.msk.f32.mxu1 %vm1340_vm0, %v5014_v22 }
 0x20b   : > { %3984 = vmatprep.subr.bf16.mxu0 %v3983_v58 }
 0x20c   : > { %3986 = vmatpush3.bf16.msra.mxu0 %v3983_v58 }
 0x20d   : > { %3614 = vmatmul.mubr.msk.f32.gmra.mrb[46].mxu1 %vm1340_vm0, %v5014_v22  ;;  %v6382_v22 = vld [vmem:[#allocation40_spill] sm:$0xff] }
 0x20e   : > { %3615 = vmatprep.mubr.msk.f32.mxu1 %vm1340_vm0, %v5056_v47 }
 0x211   : > { %3616 = vmatmul.mubr.msk.f32.gmra.mrb[48].mxu1 %vm1340_vm0, %v5056_v47  ;;  %v1070_v47 = vld [vmem:[%s5322_s11 + $0x50] sm:$0xff] }
 0x212   : > { %3617 = vmatprep.mubr.msk.f32.mxu1 %vm1340_vm0, %v5052_v28 }
 0x215   : > { %3618 = vmatmul.mubr.msk.f32.gmra.mrb[50].mxu1 %vm1340_vm0, %v5052_v28  ;;  %v1071_v28 = vld [vmem:[%s5322_s11 + $0x58] sm:$0xff] }
 0x216   : > { %3619 = vmatprep.mubr.msk.f32.mxu1 %vm1340_vm0, %v5094_v25 }
 0x219   : > { %3620 = vmatmul.mubr.msk.f32.gmra.mrb[52].mxu1 %vm1340_vm0, %v5094_v25  ;;  %v6383_v25 = vld [vmem:[#allocation39_spill] sm:$0xff] }
 0x21a   : > { %3621 = vmatprep.mubr.msk.f32.mxu1 %vm1340_vm0, %v5090_v32 }
 0x21d   : > { %3622 = vmatmul.mubr.msk.f32.gmra.mrb[54].mxu1 %vm1340_vm0, %v5090_v32  ;;  %v3987_v32 = vpack.c.bf16 %v1071_v28, %v1070_v47 }
 0x21e   : > { %3623 = vmatprep.mubr.msk.f32.mxu1 %vm1340_vm0, %v5121_v9 }
 0x21f   : > { %3988 = vmatprep.subr.bf16.mxu0 %v3987_v32 }
 0x220   : > { %3990 = vmatpush3.bf16.msra.mxu0 %v3987_v32 }
 0x221   : > { %3624 = vmatmul.mubr.msk.f32.gmra.mrb[56].mxu1 %vm1340_vm0, %v5121_v9  ;;  %v1072_v9 = vld [vmem:[%s5322_s11 + $0x60] sm:$0xff] }
 0x222   : > { %3625 = vmatprep.mubr.msk.f32.mxu1 %vm1340_vm0, %v5117_v42 }
 0x225   : > { %3626 = vmatmul.mubr.msk.f32.gmra.mrb[58].mxu1 %vm1340_vm0, %v5117_v42  ;;  %v6384_v42 = vld [vmem:[#allocation42_spill] sm:$0xff] }
 0x226   : > { %3627 = vmatprep.mubr.msk.f32.mxu1 %vm1340_vm0, %v5137_v24 }
 0x229   : > { %3628 = vmatmul.mubr.msk.f32.gmra.mrb[60].mxu1 %vm1340_vm0, %v5137_v24  ;;  %v6385_v24 = vld [vmem:[#allocation41_spill] sm:$0xff] }
 0x22a   : > { %3629 = vmatprep.mubr.msk.f32.mxu1 %vm1340_vm0, %v5133_v48 }
 0x22d   : > { %3630 = vmatmul.mubr.msk.f32.gmra.mrb[62].mxu1 %vm1340_vm0, %v5133_v48  ;;  %v1073_v48 = vld [vmem:[%s5322_s11 + $0x68] sm:$0xff]  ;;  %s3186_s11 = sshll.u32 %s529_s30, 3 }
 0x22e   : > { %3631 = vmatprep.mubr.msk.f32.mxu1 %vm1340_vm0, %v4891_v30  ;;  %v3991_v62 = vpack.c.bf16 %v1073_v48, %v1072_v9  ;;  %s6084_s14 = scalar_lea.vmem %s6237_s10, %s3186_s11 }
 0x230   : > { %3992 = vmatprep.subr.bf16.mxu0 %v3991_v62 }
 0x231   : > { %3632 = vmatmul.mubr.msk.f32.gmra.mrb[64].mxu1 %vm1340_vm0, %v4891_v30  ;;  %v6379_v30 = vld [vmem:[#allocation35_spill] sm:$0xff]  ;;  %3994 = vmatpush3.bf16.msra.mxu0 %v3991_v62 }
 0x232   : > { %3633 = vmatprep.mubr.msk.f32.mxu1 %vm1340_vm0, %v4885_v46  ;;  %3996 = vmatprep.subr.bf16.mxu0 %v3995_v60 }
 0x235   : > { %3634 = vmatmul.mubr.msk.f32.gmra.mrb[66].mxu1 %vm1340_vm0, %v4885_v46  ;;  %v6380_v46 = vld [vmem:[#allocation38_spill] sm:$0xff]  ;;  %3998 = vmatpush3.bf16.msra.mxu0 %v3995_v60 }
 0x236   : > { %3635 = vmatprep.mubr.msk.f32.mxu1 %vm1340_vm0, %v6376_v13 }
 0x238   : > { %3856 = vmatmul.mubr.f32.vlgmr.msra.gmra.mrb[32].mxu0 %v6386_v27 }
 0x239   : > { %3636 = vmatmul.mubr.msk.f32.gmra.mrb[68].mxu1 %vm1340_vm0, %v6376_v13 }
 0x23a   : > { %3637 = vmatprep.mubr.msk.f32.mxu1 %vm1340_vm0, %v6377_v34 }
 0x23d   : > { %3638 = vmatmul.mubr.msk.f32.gmra.mrb[70].mxu1 %vm1340_vm0, %v6377_v34 }
 0x23e   : > { %3639 = vmatprep.mubr.msk.f32.mxu1 %vm1340_vm0, %v6378_v15 }
 0x241   : > { %3640 = vmatmul.mubr.msk.f32.gmra.mrb[72].mxu1 %vm1340_vm0, %v6378_v15 }
 0x242   : > { %3641 = vmatprep.mubr.msk.f32.mxu1 %vm1340_vm0, %v6379_v30 }
 0x245   : > { %3642 = vmatmul.mubr.msk.f32.gmra.mrb[74].mxu1 %vm1340_vm0, %v6379_v30 }
 0x246   : > { %3643 = vmatprep.mubr.msk.f32.mxu1 %vm1340_vm0, %v6380_v46 }
 0x249   : > { %3644 = vmatmul.mubr.msk.f32.gmra.mrb[76].mxu1 %vm1340_vm0, %v6380_v46 }
 0x24a   : > { %3645 = vmatprep.mubr.msk.f32.mxu1 %vm1340_vm0, %v6381_v2 }
 0x24d   : > { %3646 = vmatmul.mubr.msk.f32.gmra.mrb[78].mxu1 %vm1340_vm0, %v6381_v2 }
 0x24e   : > { %3647 = vmatprep.mubr.msk.f32.mxu1 %vm1340_vm0, %v6382_v22 }
 0x251   : > { %3648 = vmatmul.mubr.msk.f32.gmra.mrb[80].mxu1 %vm1340_vm0, %v6382_v22 }
 0x252   : > { %3649 = vmatprep.mubr.msk.f32.mxu1 %vm1340_vm0, %v6383_v25 }
 0x255   : > { %3650 = vmatmul.mubr.msk.f32.gmra.mrb[82].mxu1 %vm1340_vm0, %v6383_v25 }
 0x256   : > { %3651 = vmatprep.mubr.msk.f32.mxu1 %vm1340_vm0, %v6384_v42 }
 0x259   : > { %3652 = vmatmul.mubr.msk.f32.gmra.mrb[84].mxu1 %vm1340_vm0, %v6384_v42 }
 0x25a   : > { %3653 = vmatprep.mubr.msk.f32.mxu1 %vm1340_vm0, %v6385_v24 }
 0x25d   : > { %3654 = vmatmul.mubr.msk.f32.gmra.mrb[86].mxu1 %vm1340_vm0, %v6385_v24 }
 0x25e   : > { %3655 = vmatprep.mubr.msk.f32.mxu1 %vm1340_vm0, %v5083_v45 }
 0x261   : > { %3656 = vmatmul.mubr.msk.f32.gmra.mrb[88].mxu1 %vm1340_vm0, %v5083_v45  ;;  %v6387_v45 = vld [vmem:[#allocation3_spill] sm:$0xff] }
 0x262   : > { %3657 = vmatprep.mubr.msk.f32.mxu1 %vm1340_vm0, %v5080_v54  ;;  %3858 = vmatprep.mubr.f32.mxu0 %v6387_v45 }
 0x263   : > { %3859 = vmatmul.mubr.f32.gmra.mrb[34].mxu0 %v6388_v4 }
 0x265   : > { %3658 = vmatmul.mubr.msk.f32.gmra.mrb[90].mxu1 %vm1340_vm0, %v5080_v54  ;;  %v6389_v54 = vld [vmem:[#allocation5_spill] sm:$0xff] }
 0x266   : > { %3659 = vmatprep.mubr.msk.f32.mxu1 %vm1340_vm0, %v5113_v23  ;;  %3861 = vmatprep.mubr.f32.mxu0 %v6389_v54 }
 0x267   : > { %3862 = vmatmul.mubr.f32.gmra.mrb[36].mxu0 %v6390_v37 }
 0x268   : > { %3864 = vmatprep.mubr.f32.mxu0 %v6391_v52 }
 0x269   : > { %3660 = vmatmul.mubr.msk.f32.gmra.mrb[92].mxu1 %vm1340_vm0, %v5113_v23  ;;  %v6394_v23 = vld [vmem:[#allocation10_spill] sm:$0xff] }
 0x26a   : > { %3661 = vmatprep.mubr.msk.f32.mxu1 %vm1340_vm0, %v5110_v39 }
 0x26b   : > { %3865 = vmatmul.mubr.f32.gmra.mrb[38].mxu0 %v6392_v41 }
 0x26c   : > { %3867 = vmatprep.mubr.f32.mxu0 %v6393_v21 }
 0x26d   : > { %3662 = vmatmul.mubr.msk.f32.gmra.mrb[94].mxu1 %vm1340_vm0, %v5110_v39  ;;  %v6399_v39 = vld [vmem:[#allocation15_spill] sm:$0xff] }
 0x26f   : > { %3868 = vmatmul.mubr.f32.gmra.mrb[40].mxu0 %v6394_v23 }
 0x270   : > { %3870 = vmatprep.mubr.f32.mxu0 %v6395_v11 }
 0x273   : > { %3871 = vmatmul.mubr.f32.gmra.mrb[42].mxu0 %v6396_v7 }
 0x274   : > { %3873 = vmatprep.mubr.f32.mxu0 %v6397_v31 }
 0x277   : > { %3874 = vmatmul.mubr.f32.gmra.mrb[44].mxu0 %v6398_v5 }
 0x278   : > { %3876 = vmatprep.mubr.f32.mxu0 %v6399_v39 }
 0x27b   : > { %3877 = vmatmul.mubr.f32.gmra.mrb[46].mxu0 %v6400_v14 }
 0x27c   : > { %3879 = vmatprep.mubr.f32.mxu0 %v6401_v57 }
 0x27f   : > { %3880 = vmatmul.mubr.f32.gmra.mrb[48].mxu0 %v6402_v59 }
 0x280   : > { %3882 = vmatprep.mubr.f32.mxu0 %v6403_v1 }
 0x283   : > { %3883 = vmatmul.mubr.f32.gmra.mrb[50].mxu0 %v6404_v16 }
 0x284   : > { %3885 = vmatprep.mubr.f32.mxu0 %v6405_v8 }
 0x287   : > { %3886 = vmatmul.mubr.f32.gmra.mrb[52].mxu0 %v6406_v61 }
 0x288   : > { %3888 = vmatprep.mubr.f32.mxu0 %v6407_v35 }
 0x28b   : > { %3889 = vmatmul.mubr.f32.gmra.mrb[54].mxu0 %v6408_v20 }
 0x28c   : > { %3891 = vmatprep.mubr.f32.mxu0 %v6409_v50 }
 0x28f   : > { %3892 = vmatmul.mubr.f32.gmra.mrb[56].mxu0 %v6410_v19 }
 0x290   : > { %3894 = vmatprep.mubr.f32.mxu0 %v6411_v12 }
 0x293   : > { %3895 = vmatmul.mubr.f32.gmra.mrb[58].mxu0 %v6412_v0 }
 0x294   : > { %3897 = vmatprep.mubr.f32.mxu0 %v6413_v56 }
 0x297   : > { %3898 = vmatmul.mubr.f32.gmra.mrb[60].mxu0 %v6414_v44 }
 0x298   : > { %3900 = vmatprep.mubr.f32.mxu0 %v6415_v38 }
 0x29b   : > { %3901 = vmatmul.mubr.f32.gmra.mrb[62].mxu0 %v6416_v51 }
 0x2c4   : > { %v5499_v17 = vpop.f32.mrb[32].mxu1 }
 0x2c5   : > { %v5501_v26 = vpop.f32.mrb[33].mxu1 }
 0x2c6   : > { %v2143_v29 = vmax.f32 %v5499_v17, %v5501_v26 }
 0x2c8   : > { %2144 = vmax.xlane.f32.xlu0 %v2143_v29  ;;  %v5505_v3 = vpop.f32.mrb[34].mxu1 }
 0x2c9   : > { %v5507_v10 = vpop.f32.mrb[35].mxu1 }
 0x2ca   : > { %v2146_v33 = vmax.f32 %v5505_v3, %v5507_v10 }
 0x2cc   : > { %2147 = vmax.xlane.f32.xlu0 %v2146_v33  ;;  %v5511_v53 = vpop.f32.mrb[36].mxu1 }
 0x2cd   : > { %v5513_v55 = vpop.f32.mrb[37].mxu1 }
 0x2ce   : > { %v2149_v36 = vmax.f32 %v5511_v53, %v5513_v55 }
 0x2d0   : > { %2150 = vmax.xlane.f32.xlu1 %v2149_v36  ;;  %v5517_v40 = vpop.f32.mrb[38].mxu1 }
 0x2d1   : > { %v5519_v43 = vpop.f32.mrb[39].mxu1 }
 0x2d2   : > { %v2152_v13 = vmax.f32 %v5517_v40, %v5519_v43 }
 0x2d4   : > { %2153 = vmax.xlane.f32.xlu1 %v2152_v13  ;;  %v5523_v34 = vpop.f32.mrb[40].mxu1 }
 0x2d5   : > { %v5525_v15 = vpop.f32.mrb[41].mxu1 }
 0x2d6   : > { %v2155_v30 = vmax.f32 %v5523_v34, %v5525_v15 }
 0x2d8   : > { %2156 = vmax.xlane.f32.xlu0 %v2155_v30  ;;  %v5529_v46 = vpop.f32.mrb[42].mxu1 }
 0x2d9   : > { %v5531_v6 = vpop.f32.mrb[43].mxu1 }
 0x2da   : > { %v2158_v18 = vmax.f32 %v5529_v46, %v5531_v6 }
 0x2dc   : > { %2159 = vmax.xlane.f32.xlu1 %v2158_v18  ;;  %v5535_v2 = vpop.f32.mrb[44].mxu1 }
 0x2dd   : > { %v5537_v58 = vpop.f32.mrb[45].mxu1 }
 0x2de   : > { %v2161_v22 = vmax.f32 %v5535_v2, %v5537_v58 }
 0x2e0   : > { %2162 = vmax.xlane.f32.xlu0 %v2161_v22  ;;  %v5541_v47 = vpop.f32.mrb[46].mxu1 }
 0x2e1   : > { %v5543_v28 = vpop.f32.mrb[47].mxu1 }
 0x2e2   : > { %v2164_v25 = vmax.f32 %v5541_v47, %v5543_v28 }
 0x2e4   : > { %2165 = vmax.xlane.f32.xlu1 %v2164_v25  ;;  %v5547_v32 = vpop.f32.mrb[48].mxu1 }
 0x2e5   : > { %v5549_v42 = vpop.f32.mrb[49].mxu1 }
 0x2e6   : > { %v2167_v9 = vmax.f32 %v5547_v32, %v5549_v42 }
 0x2e8   : > { %2168 = vmax.xlane.f32.xlu0 %v2167_v9  ;;  %v5553_v48 = vpop.f32.mrb[50].mxu1 }
 0x2e9   : > { %v5555_v24 = vpop.f32.mrb[51].mxu1 }
 0x2ea   : > { %v2170_v62 = vmax.f32 %v5553_v48, %v5555_v24 }
 0x2ec   : > { %2171 = vmax.xlane.f32.xlu1 %v2170_v62  ;;  %v5559_v63 = vpop.f32.mrb[52].mxu1 }
 0x2ed   : > { %v5561_v49 = vpop.f32.mrb[53].mxu1 }
 0x2ee   : > { %v2173_v60 = vmax.f32 %v5559_v63, %v5561_v49 }
 0x2f0   : > { %2174 = vmax.xlane.f32.xlu0 %v2173_v60  ;;  %v5565_v27 = vpop.f32.mrb[54].mxu1 }
 0x2f1   : > { %v5567_v45 = vpop.f32.mrb[55].mxu1 }
 0x2f2   : > { %v2176_v4 = vmax.f32 %v5565_v27, %v5567_v45 }
 0x2f4   : > { %2177 = vmax.xlane.f32.xlu1 %v2176_v4  ;;  %v5571_v54 = vpop.f32.mrb[56].mxu1 }
 0x2f5   : > { %v5573_v37 = vpop.f32.mrb[57].mxu1 }
 0x2f6   : > { %v2179_v52 = vmax.f32 %v5571_v54, %v5573_v37 }
 0x2f8   : > { %2180 = vmax.xlane.f32.xlu0 %v2179_v52  ;;  %v5577_v41 = vpop.f32.mrb[58].mxu1 }
 0x2f9   : > { %v5579_v21 = vpop.f32.mrb[59].mxu1 }
 0x2fa   : > { %v2182_v23 = vmax.f32 %v5577_v41, %v5579_v21 }
 0x2fc   : > { %2183 = vmax.xlane.f32.xlu1 %v2182_v23  ;;  %v5583_v11 = vpop.f32.mrb[60].mxu1 }
 0x2fd   : > { %v5585_v7 = vpop.f32.mrb[61].mxu1 }
 0x2fe   : > { %v2185_v31 = vmax.f32 %v5583_v11, %v5585_v7 }
 0x300   : > { %2186 = vmax.xlane.f32.xlu0 %v2185_v31  ;;  %v5589_v5 = vpop.f32.mrb[62].mxu1 }
 0x301   : > { %v5591_v39 = vpop.f32.mrb[63].mxu1 }
 0x302   : > { %v2188_v14 = vmax.f32 %v5589_v5, %v5591_v39 }
 0x304   : > { %2189 = vmax.xlane.f32.xlu1 %v2188_v14  ;;  %v5595_v57 = vpop.f32.mrb[64].mxu1 }
 0x305   : > { %v5597_v59 = vpop.f32.mrb[65].mxu1 }
 0x306   : > { %v2191_v1 = vmax.f32 %v5595_v57, %v5597_v59 }
 0x308   : > { %2192 = vmax.xlane.f32.xlu0 %v2191_v1  ;;  %v5601_v16 = vpop.f32.mrb[66].mxu1 }
 0x309   : > { %v5603_v8 = vpop.f32.mrb[67].mxu1 }
 0x30a   : > { %v2194_v61 = vmax.f32 %v5601_v16, %v5603_v8 }
 0x30c   : > { %2195 = vmax.xlane.f32.xlu1 %v2194_v61  ;;  %v5607_v35 = vpop.f32.mrb[68].mxu1 }
 0x30d   : > { %v5609_v20 = vpop.f32.mrb[69].mxu1 }
 0x30e   : > { %v2197_v50 = vmax.f32 %v5607_v35, %v5609_v20 }
 0x310   : > { %2198 = vmax.xlane.f32.xlu0 %v2197_v50  ;;  %v5613_v19 = vpop.f32.mrb[70].mxu1 }
 0x311   : > { %v5615_v12 = vpop.f32.mrb[71].mxu1 }
 0x312   : > { %v2200_v0 = vmax.f32 %v5613_v19, %v5615_v12 }
 0x314   : > { %2201 = vmax.xlane.f32.xlu1 %v2200_v0  ;;  %v5619_v56 = vpop.f32.mrb[72].mxu1 }
 0x315   : > { %v5621_v44 = vpop.f32.mrb[73].mxu1 }
 0x316   : > { %v2203_v38 = vmax.f32 %v5619_v56, %v5621_v44 }
 0x318   : > { %2204 = vmax.xlane.f32.xlu0 %v2203_v38  ;;  %v5625_v51 = vpop.f32.mrb[74].mxu1 }
 0x319   : > { %v5627_v29 = vpop.f32.mrb[75].mxu1 }
 0x31a   : > { %v2206_v33 = vmax.f32 %v5625_v51, %v5627_v29 }
 0x31c   : > { %2207 = vmax.xlane.f32.xlu1 %v2206_v33  ;;  %v5631_v36 = vpop.f32.mrb[76].mxu1 }
 0x31d   : > { %v5633_v13 = vpop.f32.mrb[77].mxu1 }
 0x31e   : > { %v2209_v30 = vmax.f32 %v5631_v36, %v5633_v13 }
 0x320   : > { %2210 = vmax.xlane.f32.xlu0 %v2209_v30  ;;  %v5637_v18 = vpop.f32.mrb[78].mxu1 }
 0x321   : > { %6417 = vst [vmem:[#allocation34_spill] sm:$0xff] %v5637_v18  ;;  %v5639_v22 = vpop.f32.mrb[79].mxu1 }
 0x322   : > { %6418 = vst [vmem:[#allocation33_spill] sm:$0xff] %v5639_v22  ;;  %v2212_v25 = vmax.f32 %v5637_v18, %v5639_v22 }
 0x324   : > { %2213 = vmax.xlane.f32.xlu0 %v2212_v25  ;;  %v5643_v9 = vpop.f32.mrb[80].mxu1 }
 0x325   : > { %6419 = vst [vmem:[#allocation36_spill] sm:$0xff] %v5643_v9  ;;  %v5645_v62 = vpop.f32.mrb[81].mxu1 }
 0x326   : > { %6420 = vst [vmem:[#allocation35_spill] sm:$0xff] %v5645_v62  ;;  %v2215_v60 = vmax.f32 %v5643_v9, %v5645_v62 }
 0x328   : > { %2216 = vmax.xlane.f32.xlu0 %v2215_v60  ;;  %v5649_v4 = vpop.f32.mrb[82].mxu1 }
 0x329   : > { %6421 = vst [vmem:[#allocation38_spill] sm:$0xff] %v5649_v4  ;;  %v5651_v52 = vpop.f32.mrb[83].mxu1 }
 0x32a   : > { %6422 = vst [vmem:[#allocation37_spill] sm:$0xff] %v5651_v52  ;;  %v2218_v23 = vmax.f32 %v5649_v4, %v5651_v52  ;;  %v4480_v4 = vmov 0.0|0.0  }
 0x32b   : > { %4095 = vmatprep.subr.bf16.mxu0 %v4480_v4 }
 0x32c   : > { %2219 = vmax.xlane.f32.xlu0 %v2218_v23  ;;  %v5655_v31 = vpop.f32.mrb[84].mxu1 }
 0x32d   : > { %6423 = vst [vmem:[#allocation40_spill] sm:$0xff] %v5655_v31  ;;  %v5657_v14 = vpop.f32.mrb[85].mxu1 }
 0x32e   : > { %6424 = vst [vmem:[#allocation39_spill] sm:$0xff] %v5657_v14  ;;  %v2221_v1 = vmax.f32 %v5655_v31, %v5657_v14 }
 0x330   : > { %2222 = vmax.xlane.f32.xlu0 %v2221_v1  ;;  %v5661_v61 = vpop.f32.mrb[86].mxu1 }
 0x331   : > { %6425 = vst [vmem:[#allocation42_spill] sm:$0xff] %v5661_v61  ;;  %v5663_v50 = vpop.f32.mrb[87].mxu1 }
 0x332   : > { %6426 = vst [vmem:[#allocation41_spill] sm:$0xff] %v5663_v50  ;;  %v2224_v0 = vmax.f32 %v5661_v61, %v5663_v50 }
 0x334   : > { %2225 = vmax.xlane.f32.xlu0 %v2224_v0  ;;  %v5667_v38 = vpop.f32.mrb[88].mxu1 }
 0x335   : > { %6427 = vst [vmem:[#allocation2_spill] sm:$0xff] %v5667_v38  ;;  %v5669_v33 = vpop.f32.mrb[89].mxu1 }
 0x336   : > { %6428 = vst [vmem:[#allocation3_spill] sm:$0xff] %v5669_v33  ;;  %v2227_v30 = vmax.f32 %v5667_v38, %v5669_v33  ;;  %v5689_v33 = vld [vmem:[%s511_s21] ss:$0 sm:$0xff] }
 0x338   : > { %2228 = vmax.xlane.f32.xlu0 %v2227_v30  ;;  %v5673_v25 = vpop.f32.mrb[90].mxu1  ;;  %v3857_v30 = vpop.f32.mrb[32].mxu0 }
 0x339   : > { %6429 = vst [vmem:[#allocation4_spill] sm:$0xff] %v5673_v25  ;;  %v5675_v60 = vpop.f32.mrb[91].mxu1  ;;  %v1149_v38 = vpop.f32.mrb[33].mxu0 }
 0x33a   : > { %6430 = vst [vmem:[#allocation5_spill] sm:$0xff] %v5675_v60  ;;  %v2230_v23 = vmax.f32 %v5673_v25, %v5675_v60  ;;  %v1150_v60 = vadd.f32 %v5689_v33, %v1149_v38  ;;  %v3860_v14 = vpop.f32.mrb[34].mxu0 }
 0x33b   : > { %v1165_v31 = vadd.f32 %v3860_v14, %v5689_v33  ;;  %v1159_v52 = vpop.f32.mrb[35].mxu0 }
 0x33c   : > { %2231 = vmax.xlane.f32.xlu0 %v2230_v23  ;;  %v5679_v1 = vpop.f32.mrb[92].mxu1  ;;  %v1155_v23 = vadd.f32 %v3857_v30, %v5689_v33  ;;  %v3863_v30 = vpop.f32.mrb[36].mxu0 }
 0x33d   : > { %6431 = vst [vmem:[#allocation6_spill] sm:$0xff] %v5679_v1  ;;  %v5681_v50 = vpop.f32.mrb[93].mxu1  ;;  %v1175_v62 = vadd.f32 %v3863_v30, %v5689_v33  ;;  %v1169_v9 = vpop.f32.mrb[37].mxu0 }
 0x33e   : > { %6432 = vst [vmem:[#allocation7_spill] sm:$0xff] %v5681_v50  ;;  %v2233_v0 = vmax.f32 %v5679_v1, %v5681_v50  ;;  %v4096_v1 = vpack.c.bf16 %v1155_v23, %v1150_v60  ;;  %v1170_v60 = vadd.f32 %v5689_v33, %v1169_v9  ;;  %v3866_v23 = vpop.f32.mrb[38].mxu0 }
 0x340   : > { %2234 = vmax.xlane.f32.xlu0 %v2233_v0  ;;  %v5691_v61 = vpop.f32.mrb[94].mxu1  ;;  %v1160_v0 = vadd.f32 %v5689_v33, %v1159_v52  ;;  %4097 = vmatpush1.bf16.msra.mxu0 %v4096_v1  ;;  %v4102_v14 = vpack.c.bf16 %v1175_v62, %v1170_v60 }
 0x341   : > { %6433 = vst [vmem:[#allocation8_spill] sm:$0xff] %v5691_v61  ;;  %v5695_v25 = vpop.f32.mrb[95].mxu1  ;;  %4098 = vmatprep.subr.bf16.mxu0 %v4480_v4 }
 0x342   : > { %6434 = vst [vmem:[#allocation9_spill] sm:$0xff] %v5695_v25  ;;  %v2236_v50 = vmax.f32 %v5691_v61, %v5695_v25  ;;  %v4099_v38 = vpack.c.bf16 %v1165_v31, %v1160_v0  ;;  %v1185_v25 = vadd.f32 %v3866_v23, %v5689_v33 }
 0x344   : > { %2237 = vmax.xlane.f32.xlu0 %v2236_v50  ;;  %4100 = vmatpush1.bf16.msra.mxu0 %v4099_v38  ;;  %v1179_v50 = vpop.f32.mrb[39].mxu0 }
 0x345   : > { %4101 = vmatprep.subr.bf16.mxu0 %v4480_v4  ;;  %v1180_v52 = vadd.f32 %v5689_v33, %v1179_v50  ;;  %v3869_v1 = vpop.f32.mrb[40].mxu0 }
 0x346   : > { %v1195_v0 = vadd.f32 %v3869_v1, %v5689_v33  ;;  %v1189_v30 = vpop.f32.mrb[41].mxu0 }
 0x347   : > { %v4105_v31 = vpack.c.bf16 %v1185_v25, %v1180_v52  ;;  %v1190_v9 = vadd.f32 %v5689_v33, %v1189_v30  ;;  %v3872_v38 = vpop.f32.mrb[42].mxu0 }
 0x348   : > { %4103 = vmatpush1.bf16.msra.mxu0 %v4102_v14  ;;  %v1205_v60 = vadd.f32 %v3872_v38, %v5689_v33  ;;  %v1199_v23 = vpop.f32.mrb[43].mxu0 }
 0x349   : > { %4104 = vmatprep.subr.bf16.mxu0 %v4480_v4  ;;  %v4108_v62 = vpack.c.bf16 %v1195_v0, %v1190_v9  ;;  %v1200_v50 = vadd.f32 %v5689_v33, %v1199_v23 }
 0x34a   : > { %v3875_v30 = vpop.f32.mrb[44].mxu0 }
 0x34b   : > { %v4111_v1 = vpack.c.bf16 %v1205_v60, %v1200_v50  ;;  %v1209_v61 = vpop.f32.mrb[45].mxu0 }
 0x34c   : > { %4106 = vmatpush1.bf16.msra.mxu0 %v4105_v31  ;;  %v1215_v31 = vadd.f32 %v3875_v30, %v5689_v33  ;;  %v1210_v38 = vadd.f32 %v5689_v33, %v1209_v61 }
 0x34d   : > { %4107 = vmatprep.subr.bf16.mxu0 %v4480_v4 }
 0x34e   : > { %v3878_v22 = vpop.f32.mrb[46].mxu0  ;;  %v4114_v60 = vpack.c.bf16 %v1215_v31, %v1210_v38 }
 0x34f   : > { %v1219_v18 = vpop.f32.mrb[47].mxu0 }
 0x350   : > { %4109 = vmatpush1.bf16.msra.mxu0 %v4108_v62  ;;  %v1225_v62 = vadd.f32 %v3878_v22, %v5689_v33  ;;  %v1220_v50 = vadd.f32 %v5689_v33, %v1219_v18 }
 0x351   : > { %4110 = vmatprep.subr.bf16.mxu0 %v4480_v4 }
 0x352   : > { %v3881_v61 = vpop.f32.mrb[48].mxu0 }
 0x353   : > { %v1235_v22 = vadd.f32 %v3881_v61, %v5689_v33  ;;  %v1229_v30 = vpop.f32.mrb[49].mxu0 }
 0x354   : > { %4112 = vmatpush1.bf16.msra.mxu0 %v4111_v1  ;;  %v4117_v1 = vpack.c.bf16 %v1225_v62, %v1220_v50  ;;  %v1230_v31 = vadd.f32 %v5689_v33, %v1229_v30 }
 0x355   : > { %v2145_v14 = vpop.xlane.xlu0 %2144  ;;  %4113 = vmatprep.subr.bf16.mxu0 %v4480_v4 }
 0x356   : > { %v2239_v25 = vsub.f32 %v5499_v17, %v2145_v14  ;;  %v2240_v52 = vsub.f32 %v5501_v26, %v2145_v14  ;;  %v3884_v38 = vpop.f32.mrb[50].mxu0 }
 0x357   : > { %v1245_v62 = vadd.f32 %v3884_v38, %v5689_v33 }
 0x358   : > { %v2303_v0 = vmul.f32 1.442695, %v2239_v25  ;;  %v2305_v9 = vmul.f32 1.442695, %v2240_v52  ;;  %4115 = vmatpush1.bf16.msra.mxu0 %v4114_v60 }
 0x359   : > { %v2148_v23 = vpop.xlane.xlu0 %2147  ;;  %4116 = vmatprep.subr.bf16.mxu0 %v4480_v4 }
 0x35a   : > { %4248 = vpow2.f32 %v2303_v0  ;;  %v2241_v17 = vsub.f32 %v5505_v3, %v2148_v23  ;;  %v2242_v26 = vsub.f32 %v5507_v10, %v2148_v23 }
 0x35b   : > { %4250 = vpow2.f32 %v2305_v9  ;;  %v4120_v9 = vpack.c.bf16 %v1235_v22, %v1230_v31 }
 0x35c   : > { %v2307_v14 = vmul.f32 1.442695, %v2241_v17  ;;  %v2309_v25 = vmul.f32 1.442695, %v2242_v26  ;;  %4118 = vmatpush1.bf16.msra.mxu0 %v4117_v1  ;;  %v1239_v17 = vpop.f32.mrb[51].mxu0 }
 0x35d   : > { %v2151_v52 = vpop.xlane.xlu1 %2150  ;;  %4119 = vmatprep.subr.bf16.mxu0 %v4480_v4  ;;  %v3887_v61 = vpop.f32.mrb[52].mxu0 }
 0x35e   : > { %4252 = vpow2.f32 %v2307_v14  ;;  %v2243_v3 = vsub.f32 %v5511_v53, %v2151_v52  ;;  %v2244_v10 = vsub.f32 %v5513_v55, %v2151_v52  ;;  %v1240_v55 = vadd.f32 %v5689_v33, %v1239_v17  ;;  %v1249_v30 = vpop.f32.mrb[53].mxu0 }
 0x35f   : > { %4254 = vpow2.f32 %v2309_v25  ;;  %v1255_v22 = vadd.f32 %v3887_v61, %v5689_v33  ;;  %v3890_v31 = vpop.f32.mrb[54].mxu0 }
 0x360   : > { %v2311_v18 = vmul.f32 1.442695, %v2243_v3  ;;  %v2313_v0 = vmul.f32 1.442695, %v2244_v10  ;;  %v4123_v25 = vpack.c.bf16 %v1245_v62, %v1240_v55  ;;  %4121 = vmatpush1.bf16.msra.mxu0 %v4120_v9  ;;  %v1250_v10 = vadd.f32 %v5689_v33, %v1249_v30 }
 0x361   : > { %v2154_v23 = vpop.xlane.xlu1 %2153  ;;  %4122 = vmatprep.subr.bf16.mxu0 %v4480_v4  ;;  %v1265_v38 = vadd.f32 %v3890_v31, %v5689_v33 }
 0x362   : > { %4256 = vpow2.f32 %v2311_v18  ;;  %v2245_v26 = vsub.f32 %v5517_v40, %v2154_v23  ;;  %v2246_v53 = vsub.f32 %v5519_v43, %v2154_v23  ;;  %v1259_v23 = vpop.f32.mrb[55].mxu0 }
 0x363   : > { %4258 = vpow2.f32 %v2313_v0  ;;  %v1260_v17 = vadd.f32 %v5689_v33, %v1259_v23 }
 0x364   : > { %v5734_v60 = vpop.eup %4248  ;;  %v2315_v50 = vmul.f32 1.442695, %v2245_v26  ;;  %v2317_v14 = vmul.f32 1.442695, %v2246_v53  ;;  %4124 = vmatpush1.bf16.msra.mxu0 %v4123_v25 }
 0x365   : > { %v5736_v52 = vpop.eup %4250  ;;  %v2157_v1 = vpop.xlane.xlu0 %2156  ;;  %4125 = vmatprep.subr.bf16.mxu0 %v4480_v4 }
 0x366   : > { %4260 = vpow2.f32 %v2315_v50  ;;  %v2247_v40 = vsub.f32 %v5523_v34, %v2157_v1  ;;  %v2248_v43 = vsub.f32 %v5525_v15, %v2157_v1  ;;  %v2431_v3 = vadd.f32 %v5736_v52, %v5734_v60 }
 0x367   : > { %4262 = vpow2.f32 %v2317_v14  ;;  %v4126_v15 = vpack.c.bf16 %v1255_v22, %v1250_v10  ;;  %v4129_v50 = vpack.c.bf16 %v1265_v38, %v1260_v17  ;;  %v3893_v14 = vpop.f32.mrb[56].mxu0 }
 0x368   : > { %v5745_v18 = vpop.eup %4252  ;;  %v2319_v0 = vmul.f32 1.442695, %v2247_v40  ;;  %v2321_v9 = vmul.f32 1.442695, %v2248_v43  ;;  %2432 = vadd.xlane.f32.xlu1 %v2431_v3  ;;  %v1275_v22 = vadd.f32 %v3893_v14, %v5689_v33  ;;  %v1269_v30 = vpop.f32.mrb[57].mxu0 }
 0x369   : > { %v5748_v62 = vpop.eup %4254  ;;  %v2160_v34 = vpop.xlane.xlu1 %2159  ;;  %4127 = vmatpush1.bf16.msra.mxu0 %v4126_v15 }
 0x36a   : > { %4264 = vpow2.f32 %v2319_v0  ;;  %v2249_v26 = vsub.f32 %v5529_v46, %v2160_v34  ;;  %v2250_v53 = vsub.f32 %v5531_v6, %v2160_v34  ;;  %v2434_v55 = vadd.f32 %v5748_v62, %v5745_v18  ;;  %4128 = vmatprep.subr.bf16.mxu0 %v4480_v4  ;;  %v3896_v0 = vpop.f32.mrb[58].mxu0 }
 0x36b   : > { %4266 = vpow2.f32 %v2321_v9  ;;  %v1270_v6 = vadd.f32 %v5689_v33, %v1269_v30  ;;  %v1285_v34 = vadd.f32 %v3896_v0, %v5689_v33  ;;  %v1279_v15 = vpop.f32.mrb[59].mxu0 }
 0x36c   : > { %v5756_v25 = vpop.eup %4256  ;;  %v2323_v61 = vmul.f32 1.442695, %v2249_v26  ;;  %v2325_v1 = vmul.f32 1.442695, %v2250_v53  ;;  %2435 = vadd.xlane.f32.xlu1 %v2434_v55 }
 0x36d   : > { %v5759_v40 = vpop.eup %4258  ;;  %v2163_v46 = vpop.xlane.xlu0 %2162  ;;  %v4132_v31 = vpack.c.bf16 %v1275_v22, %v1270_v6  ;;  %4130 = vmatpush1.bf16.msra.mxu0 %v4129_v50 }
 0x36e   : > { %4268 = vpow2.f32 %v2323_v61  ;;  %v2251_v43 = vsub.f32 %v5535_v2, %v2163_v46  ;;  %v2252_v3 = vsub.f32 %v5537_v58, %v2163_v46  ;;  %v2437_v10 = vadd.f32 %v5759_v40, %v5756_v25  ;;  %4131 = vmatprep.subr.bf16.mxu0 %v4480_v4  ;;  %v3899_v6 = vpop.f32.mrb[60].mxu0 }
 0x36f   : > { %4270 = vpow2.f32 %v2325_v1  ;;  %v1280_v58 = vadd.f32 %v5689_v33, %v1279_v15  ;;  %v1295_v0 = vadd.f32 %v3899_v6, %v5689_v33 }
 0x370   : > { %v5767_v9 = vpop.eup %4260  ;;  %v2327_v38 = vmul.f32 1.442695, %v2251_v43  ;;  %v2329_v23 = vmul.f32 1.442695, %v2252_v3  ;;  %2438 = vadd.xlane.f32.xlu1 %v2437_v10  ;;  %v1289_v43 = vpop.f32.mrb[61].mxu0 }
 0x371   : > { %v5770_v17 = vpop.eup %4262  ;;  %v2166_v2 = vpop.xlane.xlu1 %2165  ;;  %v4135_v50 = vpack.c.bf16 %v1285_v34, %v1280_v58  ;;  %4133 = vmatpush1.bf16.msra.mxu0 %v4132_v31 }
 0x372   : > { %4272 = vpow2.f32 %v2327_v38  ;;  %v2253_v26 = vsub.f32 %v5541_v47, %v2166_v2  ;;  %v2254_v53 = vsub.f32 %v5543_v28, %v2166_v2  ;;  %v2440_v55 = vadd.f32 %v5770_v17, %v5767_v9  ;;  %4134 = vmatprep.subr.bf16.mxu0 %v4480_v4  ;;  %v3902_v2 = vpop.f32.mrb[62].mxu0 }
 0x373   : > { %4274 = vpow2.f32 %v2329_v23  ;;  %v1290_v38 = vadd.f32 %v5689_v33, %v1289_v43 }
 0x374   : > { %v5778_v14 = vpop.eup %4264  ;;  %v2331_v61 = vmul.f32 1.442695, %v2253_v26  ;;  %v2333_v1 = vmul.f32 1.442695, %v2254_v53  ;;  %2441 = vadd.xlane.f32.xlu1 %v2440_v55  ;;  %v1299_v26 = vpop.f32.mrb[63].mxu0 }
 0x375   : > { %v5780_v22 = vpop.eup %4266  ;;  %v2169_v30 = vpop.xlane.xlu0 %2168  ;;  %4136 = vmatpush1.bf16.msra.mxu0 %v4135_v50  ;;  %v4138_v58 = vpack.c.bf16 %v1295_v0, %v1290_v38 }
 0x376   : > { %4276 = vpow2.f32 %v2331_v61  ;;  %v2255_v47 = vsub.f32 %v5547_v32, %v2169_v30  ;;  %v2256_v28 = vsub.f32 %v5549_v42, %v2169_v30  ;;  %v2443_v46 = vadd.f32 %v5780_v22, %v5778_v14  ;;  %4137 = vmatprep.subr.bf16.mxu0 %v4480_v4 }
 0x377   : > { %4278 = vpow2.f32 %v2333_v1  ;;  %v1305_v61 = vadd.f32 %v3902_v2, %v5689_v33  ;;  %v1300_v1 = vadd.f32 %v5689_v33, %v1299_v26 }
 0x378   : > { %v5787_v3 = vpop.eup %4268  ;;  %v2335_v10 = vmul.f32 1.442695, %v2255_v47  ;;  %v2337_v31 = vmul.f32 1.442695, %v2256_v28  ;;  %2444 = vadd.xlane.f32.xlu1 %v2443_v46 }
 0x379   : > { %v5791_v23 = vpop.eup %4270  ;;  %v2172_v32 = vpop.xlane.xlu1 %2171  ;;  %4139 = vmatpush1.bf16.msra.mxu0 %v4138_v58  ;;  %v4141_v46 = vpack.c.bf16 %v1305_v61, %v1300_v1 }
 0x37a   : > { %4280 = vpow2.f32 %v2335_v10  ;;  %v2257_v42 = vsub.f32 %v5553_v48, %v2172_v32  ;;  %v2258_v34 = vsub.f32 %v5555_v24, %v2172_v32  ;;  %v2446_v15 = vadd.f32 %v5791_v23, %v5787_v3  ;;  %4140 = vmatprep.subr.bf16.mxu0 %v4480_v4 }
 0x37b   : > { %4282 = vpow2.f32 %v2337_v31 }
 0x37c   : > { %v5798_v53 = vpop.eup %4272  ;;  %v2339_v55 = vmul.f32 1.442695, %v2257_v42  ;;  %v2341_v50 = vmul.f32 1.442695, %v2258_v34  ;;  %2447 = vadd.xlane.f32.xlu1 %v2446_v15 }
 0x37d   : > { %v5802_v30 = vpop.eup %4274  ;;  %v2175_v48 = vpop.xlane.xlu0 %2174  ;;  %4142 = vmatpush1.bf16.msra.mxu0 %v4141_v46 }
 0x37e   : > { %4284 = vpow2.f32 %v2339_v55  ;;  %v2259_v24 = vsub.f32 %v5559_v63, %v2175_v48  ;;  %v2260_v47 = vsub.f32 %v5561_v49, %v2175_v48  ;;  %v2449_v28 = vadd.f32 %v5802_v30, %v5798_v53 }
 0x37f   : > { %4286 = vpow2.f32 %v2341_v50 }
 0x380   : > { %v5809_v6 = vpop.eup %4276  ;;  %v2343_v43 = vmul.f32 1.442695, %v2259_v24  ;;  %v2345_v33 = vmul.f32 1.442695, %v2260_v47  ;;  %2450 = vadd.xlane.f32.xlu1 %v2449_v28 }
 0x381   : > { %v5811_v10 = vpop.eup %4278  ;;  %v2178_v31 = vpop.xlane.xlu1 %2177 }
 0x382   : > { %4288 = vpow2.f32 %v2343_v43  ;;  %v2261_v63 = vsub.f32 %v5565_v27, %v2178_v31  ;;  %v2262_v49 = vsub.f32 %v5567_v45, %v2178_v31  ;;  %v2452_v0 = vadd.f32 %v5811_v10, %v5809_v6 }
 0x383   : > { %4290 = vpow2.f32 %v2345_v33 }
 0x384   : > { %v5817_v4 = vpop.eup %4280  ;;  %v2347_v38 = vmul.f32 1.442695, %v2261_v63  ;;  %v2349_v32 = vmul.f32 1.442695, %v2262_v49  ;;  %2453 = vadd.xlane.f32.xlu1 %v2452_v0 }
 0x385   : > { %v5819_v42 = vpop.eup %4282  ;;  %v2181_v34 = vpop.xlane.xlu0 %2180 }
 0x386   : > { %4292 = vpow2.f32 %v2347_v38  ;;  %v2263_v15 = vsub.f32 %v5571_v54, %v2181_v34  ;;  %v2264_v2 = vsub.f32 %v5573_v37, %v2181_v34  ;;  %v2455_v27 = vadd.f32 %v5819_v42, %v5817_v4 }
 0x387   : > { %4294 = vpow2.f32 %v2349_v32 }
 0x388   : > { %v5825_v45 = vpop.eup %4284  ;;  %v2351_v58 = vmul.f32 1.442695, %v2263_v15  ;;  %v2353_v26 = vmul.f32 1.442695, %v2264_v2  ;;  %2456 = vadd.xlane.f32.xlu1 %v2455_v27 }
 0x389   : > { %v5827_v55 = vpop.eup %4286  ;;  %v2184_v50 = vpop.xlane.xlu1 %2183 }
 0x38a   : > { %4296 = vpow2.f32 %v2351_v58  ;;  %v2265_v61 = vsub.f32 %v5577_v41, %v2184_v50  ;;  %v2266_v1 = vsub.f32 %v5579_v21, %v2184_v50  ;;  %v2458_v54 = vadd.f32 %v5827_v55, %v5825_v45 }
 0x38b   : > { %4298 = vpow2.f32 %v2353_v26 }
 0x38c   : > { %v5833_v37 = vpop.eup %4288  ;;  %v2355_v48 = vmul.f32 1.442695, %v2265_v61  ;;  %v2357_v24 = vmul.f32 1.442695, %v2266_v1  ;;  %2459 = vadd.xlane.f32.xlu1 %v2458_v54 }
 0x38d   : > { %v5835_v47 = vpop.eup %4290  ;;  %v2187_v28 = vpop.xlane.xlu0 %2186 }
 0x38e   : > { %4300 = vpow2.f32 %v2355_v48  ;;  %v2267_v46 = vsub.f32 %v5583_v11, %v2187_v28  ;;  %v2268_v43 = vsub.f32 %v5585_v7, %v2187_v28  ;;  %v2461_v41 = vadd.f32 %v5835_v47, %v5833_v37 }
 0x38f   : > { %4302 = vpow2.f32 %v2357_v24 }
 0x390   : > { %v5841_v21 = vpop.eup %4292  ;;  %v2359_v33 = vmul.f32 1.442695, %v2267_v46  ;;  %v2361_v31 = vmul.f32 1.442695, %v2268_v43  ;;  %2462 = vadd.xlane.f32.xlu0 %v2461_v41 }
 0x391   : > { %v5843_v63 = vpop.eup %4294  ;;  %v2190_v49 = vpop.xlane.xlu1 %2189 }
 0x392   : > { %4304 = vpow2.f32 %v2359_v33  ;;  %v2269_v0 = vsub.f32 %v5589_v5, %v2190_v49  ;;  %v2270_v38 = vsub.f32 %v5591_v39, %v2190_v49  ;;  %v2464_v11 = vadd.f32 %v5843_v63, %v5841_v21 }
 0x393   : > { %4306 = vpow2.f32 %v2361_v31 }
 0x394   : > { %v5849_v7 = vpop.eup %4296  ;;  %v2363_v32 = vmul.f32 1.442695, %v2269_v0  ;;  %v2365_v34 = vmul.f32 1.442695, %v2270_v38  ;;  %2465 = vadd.xlane.f32.xlu1 %v2464_v11 }
 0x395   : > { %v5851_v15 = vpop.eup %4298  ;;  %v2193_v2 = vpop.xlane.xlu0 %2192 }
 0x396   : > { %4308 = vpow2.f32 %v2363_v32  ;;  %v2271_v27 = vsub.f32 %v5595_v57, %v2193_v2  ;;  %v2272_v58 = vsub.f32 %v5597_v59, %v2193_v2  ;;  %v2467_v5 = vadd.f32 %v5851_v15, %v5849_v7 }
 0x397   : > { %4310 = vpow2.f32 %v2365_v34 }
 0x398   : > { %v5857_v39 = vpop.eup %4300  ;;  %v2367_v26 = vmul.f32 1.442695, %v2271_v27  ;;  %v2369_v50 = vmul.f32 1.442695, %v2272_v58  ;;  %2468 = vadd.xlane.f32.xlu0 %v2467_v5 }
 0x399   : > { %v5859_v61 = vpop.eup %4302  ;;  %v2196_v1 = vpop.xlane.xlu1 %2195 }
 0x39a   : > { %4312 = vpow2.f32 %v2367_v26  ;;  %v2273_v54 = vsub.f32 %v5601_v16, %v2196_v1  ;;  %v2274_v48 = vsub.f32 %v5603_v8, %v2196_v1  ;;  %v2470_v57 = vadd.f32 %v5859_v61, %v5857_v39 }
 0x39b   : > { %4314 = vpow2.f32 %v2369_v50 }
 0x39c   : > { %v5865_v59 = vpop.eup %4304  ;;  %v2371_v24 = vmul.f32 1.442695, %v2273_v54  ;;  %v2373_v28 = vmul.f32 1.442695, %v2274_v48  ;;  %2471 = vadd.xlane.f32.xlu1 %v2470_v57 }
 0x39d   : > { %v5867_v46 = vpop.eup %4306  ;;  %v2199_v43 = vpop.xlane.xlu0 %2198 }
 0x39e   : > { %4316 = vpow2.f32 %v2371_v24  ;;  %v2275_v41 = vsub.f32 %v5607_v35, %v2199_v43  ;;  %v2276_v33 = vsub.f32 %v5609_v20, %v2199_v43  ;;  %v2473_v16 = vadd.f32 %v5867_v46, %v5865_v59 }
 0x39f   : > { %4318 = vpow2.f32 %v2373_v28 }
 0x3a0   : > { %v5873_v8 = vpop.eup %4308  ;;  %v2375_v31 = vmul.f32 1.442695, %v2275_v41  ;;  %v2377_v49 = vmul.f32 1.442695, %v2276_v33  ;;  %2474 = vadd.xlane.f32.xlu0 %v2473_v16 }
 0x3a1   : > { %v5875_v0 = vpop.eup %4310  ;;  %v2202_v38 = vpop.xlane.xlu1 %2201 }
 0x3a2   : > { %4320 = vpow2.f32 %v2375_v31  ;;  %v2277_v11 = vsub.f32 %v5613_v19, %v2202_v38  ;;  %v2278_v32 = vsub.f32 %v5615_v12, %v2202_v38  ;;  %v2476_v35 = vadd.f32 %v5875_v0, %v5873_v8 }
 0x3a3   : > { %4322 = vpow2.f32 %v2377_v49 }
 0x3a4   : > { %v5881_v20 = vpop.eup %4312  ;;  %v2379_v34 = vmul.f32 1.442695, %v2277_v11  ;;  %v2381_v2 = vmul.f32 1.442695, %v2278_v32  ;;  %2477 = vadd.xlane.f32.xlu1 %v2476_v35  ;;  %v6435_v35 = vld [vmem:[#allocation34_spill] sm:$0xff] }
 0x3a5   : > { %v5883_v27 = vpop.eup %4314  ;;  %v2205_v58 = vpop.xlane.xlu0 %2204 }
 0x3a6   : > { %4324 = vpow2.f32 %v2379_v34  ;;  %v2279_v5 = vsub.f32 %v5619_v56, %v2205_v58  ;;  %v2280_v26 = vsub.f32 %v5621_v44, %v2205_v58  ;;  %v2479_v19 = vadd.f32 %v5883_v27, %v5881_v20 }
 0x3a7   : > { %4326 = vpow2.f32 %v2381_v2  ;;  %v6436_v2 = vld [vmem:[#allocation33_spill] sm:$0xff] }
 0x3a8   : > { %v5889_v12 = vpop.eup %4316  ;;  %v2383_v50 = vmul.f32 1.442695, %v2279_v5  ;;  %v2385_v1 = vmul.f32 1.442695, %v2280_v26  ;;  %2480 = vadd.xlane.f32.xlu0 %v2479_v19 }
 0x3a9   : > { %v5891_v54 = vpop.eup %4318  ;;  %v2208_v48 = vpop.xlane.xlu1 %2207 }
 0x3aa   : > { %4328 = vpow2.f32 %v2383_v50  ;;  %v2281_v57 = vsub.f32 %v5625_v51, %v2208_v48  ;;  %v2282_v24 = vsub.f32 %v5627_v29, %v2208_v48  ;;  %v2482_v56 = vadd.f32 %v5891_v54, %v5889_v12 }
 0x3ab   : > { %4330 = vpow2.f32 %v2385_v1  ;;  %v6437_v1 = vld [vmem:[#allocation36_spill] sm:$0xff] }
 0x3ac   : > { %v5897_v44 = vpop.eup %4320  ;;  %v2387_v28 = vmul.f32 1.442695, %v2281_v57  ;;  %v2389_v43 = vmul.f32 1.442695, %v2282_v24  ;;  %2483 = vadd.xlane.f32.xlu1 %v2482_v56  ;;  %v6438_v57 = vld [vmem:[#allocation35_spill] sm:$0xff] }
 0x3ad   : > { %v5899_v41 = vpop.eup %4322  ;;  %v2211_v33 = vpop.xlane.xlu0 %2210 }
 0x3ae   : > { %4332 = vpow2.f32 %v2387_v28  ;;  %v2283_v16 = vsub.f32 %v5631_v36, %v2211_v33  ;;  %v2284_v31 = vsub.f32 %v5633_v13, %v2211_v33  ;;  %v2485_v51 = vadd.f32 %v5899_v41, %v5897_v44 }
 0x3af   : > { %4334 = vpow2.f32 %v2389_v43 }
 0x3b0   : > { %v5905_v29 = vpop.eup %4324  ;;  %v2391_v49 = vmul.f32 1.442695, %v2283_v16  ;;  %v2393_v38 = vmul.f32 1.442695, %v2284_v31  ;;  %2486 = vadd.xlane.f32.xlu0 %v2485_v51  ;;  %v6439_v51 = vld [vmem:[#allocation38_spill] sm:$0xff] }
 0x3b1   : > { %v5907_v11 = vpop.eup %4326  ;;  %v2214_v32 = vpop.xlane.xlu0 %2213 }
 0x3b2   : > { %4336 = vpow2.f32 %v2391_v49  ;;  %v2285_v34 = vsub.f32 %v6435_v35, %v2214_v32  ;;  %v2286_v58 = vsub.f32 %v6436_v2, %v2214_v32  ;;  %v2488_v36 = vadd.f32 %v5907_v11, %v5905_v29 }
 0x3b3   : > { %4338 = vpow2.f32 %v2393_v38  ;;  %v6440_v38 = vld [vmem:[#allocation37_spill] sm:$0xff] }
 0x3b4   : > { %v5913_v13 = vpop.eup %4328  ;;  %v2395_v5 = vmul.f32 1.442695, %v2285_v34  ;;  %v2397_v26 = vmul.f32 1.442695, %v2286_v58  ;;  %2489 = vadd.xlane.f32.xlu1 %v2488_v36 }
 0x3b5   : > { %v5915_v19 = vpop.eup %4330  ;;  %v2217_v50 = vpop.xlane.xlu0 %2216 }
 0x3b6   : > { %4340 = vpow2.f32 %v2395_v5  ;;  %v2287_v48 = vsub.f32 %v6437_v1, %v2217_v50  ;;  %v2288_v24 = vsub.f32 %v6438_v57, %v2217_v50  ;;  %v2491_v56 = vadd.f32 %v5915_v19, %v5913_v13  ;;  %v6442_v1 = vld [vmem:[#allocation39_spill] sm:$0xff] }
 0x3b7   : > { %4342 = vpow2.f32 %v2397_v26  ;;  %v6441_v26 = vld [vmem:[#allocation40_spill] sm:$0xff] }
 0x3b8   : > { %v5921_v28 = vpop.eup %4332  ;;  %v2399_v43 = vmul.f32 1.442695, %v2287_v48  ;;  %v2401_v33 = vmul.f32 1.442695, %v2288_v24  ;;  %2492 = vadd.xlane.f32.xlu0 %v2491_v56 }
 0x3b9   : > { %v5923_v16 = vpop.eup %4334  ;;  %v2220_v31 = vpop.xlane.xlu0 %2219 }
 0x3ba   : > { %4344 = vpow2.f32 %v2399_v43  ;;  %v2289_v49 = vsub.f32 %v6439_v51, %v2220_v31  ;;  %v2290_v32 = vsub.f32 %v6440_v38, %v2220_v31  ;;  %v2494_v35 = vadd.f32 %v5923_v16, %v5921_v28  ;;  %v6445_v51 = vld [vmem:[#allocation42_spill] sm:$0xff]  ;;  %v6446_v38 = vld [vmem:[#allocation41_spill] sm:$0xff] }
 0x3bb   : > { %4346 = vpow2.f32 %v2401_v33 }
 0x3bc   : > { %v5929_v34 = vpop.eup %4336  ;;  %v2403_v2 = vmul.f32 1.442695, %v2289_v49  ;;  %v2405_v58 = vmul.f32 1.442695, %v2290_v32  ;;  %2495 = vadd.xlane.f32.xlu1 %v2494_v35 }
 0x3bd   : > { %v5931_v36 = vpop.eup %4338  ;;  %v2223_v5 = vpop.xlane.xlu0 %2222 }
 0x3be   : > { %4348 = vpow2.f32 %v2403_v2  ;;  %v2291_v50 = vsub.f32 %v6441_v26, %v2223_v5  ;;  %v2292_v48 = vsub.f32 %v6442_v1, %v2223_v5  ;;  %v2497_v57 = vadd.f32 %v5931_v36, %v5929_v34  ;;  %v6449_v1 = vld [vmem:[#allocation2_spill] sm:$0xff] }
 0x3bf   : > { %4350 = vpow2.f32 %v2405_v58 }
 0x3c0   : > { %v5937_v24 = vpop.eup %4340  ;;  %v2407_v56 = vmul.f32 1.442695, %v2291_v50  ;;  %v2409_v43 = vmul.f32 1.442695, %v2292_v48  ;;  %2498 = vadd.xlane.f32.xlu0 %v2497_v57  ;;  %v6450_v57 = vld [vmem:[#allocation3_spill] sm:$0xff] }
 0x3c1   : > { %6443 = vst [vmem:[#allocation10_spill] sm:$0xff] %v5937_v24  ;;  %v5939_v33 = vpop.eup %4342  ;;  %v2226_v31 = vpop.xlane.xlu0 %2225 }
 0x3c2   : > { %6444 = vst [vmem:[#allocation11_spill] sm:$0xff] %v5939_v33  ;;  %4352 = vpow2.f32 %v2407_v56  ;;  %v2293_v49 = vsub.f32 %v6445_v51, %v2226_v31  ;;  %v2294_v32 = vsub.f32 %v6446_v38, %v2226_v31  ;;  %v2500_v35 = vadd.f32 %v5939_v33, %v5937_v24 }
 0x3c3   : > { %4354 = vpow2.f32 %v2409_v43 }
 0x3c4   : > { %v5945_v2 = vpop.eup %4344  ;;  %v2411_v58 = vmul.f32 1.442695, %v2293_v49  ;;  %v2413_v5 = vmul.f32 1.442695, %v2294_v32  ;;  %2501 = vadd.xlane.f32.xlu1 %v2500_v35  ;;  %v6453_v35 = vld [vmem:[#allocation4_spill] sm:$0xff] }
 0x3c5   : > { %6447 = vst [vmem:[#allocation12_spill] sm:$0xff] %v5945_v2  ;;  %v5947_v26 = vpop.eup %4346  ;;  %v2229_v50 = vpop.xlane.xlu0 %2228 }
 0x3c6   : > { %6448 = vst [vmem:[#allocation13_spill] sm:$0xff] %v5947_v26  ;;  %4356 = vpow2.f32 %v2411_v58  ;;  %v2295_v48 = vsub.f32 %v6449_v1, %v2229_v50  ;;  %v2296_v56 = vsub.f32 %v6450_v57, %v2229_v50  ;;  %v2503_v31 = vadd.f32 %v5947_v26, %v5945_v2  ;;  %v6454_v58 = vld [vmem:[#allocation5_spill] sm:$0xff] }
 0x3c7   : > { %4358 = vpow2.f32 %v2413_v5 }
 0x3c8   : > { %v5953_v51 = vpop.eup %4348  ;;  %v2415_v43 = vmul.f32 1.442695, %v2295_v48  ;;  %v2417_v38 = vmul.f32 1.442695, %v2296_v56  ;;  %2504 = vadd.xlane.f32.xlu0 %v2503_v31  ;;  %v6455_v31 = vld [vmem:[#allocation6_spill] sm:$0xff] }
 0x3c9   : > { %6451 = vst [vmem:[#allocation14_spill] sm:$0xff] %v5953_v51  ;;  %v5955_v49 = vpop.eup %4350  ;;  %v2232_v32 = vpop.xlane.xlu0 %2231 }
 0x3ca   : > { %6452 = vst [vmem:[#allocation15_spill] sm:$0xff] %v5955_v49  ;;  %4360 = vpow2.f32 %v2415_v43  ;;  %v2297_v24 = vsub.f32 %v6453_v35, %v2232_v32  ;;  %v2298_v33 = vsub.f32 %v6454_v58, %v2232_v32  ;;  %v2506_v50 = vadd.f32 %v5955_v49, %v5953_v51  ;;  %v6456_v43 = vld [vmem:[#allocation7_spill] sm:$0xff] }
 0x3cb   : > { %4362 = vpow2.f32 %v2417_v38 }
 0x3cc   : > { %v5961_v1 = vpop.eup %4352  ;;  %v2419_v5 = vmul.f32 1.442695, %v2297_v24  ;;  %v2421_v57 = vmul.f32 1.442695, %v2298_v33  ;;  %2507 = vadd.xlane.f32.xlu1 %v2506_v50  ;;  %v6457_v50 = vld [vmem:[#allocation8_spill] sm:$0xff] }
 0x3cd   : > { %v5963_v48 = vpop.eup %4354  ;;  %v2235_v56 = vpop.xlane.xlu0 %2234 }
 0x3ce   : > { %4364 = vpow2.f32 %v2419_v5  ;;  %v2299_v2 = vsub.f32 %v6455_v31, %v2235_v56  ;;  %v2300_v26 = vsub.f32 %v6456_v43, %v2235_v56  ;;  %v2509_v32 = vadd.f32 %v5963_v48, %v5961_v1  ;;  %v6458_v5 = vld [vmem:[#allocation9_spill] sm:$0xff] }
 0x3cf   : > { %4366 = vpow2.f32 %v2421_v57 }
 0x3d0   : > { %v5969_v35 = vpop.eup %4356  ;;  %v2423_v38 = vmul.f32 1.442695, %v2299_v2  ;;  %v2425_v58 = vmul.f32 1.442695, %v2300_v26  ;;  %2510 = vadd.xlane.f32.xlu0 %v2509_v32 }
 0x3d1   : > { %v5971_v24 = vpop.eup %4358  ;;  %v2238_v33 = vpop.xlane.xlu0 %2237 }
 0x3d2   : > { %4368 = vpow2.f32 %v2423_v38  ;;  %v2301_v51 = vsub.f32 %v6457_v50, %v2238_v33  ;;  %v2302_v49 = vsub.f32 %v6458_v5, %v2238_v33  ;;  %v2512_v56 = vadd.f32 %v5971_v24, %v5969_v35 }
 0x3d3   : > { %4370 = vpow2.f32 %v2425_v58 }
 0x3d4   : > { %v5977_v31 = vpop.eup %4360  ;;  %v2427_v57 = vmul.f32 1.442695, %v2301_v51  ;;  %v2429_v43 = vmul.f32 1.442695, %v2302_v49  ;;  %2513 = vadd.xlane.f32.xlu1 %v2512_v56 }
 0x3d5   : > { %v5979_v2 = vpop.eup %4362 }
 0x3d6   : > { %4372 = vpow2.f32 %v2427_v57  ;;  %v2515_v26 = vadd.f32 %v5979_v2, %v5977_v31 }
 0x3d7   : > { %4374 = vpow2.f32 %v2429_v43 }
 0x3d8   : > { %v5983_v32 = vpop.eup %4364  ;;  %2516 = vadd.xlane.f32.xlu0 %v2515_v26 }
 0x3d9   : > { %6459 = vst [vmem:[#allocation16_spill] sm:$0xff] %v5983_v32  ;;  %v5985_v38 = vpop.eup %4366 }
 0x3da   : > { %6460 = vst [vmem:[#allocation17_spill] sm:$0xff] %v5985_v38  ;;  %v2518_v58 = vadd.f32 %v5985_v38, %v5983_v32 }
 0x3dc   : > { %v5989_v33 = vpop.eup %4368  ;;  %2519 = vadd.xlane.f32.xlu1 %v2518_v58 }
 0x3dd   : > { %6461 = vst [vmem:[#allocation18_spill] sm:$0xff] %v5989_v33  ;;  %v5991_v51 = vpop.eup %4370 }
 0x3de   : > { %6462 = vst [vmem:[#allocation19_spill] sm:$0xff] %v5991_v51  ;;  %v2521_v49 = vadd.f32 %v5991_v51, %v5989_v33 }
 0x3e0   : > { %v5995_v50 = vpop.eup %4372  ;;  %2522 = vadd.xlane.f32.xlu0 %v2521_v49 }
 0x3e1   : > { %6463 = vst [vmem:[#allocation20_spill] sm:$0xff] %v5995_v50  ;;  %v5997_v5 = vpop.eup %4374 }
 0x3e2   : > { %v2524_v56 = vadd.f32 %v5997_v5, %v5995_v50 }
 0x3e4   : > { %2525 = vadd.xlane.f32.xlu1 %v2524_v56 }
 0x3f5   : > { %v2433_v57 = vpop.xlane.xlu1 %2432 }
 0x3f6   : > { %4376 = vrcp.f32 %v2433_v57 }
 0x3f9   : > { %v2436_v43 = vpop.xlane.xlu1 %2435 }
 0x3fa   : > { %4378 = vrcp.f32 %v2436_v43 }
 0x3fd   : > { %v2439_v26 = vpop.xlane.xlu1 %2438 }
 0x3fe   : > { %4380 = vrcp.f32 %v2439_v26 }
 0x400   : > { %v4377_v58 = vpop.eup %4376 }
 0x401   : > { %v2559_v32 = vmul.f32 %v4377_v58, %v5734_v60  ;;  %v2442_v38 = vpop.xlane.xlu1 %2441  ;;  %v2560_v33 = vmul.f32 %v4377_v58, %v5736_v52 }
 0x402   : > { %4382 = vrcp.f32 %v2442_v38 }
 0x403   : > { %2687 = vmatprep.mubr.f32.mxu0 %v2560_v33 }
 0x404   : > { %v4379_v49 = vpop.eup %4378  ;;  %2688 = vmatmul.mubr.f32.vlgmr.msra.gmra.mrb[64].mxu0 %v2559_v32 }
 0x405   : > { %v2445_v51 = vpop.xlane.xlu1 %2444  ;;  %v2562_v50 = vmul.f32 %v4379_v49, %v5748_v62  ;;  %v2561_v56 = vmul.f32 %v4379_v49, %v5745_v18 }
 0x406   : > { %4384 = vrcp.f32 %v2445_v51 }
 0x407   : > { %2692 = vmatprep.mubr.f32.mxu0 %v2562_v50 }
 0x408   : > { %v4381_v57 = vpop.eup %4380  ;;  %2693 = vmatmul.mubr.f32.gmra.mrb[66].mxu0 %v2561_v56 }
 0x409   : > { %v2448_v43 = vpop.xlane.xlu1 %2447  ;;  %v2564_v26 = vmul.f32 %v4381_v57, %v5759_v40  ;;  %v2563_v60 = vmul.f32 %v4381_v57, %v5756_v25 }
 0x40a   : > { %4386 = vrcp.f32 %v2448_v43 }
 0x40b   : > { %2697 = vmatprep.mubr.f32.mxu0 %v2564_v26 }
 0x40c   : > { %v4383_v52 = vpop.eup %4382  ;;  %2698 = vmatmul.mubr.f32.gmra.mrb[68].mxu0 %v2563_v60 }
 0x40d   : > { %v2451_v38 = vpop.xlane.xlu1 %2450  ;;  %v2566_v32 = vmul.f32 %v4383_v52, %v5770_v17  ;;  %v2565_v62 = vmul.f32 %v4383_v52, %v5767_v9 }
 0x40e   : > { %4388 = vrcp.f32 %v2451_v38 }
 0x40f   : > { %2702 = vmatprep.mubr.f32.mxu0 %v2566_v32 }
 0x410   : > { %v4385_v18 = vpop.eup %4384  ;;  %2703 = vmatmul.mubr.f32.gmra.mrb[70].mxu0 %v2565_v62 }
 0x411   : > { %v2454_v33 = vpop.xlane.xlu1 %2453  ;;  %v2568_v51 = vmul.f32 %v4385_v18, %v5780_v22  ;;  %v2567_v40 = vmul.f32 %v4385_v18, %v5778_v14 }
 0x412   : > { %4390 = vrcp.f32 %v2454_v33 }
 0x413   : > { %2707 = vmatprep.mubr.f32.mxu0 %v2568_v51 }
 0x414   : > { %v4387_v25 = vpop.eup %4386  ;;  %2708 = vmatmul.mubr.f32.gmra.mrb[72].mxu0 %v2567_v40 }
 0x415   : > { %v2457_v50 = vpop.xlane.xlu1 %2456  ;;  %v2570_v58 = vmul.f32 %v4387_v25, %v5791_v23  ;;  %v2569_v17 = vmul.f32 %v4387_v25, %v5787_v3 }
 0x416   : > { %4392 = vrcp.f32 %v2457_v50 }
 0x417   : > { %2712 = vmatprep.mubr.f32.mxu0 %v2570_v58 }
 0x418   : > { %v4389_v9 = vpop.eup %4388  ;;  %2713 = vmatmul.mubr.f32.gmra.mrb[74].mxu0 %v2569_v17 }
 0x419   : > { %v2460_v49 = vpop.xlane.xlu1 %2459  ;;  %v2572_v56 = vmul.f32 %v4389_v9, %v5802_v30  ;;  %v2571_v22 = vmul.f32 %v4389_v9, %v5798_v53 }
 0x41a   : > { %4394 = vrcp.f32 %v2460_v49 }
 0x41b   : > { %2717 = vmatprep.mubr.f32.mxu0 %v2572_v56 }
 0x41c   : > { %v4391_v14 = vpop.eup %4390  ;;  %2718 = vmatmul.mubr.f32.gmra.mrb[76].mxu0 %v2571_v22 }
 0x41d   : > { %v2463_v57 = vpop.xlane.xlu0 %2462  ;;  %v2574_v43 = vmul.f32 %v4391_v14, %v5811_v10  ;;  %v2573_v23 = vmul.f32 %v4391_v14, %v5809_v6 }
 0x41e   : > { %4396 = vrcp.f32 %v2463_v57 }
 0x41f   : > { %2722 = vmatprep.mubr.f32.mxu0 %v2574_v43 }
 0x420   : > { %v4393_v3 = vpop.eup %4392  ;;  %2723 = vmatmul.mubr.f32.gmra.mrb[78].mxu0 %v2573_v23 }
 0x421   : > { %v2466_v26 = vpop.xlane.xlu1 %2465  ;;  %v2576_v60 = vmul.f32 %v4393_v3, %v5819_v42  ;;  %v2575_v30 = vmul.f32 %v4393_v3, %v5817_v4 }
 0x422   : > { %4398 = vrcp.f32 %v2466_v26 }
 0x423   : > { %2727 = vmatprep.mubr.f32.mxu0 %v2576_v60 }
 0x424   : > { %v4395_v53 = vpop.eup %4394  ;;  %2728 = vmatmul.mubr.f32.gmra.mrb[80].mxu0 %v2575_v30 }
 0x425   : > { %v2469_v52 = vpop.xlane.xlu0 %2468  ;;  %v2578_v38 = vmul.f32 %v4395_v53, %v5827_v55  ;;  %v2577_v10 = vmul.f32 %v4395_v53, %v5825_v45 }
 0x426   : > { %4400 = vrcp.f32 %v2469_v52 }
 0x427   : > { %2732 = vmatprep.mubr.f32.mxu0 %v2578_v38 }
 0x428   : > { %v4397_v6 = vpop.eup %4396  ;;  %2733 = vmatmul.mubr.f32.gmra.mrb[82].mxu0 %v2577_v10 }
 0x429   : > { %v2472_v32 = vpop.xlane.xlu1 %2471  ;;  %v2580_v62 = vmul.f32 %v4397_v6, %v5835_v47  ;;  %v2579_v42 = vmul.f32 %v4397_v6, %v5833_v37 }
 0x42a   : > { %4402 = vrcp.f32 %v2472_v32  ;;  %v6464_v32 = vld [vmem:[#allocation11_spill] sm:$0xff] }
 0x42b   : > { %2737 = vmatprep.mubr.f32.mxu0 %v2580_v62 }
 0x42c   : > { %v4399_v4 = vpop.eup %4398  ;;  %2738 = vmatmul.mubr.f32.gmra.mrb[84].mxu0 %v2579_v42  ;;  %v6465_v42 = vld [vmem:[#allocation10_spill] sm:$0xff] }
 0x42d   : > { %v2475_v18 = vpop.xlane.xlu0 %2474  ;;  %v2582_v33 = vmul.f32 %v4399_v4, %v5843_v63  ;;  %v2581_v55 = vmul.f32 %v4399_v4, %v5841_v21 }
 0x42e   : > { %4404 = vrcp.f32 %v2475_v18  ;;  %v6466_v18 = vld [vmem:[#allocation13_spill] sm:$0xff] }
 0x42f   : > { %2742 = vmatprep.mubr.f32.mxu0 %v2582_v33 }
 0x430   : > { %v4401_v45 = vpop.eup %4400  ;;  %2743 = vmatmul.mubr.f32.gmra.mrb[86].mxu0 %v2581_v55  ;;  %v6467_v55 = vld [vmem:[#allocation12_spill] sm:$0xff] }
 0x431   : > { %v2478_v51 = vpop.xlane.xlu1 %2477  ;;  %v2584_v40 = vmul.f32 %v4401_v45, %v5851_v15  ;;  %v2583_v47 = vmul.f32 %v4401_v45, %v5849_v7 }
 0x432   : > { %4406 = vrcp.f32 %v2478_v51  ;;  %v6468_v51 = vld [vmem:[#allocation15_spill] sm:$0xff] }
 0x433   : > { %2747 = vmatprep.mubr.f32.mxu0 %v2584_v40 }
 0x434   : > { %v4403_v37 = vpop.eup %4402  ;;  %2748 = vmatmul.mubr.f32.gmra.mrb[88].mxu0 %v2583_v47  ;;  %v6469_v47 = vld [vmem:[#allocation14_spill] sm:$0xff] }
 0x435   : > { %v2481_v25 = vpop.xlane.xlu0 %2480  ;;  %v2586_v50 = vmul.f32 %v4403_v37, %v5859_v61  ;;  %v2585_v63 = vmul.f32 %v4403_v37, %v5857_v39 }
 0x436   : > { %4408 = vrcp.f32 %v2481_v25 }
 0x437   : > { %2752 = vmatprep.mubr.f32.mxu0 %v2586_v50 }
 0x438   : > { %v4405_v21 = vpop.eup %4404  ;;  %2753 = vmatmul.mubr.f32.gmra.mrb[90].mxu0 %v2585_v63 }
 0x439   : > { %v2484_v58 = vpop.xlane.xlu1 %2483  ;;  %v2588_v17 = vmul.f32 %v4405_v21, %v5867_v46  ;;  %v2587_v15 = vmul.f32 %v4405_v21, %v5865_v59 }
 0x43a   : > { %4410 = vrcp.f32 %v2484_v58 }
 0x43b   : > { %2757 = vmatprep.mubr.f32.mxu0 %v2588_v17 }
 0x43c   : > { %v4407_v7 = vpop.eup %4406  ;;  %2758 = vmatmul.mubr.f32.gmra.mrb[92].mxu0 %v2587_v15 }
 0x43d   : > { %v2487_v9 = vpop.xlane.xlu0 %2486  ;;  %v2590_v49 = vmul.f32 %v4407_v7, %v5875_v0  ;;  %v2589_v61 = vmul.f32 %v4407_v7, %v5873_v8 }
 0x43e   : > { %4412 = vrcp.f32 %v2487_v9 }
 0x43f   : > { %2762 = vmatprep.mubr.f32.mxu0 %v2590_v49 }
 0x440   : > { %v4409_v39 = vpop.eup %4408  ;;  %2763 = vmatmul.mubr.f32.gmra.mrb[94].mxu0 %v2589_v61 }
 0x441   : > { %v2490_v56 = vpop.xlane.xlu1 %2489  ;;  %v2592_v22 = vmul.f32 %v4409_v39, %v5883_v27  ;;  %v2591_v46 = vmul.f32 %v4409_v39, %v5881_v20  ;;  %v6470_v39 = vld [vmem:[#allocation17_spill] sm:$0xff] }
 0x442   : > { %4414 = vrcp.f32 %v2490_v56 }
 0x443   : > { %2767 = vmatprep.mubr.f32.mxu0 %v2592_v22 }
 0x444   : > { %v4411_v59 = vpop.eup %4410  ;;  %2768 = vmatmul.mubr.f32.gmra.mrb[96].mxu0 %v2591_v46  ;;  %v6472_v46 = vld [vmem:[#allocation19_spill] sm:$0xff] }
 0x445   : > { %v2493_v14 = vpop.xlane.xlu0 %2492  ;;  %v2594_v57 = vmul.f32 %v4411_v59, %v5891_v54  ;;  %v2593_v0 = vmul.f32 %v4411_v59, %v5889_v12 }
 0x446   : > { %4416 = vrcp.f32 %v2493_v14 }
 0x447   : > { %2772 = vmatprep.mubr.f32.mxu0 %v2594_v57 }
 0x448   : > { %v4413_v8 = vpop.eup %4412  ;;  %2773 = vmatmul.mubr.f32.gmra.mrb[98].mxu0 %v2593_v0  ;;  %v6474_v0 = vld [vmem:[#allocation20_spill] sm:$0xff] }
 0x449   : > { %v2496_v43 = vpop.xlane.xlu1 %2495  ;;  %v2596_v23 = vmul.f32 %v4413_v8, %v5899_v41  ;;  %v2595_v27 = vmul.f32 %v4413_v8, %v5897_v44 }
 0x44a   : > { %4418 = vrcp.f32 %v2496_v43  ;;  %v6075_v43 = vld [vmem:[%s519_s24] ss:$0 sm:$0xff] }
 0x44b   : > { %2777 = vmatprep.mubr.f32.mxu0 %v2596_v23 }
 0x44c   : > { %v4415_v20 = vpop.eup %4414  ;;  %2778 = vmatmul.mubr.f32.gmra.mrb[100].mxu0 %v2595_v27  ;;  %v6077_v27 = vld [vmem:[%s522_s29] ss:$0 sm:$0xff] }
 0x44d   : > { %v2499_v3 = vpop.xlane.xlu0 %2498  ;;  %v2598_v26 = vmul.f32 %v4415_v20, %v5907_v11  ;;  %v2597_v54 = vmul.f32 %v4415_v20, %v5905_v29 }
 0x44e   : > { %4420 = vrcp.f32 %v2499_v3 }
 0x44f   : > { %2782 = vmatprep.mubr.f32.mxu0 %v2598_v26 }
 0x450   : > { %v4417_v12 = vpop.eup %4416  ;;  %2783 = vmatmul.mubr.f32.gmra.mrb[102].mxu0 %v2597_v54 }
 0x451   : > { %v2502_v60 = vpop.xlane.xlu1 %2501  ;;  %v2600_v30 = vmul.f32 %v4417_v12, %v5915_v19  ;;  %v2599_v41 = vmul.f32 %v4417_v12, %v5913_v13 }
 0x452   : > { %4422 = vrcp.f32 %v2502_v60 }
 0x453   : > { %2787 = vmatprep.mubr.f32.mxu0 %v2600_v30 }
 0x454   : > { %v4419_v44 = vpop.eup %4418  ;;  %2788 = vmatmul.mubr.f32.gmra.mrb[104].mxu0 %v2599_v41 }
 0x455   : > { %v2505_v53 = vpop.xlane.xlu0 %2504  ;;  %v2602_v52 = vmul.f32 %v4419_v44, %v5923_v16  ;;  %v2601_v11 = vmul.f32 %v4419_v44, %v5921_v28 }
 0x456   : > { %4424 = vrcp.f32 %v2505_v53 }
 0x457   : > { %2792 = vmatprep.mubr.f32.mxu0 %v2602_v52 }
 0x458   : > { %v4421_v29 = vpop.eup %4420  ;;  %2793 = vmatmul.mubr.f32.gmra.mrb[106].mxu0 %v2601_v11 }
 0x459   : > { %v2508_v38 = vpop.xlane.xlu1 %2507  ;;  %v2604_v10 = vmul.f32 %v4421_v29, %v5931_v36  ;;  %v2603_v19 = vmul.f32 %v4421_v29, %v5929_v34 }
 0x45a   : > { %4426 = vrcp.f32 %v2508_v38 }
 0x45b   : > { %2797 = vmatprep.mubr.f32.mxu0 %v2604_v10 }
 0x45c   : > { %v4423_v13 = vpop.eup %4422  ;;  %2798 = vmatmul.mubr.f32.gmra.mrb[108].mxu0 %v2603_v19 }
 0x45d   : > { %v2511_v6 = vpop.xlane.xlu0 %2510  ;;  %v2606_v62 = vmul.f32 %v4423_v13, %v6464_v32  ;;  %v2605_v16 = vmul.f32 %v4423_v13, %v6465_v42 }
 0x45e   : > { %4428 = vrcp.f32 %v2511_v6 }
 0x45f   : > { %2802 = vmatprep.mubr.f32.mxu0 %v2606_v62 }
 0x460   : > { %v4425_v28 = vpop.eup %4424  ;;  %2803 = vmatmul.mubr.f32.gmra.mrb[110].mxu0 %v2605_v16 }
 0x461   : > { %v2514_v4 = vpop.xlane.xlu1 %2513  ;;  %v2608_v33 = vmul.f32 %v4425_v28, %v6466_v18  ;;  %v2607_v36 = vmul.f32 %v4425_v28, %v6467_v55 }
 0x462   : > { %4430 = vrcp.f32 %v2514_v4 }
 0x463   : > { %2807 = vmatprep.mubr.f32.mxu0 %v2608_v33 }
 0x464   : > { %v4427_v34 = vpop.eup %4426  ;;  %2808 = vmatmul.mubr.f32.gmra.mrb[112].mxu0 %v2607_v36 }
 0x465   : > { %v2517_v45 = vpop.xlane.xlu0 %2516  ;;  %v2610_v40 = vmul.f32 %v4427_v34, %v6468_v51  ;;  %v2609_v37 = vmul.f32 %v4427_v34, %v6469_v47 }
 0x466   : > { %4432 = vrcp.f32 %v2517_v45 }
 0x467   : > { %2812 = vmatprep.mubr.f32.mxu0 %v2610_v40 }
 0x468   : > { %v4429_v25 = vpop.eup %4428  ;;  %2813 = vmatmul.mubr.f32.gmra.mrb[114].mxu0 %v2609_v37 }
 0x469   : > { %v2520_v50 = vpop.xlane.xlu1 %2519  ;;  %v2612_v63 = vmul.f32 %v4429_v25, %v5963_v48  ;;  %v2611_v21 = vmul.f32 %v4429_v25, %v5961_v1 }
 0x46a   : > { %4434 = vrcp.f32 %v2520_v50 }
 0x46b   : > { %2817 = vmatprep.mubr.f32.mxu0 %v2612_v63 }
 0x46c   : > { %v4431_v58 = vpop.eup %4430  ;;  %2818 = vmatmul.mubr.f32.gmra.mrb[116].mxu0 %v2611_v21 }
 0x46d   : > { %v2523_v17 = vpop.xlane.xlu0 %2522  ;;  %v2614_v15 = vmul.f32 %v4431_v58, %v5971_v24  ;;  %v2613_v7 = vmul.f32 %v4431_v58, %v5969_v35  ;;  %v6471_v24 = vld [vmem:[#allocation16_spill] sm:$0xff] }
 0x46e   : > { %4436 = vrcp.f32 %v2523_v17 }
 0x46f   : > { %2822 = vmatprep.mubr.f32.mxu0 %v2614_v15 }
 0x470   : > { %v4433_v9 = vpop.eup %4432  ;;  %2823 = vmatmul.mubr.f32.gmra.mrb[118].mxu0 %v2613_v7 }
 0x471   : > { %v2526_v49 = vpop.xlane.xlu1 %2525  ;;  %v2616_v61 = vmul.f32 %v4433_v9, %v5979_v2  ;;  %v2615_v48 = vmul.f32 %v4433_v9, %v5977_v31  ;;  %v6473_v2 = vld [vmem:[#allocation18_spill] sm:$0xff] }
 0x472   : > { %4438 = vrcp.f32 %v2526_v49 }
 0x473   : > { %2827 = vmatprep.mubr.f32.mxu0 %v2616_v61 }
 0x474   : > { %v4435_v1 = vpop.eup %4434  ;;  %2828 = vmatmul.mubr.f32.gmra.mrb[120].mxu0 %v2615_v48 }
 0x475   : > { %v2618_v56 = vmul.f32 %v4435_v1, %v6470_v39  ;;  %v2617_v35 = vmul.f32 %v4435_v1, %v6471_v24 }
 0x477   : > { %2832 = vmatprep.mubr.f32.mxu0 %v2618_v56 }
 0x478   : > { %v4437_v22 = vpop.eup %4436  ;;  %2833 = vmatmul.mubr.f32.gmra.mrb[122].mxu0 %v2617_v35 }
 0x479   : > { %v2620_v59 = vmul.f32 %v4437_v22, %v6472_v46  ;;  %v2619_v14 = vmul.f32 %v4437_v22, %v6473_v2 }
 0x47b   : > { %2837 = vmatprep.mubr.f32.mxu0 %v2620_v59 }
 0x47c   : > { %v4439_v31 = vpop.eup %4438  ;;  %2838 = vmatmul.mubr.f32.gmra.mrb[124].mxu0 %v2619_v14 }
 0x47d   : > { %v2622_v57 = vmul.f32 %v4439_v31, %v5997_v5  ;;  %v2621_v8 = vmul.f32 %v4439_v31, %v6474_v0 }
 0x47f   : > { %2842 = vmatprep.mubr.f32.mxu0 %v2622_v57 }
 0x480   : > { %2843 = vmatmul.mubr.f32.gmra.mrb[126].mxu0 %v2621_v8 }
 0x4d7   : > { %v2689_v23 = vpop.f32.mrb[64].mxu0 }
 0x4d8   : > { %v2855_v5 = vmul.f32 %v6075_v43, %v2689_v23  ;;  %v2691_v20 = vpop.f32.mrb[65].mxu0 }
 0x4da   : > { %v2894_v3 = vadd.f32 %v6077_v27, %v2855_v5 }
 0x4db   : > { %v2694_v26 = vpop.f32.mrb[66].mxu0 }
 0x4dc   : > { %v2926_v54 = vmax.f32 %v2894_v3, 0.0  ;;  %v2856_v12 = vmul.f32 %v6075_v43, %v2694_v26  ;;  %v2696_v60 = vpop.f32.mrb[67].mxu0 }
 0x4de   : > { %2958 = vst.msk [vmem:[%s6084_s14] sm:$0xff] %vm1340_vm0, %v2926_v54  ;;  %v2895_v30 = vadd.f32 %v6077_v27, %v2856_v12 }
 0x4df   : > { %v2699_v41 = vpop.f32.mrb[68].mxu0 }
 0x4e0   : > { %v2927_v44 = vmax.f32 %v2895_v30, 0.0  ;;  %v2857_v53 = vmul.f32 %v6075_v43, %v2699_v41  ;;  %v2701_v52 = vpop.f32.mrb[69].mxu0 }
 0x4e2   : > { %2959 = vst.msk [vmem:[%s6084_s14 + $0x8] sm:$0xff] %vm1340_vm0, %v2927_v44  ;;  %v2896_v11 = vadd.f32 %v6077_v27, %v2857_v53 }
 0x4e3   : > { %v2704_v29 = vpop.f32.mrb[70].mxu0 }
 0x4e4   : > { %v2928_v38 = vmax.f32 %v2896_v11, 0.0  ;;  %v2858_v10 = vmul.f32 %v6075_v43, %v2704_v29  ;;  %v2706_v19 = vpop.f32.mrb[71].mxu0 }
 0x4e6   : > { %2960 = vst.msk [vmem:[%s6084_s14 + $0x10] sm:$0xff] %vm1340_vm0, %v2928_v38  ;;  %v2897_v13 = vadd.f32 %v6077_v27, %v2858_v10 }
 0x4e7   : > { %v2709_v6 = vpop.f32.mrb[72].mxu0 }
 0x4e8   : > { %v2929_v32 = vmax.f32 %v2897_v13, 0.0  ;;  %v2859_v62 = vmul.f32 %v6075_v43, %v2709_v6  ;;  %v2711_v42 = vpop.f32.mrb[73].mxu0 }
 0x4ea   : > { %2961 = vst.msk [vmem:[%s6084_s14 + $0x18] sm:$0xff] %vm1340_vm0, %v2929_v32  ;;  %v2898_v16 = vadd.f32 %v6077_v27, %v2859_v62 }
 0x4eb   : > { %v2714_v28 = vpop.f32.mrb[74].mxu0 }
 0x4ec   : > { %v2930_v4 = vmax.f32 %v2898_v16, 0.0  ;;  %v2860_v18 = vmul.f32 %v6075_v43, %v2714_v28  ;;  %v2716_v33 = vpop.f32.mrb[75].mxu0 }
 0x4ee   : > { %2962 = vst.msk [vmem:[%s6084_s14 + $0x20] sm:$0xff] %vm1340_vm0, %v2930_v4  ;;  %v2899_v55 = vadd.f32 %v6077_v27, %v2860_v18 }
 0x4ef   : > { %v2719_v36 = vpop.f32.mrb[76].mxu0 }
 0x4f0   : > { %v2931_v34 = vmax.f32 %v2899_v55, 0.0  ;;  %v2861_v45 = vmul.f32 %v6075_v43, %v2719_v36  ;;  %v2721_v51 = vpop.f32.mrb[77].mxu0 }
 0x4f2   : > { %2963 = vst.msk [vmem:[%s6084_s14 + $0x28] sm:$0xff] %vm1340_vm0, %v2931_v34  ;;  %v2900_v40 = vadd.f32 %v6077_v27, %v2861_v45 }
 0x4f3   : > { %v2724_v47 = vpop.f32.mrb[78].mxu0 }
 0x4f4   : > { %v2932_v37 = vmax.f32 %v2900_v40, 0.0  ;;  %v2862_v25 = vmul.f32 %v6075_v43, %v2724_v47  ;;  %v2726_v50 = vpop.f32.mrb[79].mxu0 }
 0x4f6   : > { %2964 = vst.msk [vmem:[%s6084_s14 + $0x30] sm:$0xff] %vm1340_vm0, %v2932_v37  ;;  %v2901_v63 = vadd.f32 %v6077_v27, %v2862_v25 }
 0x4f7   : > { %v2729_v21 = vpop.f32.mrb[80].mxu0 }
 0x4f8   : > { %v2933_v58 = vmax.f32 %v2901_v63, 0.0  ;;  %v2863_v17 = vmul.f32 %v6075_v43, %v2729_v21  ;;  %v2731_v15 = vpop.f32.mrb[81].mxu0 }
 0x4fa   : > { %2965 = vst.msk [vmem:[%s6084_s14 + $0x38] sm:$0xff] %vm1340_vm0, %v2933_v58  ;;  %v2902_v7 = vadd.f32 %v6077_v27, %v2863_v17 }
 0x4fb   : > { %v2734_v9 = vpop.f32.mrb[82].mxu0 }
 0x4fc   : > { %v2934_v49 = vmax.f32 %v2902_v7, 0.0  ;;  %v2864_v61 = vmul.f32 %v6075_v43, %v2734_v9  ;;  %v2736_v48 = vpop.f32.mrb[83].mxu0 }
 0x4fe   : > { %2966 = vst.msk [vmem:[%s6084_s14 + $0x40] sm:$0xff] %vm1340_vm0, %v2934_v49  ;;  %v2903_v1 = vadd.f32 %v6077_v27, %v2864_v61 }
 0x4ff   : > { %v2739_v39 = vpop.f32.mrb[84].mxu0 }
 0x500   : > { %v2935_v56 = vmax.f32 %v2903_v1, 0.0  ;;  %v2865_v24 = vmul.f32 %v6075_v43, %v2739_v39  ;;  %v2741_v35 = vpop.f32.mrb[85].mxu0 }
 0x502   : > { %2967 = vst.msk [vmem:[%s6084_s14 + $0x48] sm:$0xff] %vm1340_vm0, %v2935_v56  ;;  %v2904_v22 = vadd.f32 %v6077_v27, %v2865_v24 }
 0x503   : > { %v2744_v46 = vpop.f32.mrb[86].mxu0 }
 0x504   : > { %v2936_v59 = vmax.f32 %v2904_v22, 0.0  ;;  %v2866_v2 = vmul.f32 %v6075_v43, %v2744_v46  ;;  %v2746_v14 = vpop.f32.mrb[87].mxu0 }
 0x506   : > { %2968 = vst.msk [vmem:[%s6084_s14 + $0x50] sm:$0xff] %vm1340_vm0, %v2936_v59  ;;  %v2905_v31 = vadd.f32 %v6077_v27, %v2866_v2 }
 0x507   : > { %v2749_v57 = vpop.f32.mrb[88].mxu0 }
 0x508   : > { %v2937_v0 = vmax.f32 %v2905_v31, 0.0  ;;  %v2867_v8 = vmul.f32 %v6075_v43, %v2749_v57  ;;  %v2751_v23 = vpop.f32.mrb[89].mxu0 }
 0x50a   : > { %2969 = vst.msk [vmem:[%s6084_s14 + $0x58] sm:$0xff] %vm1340_vm0, %v2937_v0  ;;  %v2906_v5 = vadd.f32 %v6077_v27, %v2867_v8 }
 0x50b   : > { %v2754_v20 = vpop.f32.mrb[90].mxu0 }
 0x50c   : > { %v2938_v3 = vmax.f32 %v2906_v5, 0.0  ;;  %v2868_v26 = vmul.f32 %v6075_v43, %v2754_v20  ;;  %v2756_v54 = vpop.f32.mrb[91].mxu0 }
 0x50e   : > { %2970 = vst.msk [vmem:[%s6084_s14 + $0x60] sm:$0xff] %vm1340_vm0, %v2938_v3  ;;  %v2907_v12 = vadd.f32 %v6077_v27, %v2868_v26 }
 0x50f   : > { %v2759_v60 = vpop.f32.mrb[92].mxu0 }
 0x510   : > { %v2939_v30 = vmax.f32 %v2907_v12, 0.0  ;;  %v2869_v41 = vmul.f32 %v6075_v43, %v2759_v60  ;;  %v2761_v44 = vpop.f32.mrb[93].mxu0 }
 0x512   : > { %2971 = vst.msk [vmem:[%s6084_s14 + $0x68] sm:$0xff] %vm1340_vm0, %v2939_v30  ;;  %v2908_v53 = vadd.f32 %v6077_v27, %v2869_v41 }
 0x513   : > { %v2764_v52 = vpop.f32.mrb[94].mxu0 }
 0x514   : > { %v2940_v11 = vmax.f32 %v2908_v53, 0.0  ;;  %v2870_v29 = vmul.f32 %v6075_v43, %v2764_v52  ;;  %v2766_v38 = vpop.f32.mrb[95].mxu0 }
 0x516   : > { %2972 = vst.msk [vmem:[%s6084_s14 + $0x70] sm:$0xff] %vm1340_vm0, %v2940_v11  ;;  %v2909_v10 = vadd.f32 %v6077_v27, %v2870_v29 }
 0x517   : > { %v2769_v19 = vpop.f32.mrb[96].mxu0 }
 0x518   : > { %v2941_v13 = vmax.f32 %v2909_v10, 0.0  ;;  %v2871_v6 = vmul.f32 %v6075_v43, %v2769_v19  ;;  %v2771_v32 = vpop.f32.mrb[97].mxu0 }
 0x51a   : > { %2973 = vst.msk [vmem:[%s6084_s14 + $0x78] sm:$0xff] %vm1340_vm0, %v2941_v13  ;;  %v2910_v62 = vadd.f32 %v6077_v27, %v2871_v6 }
 0x51b   : > { %v2774_v42 = vpop.f32.mrb[98].mxu0 }
 0x51c   : > { %v2942_v16 = vmax.f32 %v2910_v62, 0.0  ;;  %v2872_v28 = vmul.f32 %v6075_v43, %v2774_v42  ;;  %v2776_v4 = vpop.f32.mrb[99].mxu0 }
 0x51e   : > { %2974 = vst.msk [vmem:[%s6084_s14 + $0x80] sm:$0xff] %vm1340_vm0, %v2942_v16  ;;  %v2911_v18 = vadd.f32 %v6077_v27, %v2872_v28 }
 0x51f   : > { %v2779_v33 = vpop.f32.mrb[100].mxu0 }
 0x520   : > { %v2943_v55 = vmax.f32 %v2911_v18, 0.0  ;;  %v2873_v36 = vmul.f32 %v6075_v43, %v2779_v33  ;;  %v2781_v34 = vpop.f32.mrb[101].mxu0 }
 0x522   : > { %2975 = vst.msk [vmem:[%s6084_s14 + $0x88] sm:$0xff] %vm1340_vm0, %v2943_v55  ;;  %v2912_v45 = vadd.f32 %v6077_v27, %v2873_v36 }
 0x523   : > { %v2784_v51 = vpop.f32.mrb[102].mxu0 }
 0x524   : > { %v2944_v40 = vmax.f32 %v2912_v45, 0.0  ;;  %v2874_v47 = vmul.f32 %v6075_v43, %v2784_v51  ;;  %v2786_v37 = vpop.f32.mrb[103].mxu0 }
 0x526   : > { %2976 = vst.msk [vmem:[%s6084_s14 + $0x90] sm:$0xff] %vm1340_vm0, %v2944_v40  ;;  %v2913_v25 = vadd.f32 %v6077_v27, %v2874_v47 }
 0x527   : > { %v2789_v50 = vpop.f32.mrb[104].mxu0 }
 0x528   : > { %v2945_v63 = vmax.f32 %v2913_v25, 0.0  ;;  %v2875_v21 = vmul.f32 %v6075_v43, %v2789_v50  ;;  %v2791_v58 = vpop.f32.mrb[105].mxu0 }
 0x52a   : > { %2977 = vst.msk [vmem:[%s6084_s14 + $0x98] sm:$0xff] %vm1340_vm0, %v2945_v63  ;;  %v2914_v17 = vadd.f32 %v6077_v27, %v2875_v21 }
 0x52b   : > { %v2794_v15 = vpop.f32.mrb[106].mxu0 }
 0x52c   : > { %v2946_v7 = vmax.f32 %v2914_v17, 0.0  ;;  %v2876_v9 = vmul.f32 %v6075_v43, %v2794_v15  ;;  %v2796_v49 = vpop.f32.mrb[107].mxu0 }
 0x52e   : > { %2978 = vst.msk [vmem:[%s6084_s14 + $0xa0] sm:$0xff] %vm1340_vm0, %v2946_v7  ;;  %v2915_v61 = vadd.f32 %v6077_v27, %v2876_v9 }
 0x52f   : > { %v2799_v48 = vpop.f32.mrb[108].mxu0 }
 0x530   : > { %v2947_v1 = vmax.f32 %v2915_v61, 0.0  ;;  %v2877_v39 = vmul.f32 %v6075_v43, %v2799_v48  ;;  %v2801_v56 = vpop.f32.mrb[109].mxu0 }
 0x532   : > { %2979 = vst.msk [vmem:[%s6084_s14 + $0xa8] sm:$0xff] %vm1340_vm0, %v2947_v1  ;;  %v2916_v24 = vadd.f32 %v6077_v27, %v2877_v39 }
 0x533   : > { %v2804_v35 = vpop.f32.mrb[110].mxu0 }
 0x534   : > { %v2948_v22 = vmax.f32 %v2916_v24, 0.0  ;;  %v2878_v46 = vmul.f32 %v6075_v43, %v2804_v35  ;;  %v2806_v59 = vpop.f32.mrb[111].mxu0 }
 0x536   : > { %2980 = vst.msk [vmem:[%s6084_s14 + $0xb0] sm:$0xff] %vm1340_vm0, %v2948_v22  ;;  %v2917_v2 = vadd.f32 %v6077_v27, %v2878_v46 }
 0x537   : > { %v2809_v14 = vpop.f32.mrb[112].mxu0 }
 0x538   : > { %v2949_v31 = vmax.f32 %v2917_v2, 0.0  ;;  %v2879_v57 = vmul.f32 %v6075_v43, %v2809_v14  ;;  %v2811_v0 = vpop.f32.mrb[113].mxu0 }
 0x53a   : > { %2981 = vst.msk [vmem:[%s6084_s14 + $0xb8] sm:$0xff] %vm1340_vm0, %v2949_v31  ;;  %v2918_v8 = vadd.f32 %v6077_v27, %v2879_v57 }
 0x53b   : > { %v2814_v23 = vpop.f32.mrb[114].mxu0 }
 0x53c   : > { %v2950_v5 = vmax.f32 %v2918_v8, 0.0  ;;  %v2880_v20 = vmul.f32 %v6075_v43, %v2814_v23  ;;  %v2816_v3 = vpop.f32.mrb[115].mxu0 }
 0x53e   : > { %2982 = vst.msk [vmem:[%s6084_s14 + $0xc0] sm:$0xff] %vm1340_vm0, %v2950_v5  ;;  %v2919_v26 = vadd.f32 %v6077_v27, %v2880_v20 }
 0x53f   : > { %v2819_v54 = vpop.f32.mrb[116].mxu0 }
 0x540   : > { %v2951_v12 = vmax.f32 %v2919_v26, 0.0  ;;  %v2881_v60 = vmul.f32 %v6075_v43, %v2819_v54  ;;  %v2821_v30 = vpop.f32.mrb[117].mxu0 }
 0x542   : > { %2983 = vst.msk [vmem:[%s6084_s14 + $0xc8] sm:$0xff] %vm1340_vm0, %v2951_v12  ;;  %v2920_v41 = vadd.f32 %v6077_v27, %v2881_v60 }
 0x543   : > { %v2824_v44 = vpop.f32.mrb[118].mxu0 }
 0x544   : > { %v2952_v53 = vmax.f32 %v2920_v41, 0.0  ;;  %v2882_v52 = vmul.f32 %v6075_v43, %v2824_v44  ;;  %v2826_v11 = vpop.f32.mrb[119].mxu0 }
 0x546   : > { %2984 = vst.msk [vmem:[%s6084_s14 + $0xd0] sm:$0xff] %vm1340_vm0, %v2952_v53  ;;  %v2921_v29 = vadd.f32 %v6077_v27, %v2882_v52 }
 0x547   : > { %v2829_v38 = vpop.f32.mrb[120].mxu0 }
 0x548   : > { %v2953_v10 = vmax.f32 %v2921_v29, 0.0  ;;  %v2883_v19 = vmul.f32 %v6075_v43, %v2829_v38  ;;  %v2831_v13 = vpop.f32.mrb[121].mxu0 }
 0x54a   : > { %2985 = vst.msk [vmem:[%s6084_s14 + $0xd8] sm:$0xff] %vm1340_vm0, %v2953_v10  ;;  %v2922_v6 = vadd.f32 %v6077_v27, %v2883_v19 }
 0x54b   : > { %v2834_v32 = vpop.f32.mrb[122].mxu0 }
 0x54c   : > { %v2954_v62 = vmax.f32 %v2922_v6, 0.0  ;;  %v2884_v42 = vmul.f32 %v6075_v43, %v2834_v32  ;;  %v2836_v16 = vpop.f32.mrb[123].mxu0 }
 0x54e   : > { %2986 = vst.msk [vmem:[%s6084_s14 + $0xe0] sm:$0xff] %vm1340_vm0, %v2954_v62  ;;  %v2923_v28 = vadd.f32 %v6077_v27, %v2884_v42 }
 0x54f   : > { %v2839_v4 = vpop.f32.mrb[124].mxu0 }
 0x550   : > { %v2955_v18 = vmax.f32 %v2923_v28, 0.0  ;;  %v2885_v33 = vmul.f32 %v6075_v43, %v2839_v4  ;;  %v2841_v55 = vpop.f32.mrb[125].mxu0 }
 0x552   : > { %2987 = vst.msk [vmem:[%s6084_s14 + $0xe8] sm:$0xff] %vm1340_vm0, %v2955_v18  ;;  %v2924_v36 = vadd.f32 %v6077_v27, %v2885_v33 }
 0x553   : > { %v2844_v34 = vpop.f32.mrb[126].mxu0 }
 0x554   : > { %v2956_v45 = vmax.f32 %v2924_v36, 0.0  ;;  %v2886_v51 = vmul.f32 %v6075_v43, %v2844_v34  ;;  %v2846_v40 = vpop.f32.mrb[127].mxu0 }
 0x556   : > { %2988 = vst.msk [vmem:[%s6084_s14 + $0xf0] sm:$0xff] %vm1340_vm0, %v2956_v45  ;;  %v2925_v47 = vadd.f32 %v6077_v27, %v2886_v51 }
 0x558   : > { %v2957_v37 = vmax.f32 %v2925_v47, 0.0 }
 0x55a   : > { %2989 = vst.msk [vmem:[%s6084_s14 + $0xf8] sm:$0xff] %vm1340_vm0, %v2957_v37 }
 0x55b PF: > { %s20_s17 = sadd.s32 1, %s4478_s17   ;;  %s6475_s13 = smov %s4470_s15 }
 0x55c   : > { %p17_p7 = scmp.ge.s32.totalorder %s20_s17, 10   ;;  %s6476_s14 = smov %s4474_s16 }
 0x55d   : > { %s6477_s15 = smov %s6480_s18  ;;  %s6478_s16 = smov %s6484_s19 }
 0x55e   :  { %19 = sbr.rel (!%p17_p7) target bundleno = 3 (0x3), region = 117 }

// kernel: m_decoder_block_forward.2
= control target key start
LH: loop header
LB: loop body
LE: loop exit
PB: predicated region body
PF: predicated region fallthrough
CT: control target
= control target key end

     0   :  { %s3438_s15 = smov 0   ;;  %s5003_s0 = inlined_call_operand.vmem [shape: f32[2,16,16,4], index: 0, kind: input, shape index: {}]   ;;  %s5004_s1 = inlined_call_operand.vmem [shape: f32[2,16,16,4], index: 1, kind: input, shape index: {}]   ;;  %s5005_s2 = inlined_call_operand.vmem [shape: f32[1152,128], index: 2, kind: input, shape index: {}]   ;;  %s5006_s3 = inlined_call_operand.vmem [shape: f32[1,128], index: 3, kind: input, shape index: {}]   ;;  %s5007_s4 = inlined_call_operand.vmem [shape: f32[2,16,16,128], index: 4, kind: output, shape index: {}]  }
   0x1 LB: > { %s2821_s16 = sadd.s32 4294967295, %s3408_s15   ;;  %p2825_p0 = scmp.ge.s32.totalorder %s3408_s15, 1  ;;  %s3408_s15 = sphi %s3438_s15, %s14_s15  }
   0x2   : > { %p172_p1 = scmp.lt.s32.totalorder %s3408_s15, 3 }
   0x4   : > { %p173_p2 = pnand %p2825_p0, %p172_p1 }
   0x6   : > { %176 = sbr.rel (%p173_p2) target bundleno = 647 (0x287), region = 36 }
   0xd   : > { %p203_p3 = scmp.lt.s32.totalorder %s2821_s16, 1  ;;  %v3449_v0 = vld [vmem:[%s5005_s2] sm:$0xff]  ;;  %v3454_v1 = vld [vmem:[%s5005_s2 + $0x8] sm:$0xff]  ;;  %v3459_v2 = vld [vmem:[%s5005_s2 + $0x10] sm:$0xff]  ;;  %v5008_v3 = vmov 0.0|0.0   ;;  %v3411_v10 = vmov 0.0  }
   0xe   : > { %2966 = vmatprep.subr.bf16.mxu1 %v5008_v3  ;;  %v2967_v4 = vpack.c.bf16 %v3454_v1, %v3449_v0  ;;  %v3467_v5 = vld [vmem:[%s5005_s2 + $0x18] sm:$0xff]  ;;  %3014 = vmatprep.subr.bf16.mxu0 %v5008_v3  ;;  %v3473_v6 = vld [vmem:[%s5005_s2 + $0x100] sm:$0xff]  ;;  %v3478_v7 = vld [vmem:[%s5005_s2 + $0x108] sm:$0xff]  ;;  %223 = vst [vmem:[#allocation2 + $0x28] sm:$0xff] %v3411_v10  ;;  %s3412_s20 = smov 4   ;;  %vm323_vm0 = vcmask 31744  }
   0xf   : > { %s5139_s16 = smov (!%p203_p3, %s2821_s16), 1  ;;  %v3015_v8 = vpack.c.bf16 %v3478_v7, %v3473_v6  ;;  %v3487_v9 = vld [vmem:[%s5005_s2 + $0x110] sm:$0xff]  ;;  %218 = vst [vmem:[#allocation2] sm:$0xff] %v3411_v10  ;;  %219 = vst [vmem:[#allocation2 + $0x8] sm:$0xff] %v3411_v10  ;;  %1629 = vmatprep.mubr.f32.mxu1 %v3411_v10  ;;  %v1449_v11 = vld [vmem:[%s5005_s2 + $0x118] sm:$0xff]  ;;  %v2970_v12 = vpack.c.bf16 %v3467_v5, %v3459_v2  ;;  %vm516_vm1 = vcmask 64544  }
  0x10   : > { %220 = vst [vmem:[#allocation2 + $0x10] sm:$0xff] %v3411_v10  ;;  %221 = vst [vmem:[#allocation2 + $0x18] sm:$0x1] %v3411_v10  ;;  %2968 = vmatpush1.bf16.msra.mxu1 %v2967_v4  ;;  %s3569_s7 = sshll.u32 %s5139_s16, 8  ;;  %v1418_v13 = vld [vmem:[%s5005_s2 + $0x20] sm:$0xff]  ;;  %v3018_v14 = vpack.c.bf16 %v1449_v11, %v3487_v9  ;;  %v1419_v15 = vld [vmem:[%s5005_s2 + $0x28] sm:$0xff] }
  0x11   : > { %222 = vst [vmem:[#allocation2 + $0x20] sm:$0xff] %v3411_v10  ;;  %224 = vst [vmem:[#allocation2 + $0x30] sm:$0xff] %v3411_v10  ;;  %2969 = vmatprep.subr.bf16.mxu1 %v5008_v3  ;;  %3016 = vmatpush1.bf16.msra.mxu0 %v3015_v8  ;;  %s3585_s12 = scalar_lea.vmem %s5004_s1, %s3569_s7  ;;  %v1450_v16 = vld [vmem:[%s5005_s2 + $0x120] sm:$0xff]  ;;  %v1451_v17 = vld [vmem:[%s5005_s2 + $0x128] sm:$0xff]  ;;  %v2973_v22 = vpack.c.bf16 %v1419_v15, %v1418_v13  ;;  %s3700_s21 = scalar_lea.vmem %s5003_s0, %s3569_s7 }
  0x12   : > { %225 = vst [vmem:[#allocation2 + $0x38] sm:$0x1] %v3411_v10  ;;  %226 = vst [vmem:[#allocation2 + $0x40] sm:$0xff] %v3411_v10  ;;  %3017 = vmatprep.subr.bf16.mxu0 %v5008_v3  ;;  %v356_v18 = vld [vmem:[%s3585_s12] sm:$0xff]  ;;  %v358_v19 = vld [vmem:[%s3585_s12 + $0x10] sm:$0xff]  ;;  %v3021_v24 = vpack.c.bf16 %v1451_v17, %v1450_v16  ;;  %s4891_s17 = scalar_lea.vmem %s5007_s4, %s3569_s7 }
  0x13   : > { %227 = vst [vmem:[#allocation2 + $0x48] sm:$0xff] %v3411_v10  ;;  %228 = vst [vmem:[#allocation2 + $0x50] sm:$0xff] %v3411_v10  ;;  %420 = vrot.lane.b32.xlu0 %v356_v18, %s3412_s20  ;;  %424 = vrot.lane.b32.xlu1 %v358_v19, %s3412_s20  ;;  %v357_v20 = vld [vmem:[%s3585_s12 + $0x8] sm:$0xff]  ;;  %v359_v21 = vld [vmem:[%s3585_s12 + $0x18] sm:$0xff] }
  0x14   : > { %229 = vst [vmem:[#allocation2 + $0x58] sm:$0x1] %v3411_v10  ;;  %230 = vst [vmem:[#allocation2 + $0x60] sm:$0xff] %v3411_v10  ;;  %2971 = vmatpush1.bf16.msra.mxu1 %v2970_v12  ;;  %v1420_v23 = vld [vmem:[%s5005_s2 + $0x30] sm:$0xff]  ;;  %v1421_v25 = vld [vmem:[%s5005_s2 + $0x38] sm:$0xff] }
  0x15   : > { %231 = vst [vmem:[#allocation2 + $0x68] sm:$0xff] %v3411_v10  ;;  %232 = vst [vmem:[#allocation2 + $0x70] sm:$0xff] %v3411_v10  ;;  %3019 = vmatpush1.bf16.msra.mxu0 %v3018_v14  ;;  %2972 = vmatprep.subr.bf16.mxu1 %v5008_v3  ;;  %v1452_v26 = vld [vmem:[%s5005_s2 + $0x130] sm:$0xff]  ;;  %v1453_v27 = vld [vmem:[%s5005_s2 + $0x138] sm:$0xff]  ;;  %v2976_v30 = vpack.c.bf16 %v1421_v25, %v1420_v23 }
  0x16   : > { %233 = vst [vmem:[#allocation2 + $0x78] sm:$0x1] %v3411_v10  ;;  %234 = vst [vmem:[#allocation2 + $0x80] sm:$0xff] %v3411_v10  ;;  %3020 = vmatprep.subr.bf16.mxu0 %v5008_v3  ;;  %v361_v28 = vld [vmem:[%s3585_s12 + $0x28] sm:$0xff]  ;;  %v360_v29 = vld [vmem:[%s3585_s12 + $0x20] sm:$0xff]  ;;  %v3024_v31 = vpack.c.bf16 %v1453_v27, %v1452_v26 }
  0x17   : > { %235 = vst [vmem:[#allocation2 + $0x88] sm:$0xff] %v3411_v10  ;;  %236 = vst [vmem:[#allocation2 + $0x90] sm:$0xff] %v3411_v10  ;;  %422 = vrot.lane.b32.xlu0 %v357_v20, %s3412_s20  ;;  %426 = vrot.lane.b32.xlu1 %v359_v21, %s3412_s20  ;;  %v1422_v32 = vld [vmem:[%s5005_s2 + $0x40] sm:$0xff]  ;;  %v1423_v33 = vld [vmem:[%s5005_s2 + $0x48] sm:$0xff] }
  0x18   : > { %237 = vst [vmem:[#allocation2 + $0x98] sm:$0x1] %v3411_v10  ;;  %238 = vst [vmem:[#allocation2 + $0xa0] sm:$0xff] %v3411_v10  ;;  %2974 = vmatpush1.bf16.msra.mxu1 %v2973_v22  ;;  %v1454_v34 = vld [vmem:[%s5005_s2 + $0x140] sm:$0xff]  ;;  %v1455_v35 = vld [vmem:[%s5005_s2 + $0x148] sm:$0xff]  ;;  %v2979_v38 = vpack.c.bf16 %v1423_v33, %v1422_v32 }
  0x19   : > { %239 = vst [vmem:[#allocation2 + $0xa8] sm:$0xff] %v3411_v10  ;;  %240 = vst [vmem:[#allocation2 + $0xb0] sm:$0xff] %v3411_v10  ;;  %3022 = vmatpush1.bf16.msra.mxu0 %v3021_v24  ;;  %2975 = vmatprep.subr.bf16.mxu1 %v5008_v3  ;;  %v363_v36 = vld [vmem:[%s3585_s12 + $0x38] sm:$0xff]  ;;  %v362_v37 = vld [vmem:[%s3585_s12 + $0x30] sm:$0xff]  ;;  %v3027_v40 = vpack.c.bf16 %v1455_v35, %v1454_v34 }
  0x1a   : > { %241 = vst [vmem:[#allocation2 + $0xb8] sm:$0x1] %v3411_v10  ;;  %242 = vst [vmem:[#allocation2 + $0xc0] sm:$0xff] %v3411_v10  ;;  %3023 = vmatprep.subr.bf16.mxu0 %v5008_v3  ;;  %v1424_v39 = vld [vmem:[%s5005_s2 + $0x50] sm:$0xff]  ;;  %v1425_v41 = vld [vmem:[%s5005_s2 + $0x58] sm:$0xff] }
  0x1b   : > { %243 = vst [vmem:[#allocation2 + $0xc8] sm:$0xff] %v3411_v10  ;;  %244 = vst [vmem:[#allocation2 + $0xd0] sm:$0xff] %v3411_v10  ;;  %430 = vrot.lane.b32.xlu1 %v361_v28, %s3412_s20  ;;  %428 = vrot.lane.b32.xlu0 %v360_v29, %s3412_s20  ;;  %v1456_v42 = vld [vmem:[%s5005_s2 + $0x150] sm:$0xff]  ;;  %v1457_v43 = vld [vmem:[%s5005_s2 + $0x158] sm:$0xff]  ;;  %v2982_v46 = vpack.c.bf16 %v1425_v41, %v1424_v39 }
  0x1c   : > { %245 = vst [vmem:[#allocation2 + $0xd8] sm:$0x1] %v3411_v10  ;;  %246 = vst [vmem:[#allocation2 + $0xe0] sm:$0xff] %v3411_v10  ;;  %2977 = vmatpush1.bf16.msra.mxu1 %v2976_v30  ;;  %v365_v44 = vld [vmem:[%s3585_s12 + $0x48] sm:$0xff]  ;;  %v364_v45 = vld [vmem:[%s3585_s12 + $0x40] sm:$0xff]  ;;  %v3030_v48 = vpack.c.bf16 %v1457_v43, %v1456_v42 }
  0x1d   : > { %247 = vst [vmem:[#allocation2 + $0xe8] sm:$0xff] %v3411_v10  ;;  %248 = vst [vmem:[#allocation2 + $0xf0] sm:$0xff] %v3411_v10  ;;  %3025 = vmatpush1.bf16.msra.mxu0 %v3024_v31  ;;  %2978 = vmatprep.subr.bf16.mxu1 %v5008_v3  ;;  %v1426_v47 = vld [vmem:[%s5005_s2 + $0x60] sm:$0xff]  ;;  %v1427_v49 = vld [vmem:[%s5005_s2 + $0x68] sm:$0xff] }
  0x1e   : > { %249 = vst [vmem:[#allocation2 + $0xf8] sm:$0x1] %v3411_v10  ;;  %250 = vst [vmem:[#allocation2 + $0x100] sm:$0xff] %v3411_v10  ;;  %3026 = vmatprep.subr.bf16.mxu0 %v5008_v3  ;;  %v1458_v50 = vld [vmem:[%s5005_s2 + $0x160] sm:$0xff]  ;;  %v1459_v51 = vld [vmem:[%s5005_s2 + $0x168] sm:$0xff]  ;;  %v2985_v54 = vpack.c.bf16 %v1427_v49, %v1426_v47 }
  0x1f   : > { %251 = vst [vmem:[#allocation2 + $0x108] sm:$0xff] %v3411_v10  ;;  %252 = vst [vmem:[#allocation2 + $0x110] sm:$0xff] %v3411_v10  ;;  %434 = vrot.lane.b32.xlu1 %v363_v36, %s3412_s20  ;;  %432 = vrot.lane.b32.xlu0 %v362_v37, %s3412_s20  ;;  %v367_v52 = vld [vmem:[%s3585_s12 + $0x58] sm:$0xff]  ;;  %v366_v53 = vld [vmem:[%s3585_s12 + $0x50] sm:$0xff]  ;;  %v3033_v56 = vpack.c.bf16 %v1459_v51, %v1458_v50 }
  0x20   : > { %253 = vst [vmem:[#allocation2 + $0x118] sm:$0x1] %v3411_v10  ;;  %254 = vst [vmem:[#allocation2 + $0x120] sm:$0xff] %v3411_v10  ;;  %2980 = vmatpush1.bf16.msra.mxu1 %v2979_v38  ;;  %v1428_v55 = vld [vmem:[%s5005_s2 + $0x70] sm:$0xff]  ;;  %v1429_v57 = vld [vmem:[%s5005_s2 + $0x78] sm:$0xff] }
  0x21   : > { %255 = vst [vmem:[#allocation2 + $0x128] sm:$0xff] %v3411_v10  ;;  %256 = vst [vmem:[#allocation2 + $0x130] sm:$0xff] %v3411_v10  ;;  %3028 = vmatpush1.bf16.msra.mxu0 %v3027_v40  ;;  %2981 = vmatprep.subr.bf16.mxu1 %v5008_v3  ;;  %v1460_v58 = vld [vmem:[%s5005_s2 + $0x170] sm:$0xff]  ;;  %v1461_v59 = vld [vmem:[%s5005_s2 + $0x178] sm:$0xff]  ;;  %v2988_v62 = vpack.c.bf16 %v1429_v57, %v1428_v55 }
  0x22   : > { %257 = vst [vmem:[#allocation2 + $0x138] sm:$0x1] %v3411_v10  ;;  %258 = vst [vmem:[#allocation2 + $0x140] sm:$0xff] %v3411_v10  ;;  %3029 = vmatprep.subr.bf16.mxu0 %v5008_v3  ;;  %v369_v60 = vld [vmem:[%s3585_s12 + $0x68] sm:$0xff]  ;;  %v368_v61 = vld [vmem:[%s3585_s12 + $0x60] sm:$0xff]  ;;  %v3036_v0 = vpack.c.bf16 %v1461_v59, %v1460_v58 }
  0x23   : > { %259 = vst [vmem:[#allocation2 + $0x148] sm:$0xff] %v3411_v10  ;;  %260 = vst [vmem:[#allocation2 + $0x150] sm:$0xff] %v3411_v10  ;;  %438 = vrot.lane.b32.xlu1 %v365_v44, %s3412_s20  ;;  %436 = vrot.lane.b32.xlu0 %v364_v45, %s3412_s20  ;;  %v1430_v63 = vld [vmem:[%s5005_s2 + $0x80] sm:$0xff]  ;;  %v1431_v1 = vld [vmem:[%s5005_s2 + $0x88] sm:$0xff] }
  0x24   : > { %261 = vst [vmem:[#allocation2 + $0x158] sm:$0x1] %v3411_v10  ;;  %262 = vst [vmem:[#allocation2 + $0x160] sm:$0xff] %v3411_v10  ;;  %2983 = vmatpush1.bf16.msra.mxu1 %v2982_v46  ;;  %v1462_v2 = vld [vmem:[%s5005_s2 + $0x180] sm:$0xff]  ;;  %v1463_v4 = vld [vmem:[%s5005_s2 + $0x188] sm:$0xff]  ;;  %v2991_v8 = vpack.c.bf16 %v1431_v1, %v1430_v63 }
  0x25   : > { %263 = vst [vmem:[#allocation2 + $0x168] sm:$0xff] %v3411_v10  ;;  %264 = vst [vmem:[#allocation2 + $0x170] sm:$0xff] %v3411_v10  ;;  %3031 = vmatpush1.bf16.msra.mxu0 %v3030_v48  ;;  %2984 = vmatprep.subr.bf16.mxu1 %v5008_v3  ;;  %v371_v5 = vld [vmem:[%s3585_s12 + $0x78] sm:$0xff]  ;;  %v370_v6 = vld [vmem:[%s3585_s12 + $0x70] sm:$0xff]  ;;  %v3039_v11 = vpack.c.bf16 %v1463_v4, %v1462_v2 }
  0x26   : > { %265 = vst [vmem:[#allocation2 + $0x178] sm:$0x1] %v3411_v10  ;;  %266 = vst [vmem:[#allocation2 + $0x180] sm:$0xff] %v3411_v10  ;;  %3032 = vmatprep.subr.bf16.mxu0 %v5008_v3  ;;  %v1432_v7 = vld [vmem:[%s5005_s2 + $0x90] sm:$0xff]  ;;  %v1433_v9 = vld [vmem:[%s5005_s2 + $0x98] sm:$0xff] }
  0x27   : > { %267 = vst [vmem:[#allocation2 + $0x188] sm:$0xff] %v3411_v10  ;;  %268 = vst [vmem:[#allocation2 + $0x190] sm:$0xff] %v3411_v10  ;;  %442 = vrot.lane.b32.xlu1 %v367_v52, %s3412_s20  ;;  %440 = vrot.lane.b32.xlu0 %v366_v53, %s3412_s20  ;;  %v1464_v12 = vld [vmem:[%s5005_s2 + $0x190] sm:$0xff]  ;;  %v290_v13 = vld [vmem:[%s3700_s21] sm:$0xff]  ;;  %v2994_v20 = vpack.c.bf16 %v1433_v9, %v1432_v7 }
  0x28   : > { %269 = vst [vmem:[#allocation2 + $0x198] sm:$0x1] %v3411_v10  ;;  %270 = vst [vmem:[#allocation2 + $0x1a0] sm:$0xff] %v3411_v10  ;;  %2986 = vmatpush1.bf16.msra.mxu1 %v2985_v54  ;;  %v1465_v14 = vld [vmem:[%s5005_s2 + $0x198] sm:$0xff]  ;;  %v292_v15 = vld [vmem:[%s3700_s21 + $0x10] sm:$0xff] }
  0x29   : > { %271 = vst [vmem:[#allocation2 + $0x1a8] sm:$0xff] %v3411_v10  ;;  %272 = vst [vmem:[#allocation2 + $0x1b0] sm:$0xff] %v3411_v10  ;;  %3034 = vmatpush1.bf16.msra.mxu0 %v3033_v56  ;;  %2987 = vmatprep.subr.bf16.mxu1 %v5008_v3  ;;  %v291_v16 = vld [vmem:[%s3700_s21 + $0x8] sm:$0xff]  ;;  %v372_v18 = vld [vmem:[%s3585_s12 + $0x80] sm:$0xff]  ;;  %v3042_v23 = vpack.c.bf16 %v1465_v14, %v1464_v12 }
  0x2a   : > { %273 = vst [vmem:[#allocation2 + $0x1b8] sm:$0x1] %v3411_v10  ;;  %274 = vst [vmem:[#allocation2 + $0x1c0] sm:$0xff] %v3411_v10  ;;  %3035 = vmatprep.subr.bf16.mxu0 %v5008_v3  ;;  %v373_v17 = vld [vmem:[%s3585_s12 + $0x88] sm:$0xff]  ;;  %v293_v19 = vld [vmem:[%s3700_s21 + $0x18] sm:$0xff] }
  0x2b   : > { %275 = vst [vmem:[#allocation2 + $0x1c8] sm:$0xff] %v3411_v10  ;;  %276 = vst [vmem:[#allocation2 + $0x1d0] sm:$0xff] %v3411_v10  ;;  %446 = vrot.lane.b32.xlu1 %v369_v60, %s3412_s20  ;;  %444 = vrot.lane.b32.xlu0 %v368_v61, %s3412_s20  ;;  %v1434_v21 = vld [vmem:[%s5005_s2 + $0xa0] sm:$0xff]  ;;  %v1435_v22 = vld [vmem:[%s5005_s2 + $0xa8] sm:$0xff] }
  0x2c   : > { %277 = vst [vmem:[#allocation2 + $0x1d8] sm:$0x1] %v3411_v10  ;;  %278 = vst [vmem:[#allocation2 + $0x1e0] sm:$0xff] %v3411_v10  ;;  %2989 = vmatpush1.bf16.msra.mxu1 %v2988_v62  ;;  %v1466_v24 = vld [vmem:[%s5005_s2 + $0x1a0] sm:$0xff]  ;;  %v1467_v25 = vld [vmem:[%s5005_s2 + $0x1a8] sm:$0xff]  ;;  %v2997_v31 = vpack.c.bf16 %v1435_v22, %v1434_v21 }
  0x2d   : > { %279 = vst [vmem:[#allocation2 + $0x1e8] sm:$0xff] %v3411_v10  ;;  %280 = vst [vmem:[#allocation2 + $0x1f0] sm:$0xff] %v3411_v10  ;;  %3037 = vmatpush1.bf16.msra.mxu0 %v3036_v0  ;;  %2990 = vmatprep.subr.bf16.mxu1 %v5008_v3  ;;  %v295_v26 = vld [vmem:[%s3700_s21 + $0x28] sm:$0xff]  ;;  %v294_v27 = vld [vmem:[%s3700_s21 + $0x20] sm:$0xff]  ;;  %v3045_v34 = vpack.c.bf16 %v1467_v25, %v1466_v24 }
  0x2e   : > { %281 = vst [vmem:[#allocation2 + $0x1f8] sm:$0x1] %v3411_v10  ;;  %282 = vst [vmem:[#allocation2 + $0x200] sm:$0xff] %v3411_v10  ;;  %3038 = vmatprep.subr.bf16.mxu0 %v5008_v3  ;;  %v375_v28 = vld [vmem:[%s3585_s12 + $0x98] sm:$0xff]  ;;  %v374_v29 = vld [vmem:[%s3585_s12 + $0x90] sm:$0xff] }
  0x2f   : > { %283 = vst [vmem:[#allocation2 + $0x208] sm:$0xff] %v3411_v10  ;;  %284 = vst [vmem:[#allocation2 + $0x210] sm:$0xff] %v3411_v10  ;;  %450 = vrot.lane.b32.xlu1 %v371_v5, %s3412_s20  ;;  %448 = vrot.lane.b32.xlu0 %v370_v6, %s3412_s20  ;;  %v297_v30 = vld [vmem:[%s3700_s21 + $0x38] sm:$0xff]  ;;  %v1436_v32 = vld [vmem:[%s5005_s2 + $0xb0] sm:$0xff] }
  0x30   : > { %285 = vst [vmem:[#allocation2 + $0x218] sm:$0x1] %v3411_v10  ;;  %286 = vst [vmem:[#allocation2 + $0x220] sm:$0xff] %v3411_v10  ;;  %2992 = vmatpush1.bf16.msra.mxu1 %v2991_v8  ;;  %v1437_v33 = vld [vmem:[%s5005_s2 + $0xb8] sm:$0xff]  ;;  %v296_v35 = vld [vmem:[%s3700_s21 + $0x30] sm:$0xff] }
  0x31   : > { %287 = vst [vmem:[#allocation2 + $0x228] sm:$0xff] %v3411_v10  ;;  %288 = vst [vmem:[#allocation2 + $0x230] sm:$0xff] %v3411_v10  ;;  %3040 = vmatpush1.bf16.msra.mxu0 %v3039_v11  ;;  %2993 = vmatprep.subr.bf16.mxu1 %v5008_v3  ;;  %v1468_v36 = vld [vmem:[%s5005_s2 + $0x1b0] sm:$0xff]  ;;  %v1469_v37 = vld [vmem:[%s5005_s2 + $0x1b8] sm:$0xff]  ;;  %v3000_v42 = vpack.c.bf16 %v1437_v33, %v1436_v32 }
  0x32   : > { %289 = vst [vmem:[#allocation2 + $0x238] sm:$0x1] %v3411_v10  ;;  %324 = vst.msk [vmem:[#allocation2 + $0x28] sm:$0xff] %vm323_vm0, %v290_v13  ;;  %3041 = vmatprep.subr.bf16.mxu0 %v5008_v3  ;;  %v299_v38 = vld [vmem:[%s3700_s21 + $0x48] sm:$0xff]  ;;  %v298_v39 = vld [vmem:[%s3700_s21 + $0x40] sm:$0xff]  ;;  %v3048_v44 = vpack.c.bf16 %v1469_v37, %v1468_v36 }
  0x33   : > { %326 = vst.msk [vmem:[#allocation2 + $0x48] sm:$0xff] %vm323_vm0, %v292_v15  ;;  %325 = vst.msk [vmem:[#allocation2 + $0x30] sm:$0xff] %vm323_vm0, %v291_v16  ;;  %454 = vrot.lane.b32.xlu1 %v373_v17, %s3412_s20  ;;  %452 = vrot.lane.b32.xlu0 %v372_v18, %s3412_s20  ;;  %v377_v40 = vld [vmem:[%s3585_s12 + $0xa8] sm:$0xff]  ;;  %v376_v41 = vld [vmem:[%s3585_s12 + $0xa0] sm:$0xff] }
  0x34   : > { %327 = vst.msk [vmem:[#allocation2 + $0x50] sm:$0xff] %vm323_vm0, %v293_v19  ;;  %329 = vst.msk [vmem:[#allocation2 + $0x70] sm:$0xff] %vm323_vm0, %v295_v26  ;;  %2995 = vmatpush1.bf16.msra.mxu1 %v2994_v20  ;;  %v1438_v43 = vld [vmem:[%s5005_s2 + $0xc0] sm:$0xff]  ;;  %v301_v45 = vld [vmem:[%s3700_s21 + $0x58] sm:$0xff] }
  0x35   : > { %328 = vst.msk [vmem:[#allocation2 + $0x68] sm:$0xff] %vm323_vm0, %v294_v27  ;;  %3043 = vmatpush1.bf16.msra.mxu0 %v3042_v23  ;;  %331 = vst.msk [vmem:[#allocation2 + $0x90] sm:$0xff] %vm323_vm0, %v297_v30  ;;  %2996 = vmatprep.subr.bf16.mxu1 %v5008_v3  ;;  %v300_v46 = vld [vmem:[%s3700_s21 + $0x50] sm:$0xff]  ;;  %v1439_v47 = vld [vmem:[%s5005_s2 + $0xc8] sm:$0xff] }
  0x36   : > { %3044 = vmatprep.subr.bf16.mxu0 %v5008_v3  ;;  %330 = vst.msk [vmem:[#allocation2 + $0x88] sm:$0xff] %vm323_vm0, %v296_v35  ;;  %333 = vst.msk [vmem:[#allocation2 + $0xb0] sm:$0xff] %vm323_vm0, %v299_v38  ;;  %v1470_v48 = vld [vmem:[%s5005_s2 + $0x1c0] sm:$0xff]  ;;  %v1471_v49 = vld [vmem:[%s5005_s2 + $0x1c8] sm:$0xff]  ;;  %v3003_v54 = vpack.c.bf16 %v1439_v47, %v1438_v43 }
  0x37   : > { %458 = vrot.lane.b32.xlu1 %v375_v28, %s3412_s20  ;;  %456 = vrot.lane.b32.xlu0 %v374_v29, %s3412_s20  ;;  %332 = vst.msk [vmem:[#allocation2 + $0xa8] sm:$0xff] %vm323_vm0, %v298_v39  ;;  %335 = vst.msk [vmem:[#allocation2 + $0xd0] sm:$0xff] %vm323_vm0, %v301_v45  ;;  %v303_v50 = vld [vmem:[%s3700_s21 + $0x68] sm:$0xff]  ;;  %v302_v51 = vld [vmem:[%s3700_s21 + $0x60] sm:$0xff]  ;;  %v3051_v56 = vpack.c.bf16 %v1471_v49, %v1470_v48 }
  0x38   : > { %2998 = vmatpush1.bf16.msra.mxu1 %v2997_v31  ;;  %334 = vst.msk [vmem:[#allocation2 + $0xc8] sm:$0xff] %vm323_vm0, %v300_v46  ;;  %v379_v52 = vld [vmem:[%s3585_s12 + $0xb8] sm:$0xff]  ;;  %v378_v53 = vld [vmem:[%s3585_s12 + $0xb0] sm:$0xff]  ;;  %337 = vst.msk [vmem:[#allocation2 + $0xf0] sm:$0xff] %vm323_vm0, %v303_v50 }
  0x39   : > { %3046 = vmatpush1.bf16.msra.mxu0 %v3045_v34  ;;  %2999 = vmatprep.subr.bf16.mxu1 %v5008_v3  ;;  %336 = vst.msk [vmem:[#allocation2 + $0xe8] sm:$0xff] %vm323_vm0, %v302_v51  ;;  %v1440_v55 = vld [vmem:[%s5005_s2 + $0xd0] sm:$0xff]  ;;  %v305_v57 = vld [vmem:[%s3700_s21 + $0x78] sm:$0xff]  ;;  %v381_v62 = vld [vmem:[%s3585_s12 + $0xc8] sm:$0xff] }
  0x3a   : > { %3047 = vmatprep.subr.bf16.mxu0 %v5008_v3  ;;  %v304_v58 = vld [vmem:[%s3700_s21 + $0x70] sm:$0xff]  ;;  %v1441_v59 = vld [vmem:[%s5005_s2 + $0xd8] sm:$0xff]  ;;  %339 = vst.msk [vmem:[#allocation2 + $0x110] sm:$0xff] %vm323_vm0, %v305_v57  ;;  %v380_v63 = vld [vmem:[%s3585_s12 + $0xc0] sm:$0xff] }
  0x3b   : > { %462 = vrot.lane.b32.xlu1 %v377_v40, %s3412_s20  ;;  %460 = vrot.lane.b32.xlu0 %v376_v41, %s3412_s20  ;;  %v1472_v60 = vld [vmem:[%s5005_s2 + $0x1d0] sm:$0xff]  ;;  %v1473_v61 = vld [vmem:[%s5005_s2 + $0x1d8] sm:$0xff]  ;;  %338 = vst.msk [vmem:[#allocation2 + $0x108] sm:$0xff] %vm323_vm0, %v304_v58  ;;  %v3006_v0 = vpack.c.bf16 %v1441_v59, %v1440_v55  ;;  %v549_v26 = vld [vmem:[#allocation2 + $0x7] sm:$0xff] }
  0x3c   : > { %3001 = vmatpush1.bf16.msra.mxu1 %v3000_v42  ;;  %v1442_v1 = vld [vmem:[%s5005_s2 + $0xe0] sm:$0xff]  ;;  %v3054_v2 = vpack.c.bf16 %v1473_v61, %v1472_v60  ;;  %v1443_v4 = vld [vmem:[%s5005_s2 + $0xe8] sm:$0xff]  ;;  %v383_v9 = vld [vmem:[%s3585_s12 + $0xd8] sm:$0xff] }
  0x3d   : > { %3049 = vmatpush1.bf16.msra.mxu0 %v3048_v44  ;;  %3002 = vmatprep.subr.bf16.mxu1 %v5008_v3  ;;  %v1474_v5 = vld [vmem:[%s5005_s2 + $0x1e0] sm:$0xff]  ;;  %v1475_v6 = vld [vmem:[%s5005_s2 + $0x1e8] sm:$0xff]  ;;  %v382_v11 = vld [vmem:[%s3585_s12 + $0xd0] sm:$0xff]  ;;  %v3009_v12 = vpack.c.bf16 %v1443_v4, %v1442_v1 }
  0x3e   : > { %3050 = vmatprep.subr.bf16.mxu0 %v5008_v3  ;;  %v307_v7 = vld [vmem:[%s3700_s21 + $0x88] sm:$0xff]  ;;  %v306_v8 = vld [vmem:[%s3700_s21 + $0x80] sm:$0xff]  ;;  %v1444_v13 = vld [vmem:[%s5005_s2 + $0xf0] sm:$0xff]  ;;  %v3057_v14 = vpack.c.bf16 %v1475_v6, %v1474_v5 }
  0x3f   : > { %466 = vrot.lane.b32.xlu1 %v379_v52, %s3412_s20  ;;  %464 = vrot.lane.b32.xlu0 %v378_v53, %s3412_s20  ;;  %341 = vst.msk [vmem:[#allocation2 + $0x130] sm:$0xff] %vm323_vm0, %v307_v7  ;;  %340 = vst.msk [vmem:[#allocation2 + $0x128] sm:$0xff] %vm323_vm0, %v306_v8  ;;  %v1445_v15 = vld [vmem:[%s5005_s2 + $0xf8] sm:$0xff]  ;;  %v1476_v16 = vld [vmem:[%s5005_s2 + $0x1f0] sm:$0xff] }
  0x40   : > { %3004 = vmatpush1.bf16.msra.mxu1 %v3003_v54  ;;  %v1477_v17 = vld [vmem:[%s5005_s2 + $0x1f8] sm:$0xff]  ;;  %v385_v18 = vld [vmem:[%s3585_s12 + $0xe8] sm:$0xff]  ;;  %v384_v19 = vld [vmem:[%s3585_s12 + $0xe0] sm:$0xff]  ;;  %v3012_v20 = vpack.c.bf16 %v1445_v15, %v1444_v13 }
  0x41   : > { %3052 = vmatpush1.bf16.msra.mxu0 %v3051_v56  ;;  %3005 = vmatprep.subr.bf16.mxu1 %v5008_v3  ;;  %v3060_v21 = vpack.c.bf16 %v1477_v17, %v1476_v16  ;;  %v1510_v22 = vld [vmem:[%s5005_s2 + $0x300] sm:$0xff]  ;;  %v1511_v23 = vld [vmem:[%s5005_s2 + $0x308] sm:$0xff]  ;;  %v309_v24 = vld [vmem:[%s3700_s21 + $0x98] sm:$0xff] }
  0x42   : > { %3053 = vmatprep.subr.bf16.mxu0 %v5008_v3  ;;  %v308_v25 = vld [vmem:[%s3700_s21 + $0x90] sm:$0xff]  ;;  %v387_v27 = vld [vmem:[%s3585_s12 + $0xf8] sm:$0xff]  ;;  %343 = vst.msk [vmem:[#allocation2 + $0x150] sm:$0xff] %vm323_vm0, %v309_v24  ;;  %v3897_v29 = vpack.c.bf16 %v1511_v23, %v1510_v22  ;;  %v1514_v34 = vld [vmem:[%s5005_s2 + $0x320] sm:$0xff] }
  0x43   : > { %470 = vrot.lane.b32.xlu1 %v381_v62, %s3412_s20  ;;  %468 = vrot.lane.b32.xlu0 %v380_v63, %s3412_s20  ;;  %342 = vst.msk [vmem:[#allocation2 + $0x148] sm:$0xff] %vm323_vm0, %v308_v25  ;;  %v386_v28 = vld [vmem:[%s3585_s12 + $0xf0] sm:$0xff]  ;;  %v1513_v31 = vld [vmem:[%s5005_s2 + $0x318] sm:$0xff] }
  0x44   : > { %3007 = vmatpush1.bf16.msra.mxu1 %v3006_v0  ;;  %v1512_v30 = vld [vmem:[%s5005_s2 + $0x310] sm:$0xff]  ;;  %v1515_v35 = vld [vmem:[%s5005_s2 + $0x328] sm:$0xff]  ;;  %v310_v36 = vld [vmem:[%s3700_s21 + $0xa0] sm:$0xff] }
  0x45   : > { %3055 = vmatpush1.bf16.msra.mxu0 %v3054_v2  ;;  %3008 = vmatprep.subr.bf16.mxu1 %v5008_v3  ;;  %v550_v32 = vld [vmem:[#allocation2 + $0xf] sm:$0xff]  ;;  %v3909_v33 = vpack.c.bf16 %v1513_v31, %v1512_v30  ;;  %344 = vst.msk [vmem:[#allocation2 + $0x168] sm:$0xff] %vm323_vm0, %v310_v36  ;;  %v3923_v37 = vpack.c.bf16 %v1515_v35, %v1514_v34  ;;  %v1517_v39 = vld [vmem:[%s5005_s2 + $0x338] sm:$0xff]  ;;  %v1518_v41 = vld [vmem:[%s5005_s2 + $0x340] sm:$0xff] }
  0x46   : > { %3056 = vmatprep.subr.bf16.mxu0 %v5008_v3  ;;  %v1516_v38 = vld [vmem:[%s5005_s2 + $0x330] sm:$0xff]  ;;  %v1519_v42 = vld [vmem:[%s5005_s2 + $0x348] sm:$0xff]  ;;  %v313_v43 = vld [vmem:[%s3700_s21 + $0xb8] sm:$0xff] }
  0x47   : > { %474 = vrot.lane.b32.xlu1 %v383_v9, %s3412_s20  ;;  %472 = vrot.lane.b32.xlu0 %v382_v11, %s3412_s20  ;;  %v3933_v40 = vpack.c.bf16 %v1517_v39, %v1516_v38  ;;  %v312_v44 = vld [vmem:[%s3700_s21 + $0xb0] sm:$0xff]  ;;  %347 = vst.msk [vmem:[#allocation2 + $0x190] sm:$0xff] %vm323_vm0, %v313_v43  ;;  %v3947_v45 = vpack.c.bf16 %v1519_v42, %v1518_v41  ;;  %v1521_v47 = vld [vmem:[%s5005_s2 + $0x358] sm:$0xff] }
  0x48   : > { %3010 = vmatpush1.bf16.msra.mxu1 %v3009_v12  ;;  %346 = vst.msk [vmem:[#allocation2 + $0x188] sm:$0xff] %vm323_vm0, %v312_v44  ;;  %v1520_v46 = vld [vmem:[%s5005_s2 + $0x350] sm:$0xff]  ;;  %v1522_v49 = vld [vmem:[%s5005_s2 + $0x360] sm:$0xff]  ;;  %v1523_v50 = vld [vmem:[%s5005_s2 + $0x368] sm:$0xff] }
  0x49   : > { %3058 = vmatpush1.bf16.msra.mxu0 %v3057_v14  ;;  %3011 = vmatprep.subr.bf16.mxu1 %v5008_v3  ;;  %v3957_v48 = vpack.c.bf16 %v1521_v47, %v1520_v46  ;;  %v315_v51 = vld [vmem:[%s3700_s21 + $0xc8] sm:$0xff]  ;;  %v314_v52 = vld [vmem:[%s3700_s21 + $0xc0] sm:$0xff]  ;;  %v3971_v53 = vpack.c.bf16 %v1523_v50, %v1522_v49  ;;  %v1524_v54 = vld [vmem:[%s5005_s2 + $0x370] sm:$0xff] }
  0x4a   : > { %3059 = vmatprep.subr.bf16.mxu0 %v5008_v3  ;;  %349 = vst.msk [vmem:[#allocation2 + $0x1b0] sm:$0xff] %vm323_vm0, %v315_v51  ;;  %348 = vst.msk [vmem:[#allocation2 + $0x1a8] sm:$0xff] %vm323_vm0, %v314_v52  ;;  %v1525_v55 = vld [vmem:[%s5005_s2 + $0x378] sm:$0xff]  ;;  %v1526_v57 = vld [vmem:[%s5005_s2 + $0x380] sm:$0xff] }
  0x4b   : > { %478 = vrot.lane.b32.xlu1 %v385_v18, %s3412_s20  ;;  %476 = vrot.lane.b32.xlu0 %v384_v19, %s3412_s20  ;;  %v3981_v56 = vpack.c.bf16 %v1525_v55, %v1524_v54  ;;  %v1527_v58 = vld [vmem:[%s5005_s2 + $0x388] sm:$0xff]  ;;  %v317_v59 = vld [vmem:[%s3700_s21 + $0xd8] sm:$0xff] }
  0x4c   : > { %3013 = vmatpush1.bf16.msra.mxu1 %v3012_v20  ;;  %v316_v60 = vld [vmem:[%s3700_s21 + $0xd0] sm:$0xff]  ;;  %351 = vst.msk [vmem:[#allocation2 + $0x1d0] sm:$0xff] %vm323_vm0, %v317_v59  ;;  %v3995_v61 = vpack.c.bf16 %v1527_v58, %v1526_v57  ;;  %v1529_v63 = vld [vmem:[%s5005_s2 + $0x398] sm:$0xff]  ;;  %v1530_v1 = vld [vmem:[%s5005_s2 + $0x3a0] sm:$0xff] }
  0x4d   : > { %3061 = vmatpush1.bf16.msra.mxu0 %v3060_v21  ;;  %3190 = vmatprep.subr.bf16.mxu1 %v5008_v3  ;;  %350 = vst.msk [vmem:[#allocation2 + $0x1c8] sm:$0xff] %vm323_vm0, %v316_v60  ;;  %v1528_v62 = vld [vmem:[%s5005_s2 + $0x390] sm:$0xff]  ;;  %v1531_v2 = vld [vmem:[%s5005_s2 + $0x3a8] sm:$0xff]  ;;  %v318_v5 = vld [vmem:[%s3700_s21 + $0xe0] sm:$0xff] }
  0x4e   : > { %3062 = vmatprep.subr.bf16.mxu0 %v5008_v3  ;;  %v4005_v0 = vpack.c.bf16 %v1529_v63, %v1528_v62  ;;  %v319_v4 = vld [vmem:[%s3700_s21 + $0xe8] sm:$0xff]  ;;  %352 = vst.msk [vmem:[#allocation2 + $0x1e8] sm:$0xff] %vm323_vm0, %v318_v5  ;;  %v4019_v6 = vpack.c.bf16 %v1531_v2, %v1530_v1  ;;  %v1532_v7 = vld [vmem:[%s5005_s2 + $0x3b0] sm:$0xff]  ;;  %v1533_v8 = vld [vmem:[%s5005_s2 + $0x3b8] sm:$0xff] }
  0x4f   : > { %1630 = vmatmul.mubr.f32.vlgmr.msra.gmra.mrb[0].mxu1 %v549_v26  ;;  %482 = vrot.lane.b32.xlu1 %v387_v27, %s3412_s20  ;;  %353 = vst.msk [vmem:[#allocation2 + $0x1f0] sm:$0xff] %vm323_vm0, %v319_v4  ;;  %v4029_v9 = vpack.c.bf16 %v1533_v8, %v1532_v7  ;;  %v1534_v11 = vld [vmem:[%s5005_s2 + $0x3c0] sm:$0xff]  ;;  %v1535_v12 = vld [vmem:[%s5005_s2 + $0x3c8] sm:$0xff]  ;;  %v321_v13 = vld [vmem:[%s3700_s21 + $0xf8] sm:$0xff] }
  0x50   : > { %1634 = vmatprep.mubr.f32.mxu1 %v3411_v10  ;;  %480 = vrot.lane.b32.xlu0 %v386_v28, %s3412_s20  ;;  %v311_v10 = vld [vmem:[%s3700_s21 + $0xa8] sm:$0xff]  ;;  %5063 = vst [vmem:[#allocation4_spill] sm:$0xff] %v4019_v6  ;;  %v320_v14 = vld [vmem:[%s3700_s21 + $0xf0] sm:$0xff]  ;;  %355 = vst.msk [vmem:[#allocation2 + $0x210] sm:$0xff] %vm323_vm0, %v321_v13  ;;  %v4043_v15 = vpack.c.bf16 %v1535_v12, %v1534_v11 }
  0x51   : > { %3206 = vmatpush1.bf16.msra.mxu1 %v3897_v29  ;;  %345 = vst.msk [vmem:[#allocation2 + $0x170] sm:$0xff] %vm323_vm0, %v311_v10  ;;  %5064 = vst [vmem:[#allocation5_spill] sm:$0xff] %v4029_v9  ;;  %v1536_v16 = vld [vmem:[%s5005_s2 + $0x3d0] sm:$0xff]  ;;  %v1537_v17 = vld [vmem:[%s5005_s2 + $0x3d8] sm:$0xff] }
  0x52   : > { %3191 = vmatprep.subr.bf16.mxu1 %v5008_v3  ;;  %354 = vst.msk [vmem:[#allocation2 + $0x208] sm:$0xff] %vm323_vm0, %v320_v14  ;;  %5065 = vst [vmem:[#allocation6_spill] sm:$0xff] %v4043_v15  ;;  %v4053_v18 = vpack.c.bf16 %v1537_v17, %v1536_v16  ;;  %v1538_v19 = vld [vmem:[%s5005_s2 + $0x3e0] sm:$0xff]  ;;  %v1539_v20 = vld [vmem:[%s5005_s2 + $0x3e8] sm:$0xff] }
  0x53   : > { %1635 = vmatmul.mubr.f32.gmra.mrb[2].mxu1 %v550_v32  ;;  %v4063_v23 = vpack.c.bf16 %v1539_v20, %v1538_v19  ;;  %v1540_v24 = vld [vmem:[%s5005_s2 + $0x3f0] sm:$0xff]  ;;  %v1541_v25 = vld [vmem:[%s5005_s2 + $0x3f8] sm:$0xff]  ;;  %v1478_v28 = vld [vmem:[%s5005_s2 + $0x200] sm:$0xff] }
  0x54   : > { %5066 = vst [vmem:[#allocation7_spill] sm:$0xff] %v4053_v18  ;;  %v1479_v30 = vld [vmem:[%s5005_s2 + $0x208] sm:$0xff]  ;;  %v4081_v31 = vpack.c.bf16 %v1541_v25, %v1540_v24  ;;  %v1480_v39 = vld [vmem:[%s5005_s2 + $0x210] sm:$0xff]  ;;  %v1481_v41 = vld [vmem:[%s5005_s2 + $0x218] sm:$0xff] }
  0x55   : > { %3207 = vmatpush1.bf16.msra.mxu1 %v3909_v33  ;;  %5067 = vst [vmem:[#allocation8_spill] sm:$0xff] %v4063_v23  ;;  %v677_v32 = vld [vmem:[#allocation2 + $0x9] sm:$0xff]  ;;  %v3063_v34 = vpack.c.bf16 %v1479_v30, %v1478_v28  ;;  %v678_v42 = vld [vmem:[#allocation2 + $0x11] sm:$0xff]  ;;  %v1542_v44 = vld [vmem:[%s5005_s2 + $0x400] sm:$0xff]  ;;  %v3066_v51 = vpack.c.bf16 %v1481_v41, %v1480_v39 }
  0x56   : > { %3192 = vmatprep.subr.bf16.mxu1 %v5008_v3  ;;  %5068 = vst [vmem:[#allocation9_spill] sm:$0xff] %v4081_v31  ;;  %v1543_v46 = vld [vmem:[%s5005_s2 + $0x408] sm:$0xff]  ;;  %v1482_v57 = vld [vmem:[%s5005_s2 + $0x220] sm:$0xff]  ;;  %v1484_v2 = vld [vmem:[%s5005_s2 + $0x230] sm:$0xff] }
  0x57   : > { %v4102_v55 = vpack.c.bf16 %v1543_v46, %v1542_v44  ;;  %v1483_v58 = vld [vmem:[%s5005_s2 + $0x228] sm:$0xff]  ;;  %v1485_v4 = vld [vmem:[%s5005_s2 + $0x238] sm:$0xff]  ;;  %v1486_v16 = vld [vmem:[%s5005_s2 + $0x240] sm:$0xff] }
  0x58   : > { %v3069_v60 = vpack.c.bf16 %v1483_v58, %v1482_v57  ;;  %v3072_v11 = vpack.c.bf16 %v1485_v4, %v1484_v2  ;;  %v1487_v17 = vld [vmem:[%s5005_s2 + $0x248] sm:$0xff]  ;;  %v1488_v25 = vld [vmem:[%s5005_s2 + $0x250] sm:$0xff] }
  0x59   : > { %3208 = vmatpush1.bf16.msra.mxu1 %v3923_v37  ;;  %v3075_v20 = vpack.c.bf16 %v1487_v17, %v1486_v16  ;;  %v1492_v46 = vld [vmem:[%s5005_s2 + $0x270] sm:$0xff] }
  0x5a   : > { %3193 = vmatprep.subr.bf16.mxu1 %v5008_v3 }
  0x5d   : > { %3209 = vmatpush1.bf16.msra.mxu1 %v3933_v40 }
  0x5e   : > { %3194 = vmatprep.subr.bf16.mxu1 %v5008_v3 }
  0x61   : > { %3210 = vmatpush1.bf16.msra.mxu1 %v3947_v45 }
  0x62   : > { %3195 = vmatprep.subr.bf16.mxu1 %v5008_v3 }
  0x65   : > { %3211 = vmatpush1.bf16.msra.mxu1 %v3957_v48 }
  0x66   : > { %3196 = vmatprep.subr.bf16.mxu1 %v5008_v3 }
  0x69   : > { %3212 = vmatpush1.bf16.msra.mxu1 %v3971_v53 }
  0x6a   : > { %3197 = vmatprep.subr.bf16.mxu1 %v5008_v3 }
  0x6d   : > { %3213 = vmatpush1.bf16.msra.mxu1 %v3981_v56 }
  0x6e   : > { %3198 = vmatprep.subr.bf16.mxu1 %v5008_v3 }
  0x71   : > { %3214 = vmatpush1.bf16.msra.mxu1 %v3995_v61 }
  0x72   : > { %3199 = vmatprep.subr.bf16.mxu1 %v5008_v3 }
  0x75   : > { %3215 = vmatpush1.bf16.msra.mxu1 %v4005_v0 }
  0x76   : > { %3200 = vmatprep.subr.bf16.mxu1 %v5008_v3 }
  0x79   : > { %3216 = vmatpush1.bf16.msra.mxu1 %v4019_v6 }
  0x7a   : > { %3201 = vmatprep.subr.bf16.mxu1 %v5008_v3 }
  0x7d   : > { %3217 = vmatpush1.bf16.msra.mxu1 %v4029_v9 }
  0x7e   : > { %3202 = vmatprep.subr.bf16.mxu1 %v5008_v3 }
  0x81   : > { %3218 = vmatpush1.bf16.msra.mxu1 %v4043_v15 }
  0x82   : > { %3203 = vmatprep.subr.bf16.mxu1 %v5008_v3 }
  0x85   : > { %v421_v21 = vpop.permute.xlu0 %420  ;;  %v425_v22 = vpop.permute.xlu1 %424  ;;  %3219 = vmatpush1.bf16.msra.mxu1 %v4053_v18 }
  0x86   : > { %517 = vst.msk [vmem:[#allocation2 + $0x28] sm:$0xff] %vm516_vm1, %v421_v21  ;;  %519 = vst.msk [vmem:[#allocation2 + $0x48] sm:$0xff] %vm516_vm1, %v425_v22  ;;  %3204 = vmatprep.subr.bf16.mxu1 %v5008_v3 }
  0x89   : > { %v423_v26 = vpop.permute.xlu0 %422  ;;  %v427_v27 = vpop.permute.xlu1 %426  ;;  %3220 = vmatpush1.bf16.msra.mxu1 %v4063_v23 }
  0x8a   : > { %518 = vst.msk [vmem:[#allocation2 + $0x30] sm:$0xff] %vm516_vm1, %v423_v26  ;;  %520 = vst.msk [vmem:[#allocation2 + $0x50] sm:$0xff] %vm516_vm1, %v427_v27  ;;  %3205 = vmatprep.subr.bf16.mxu1 %v5008_v3  ;;  %v1489_v26 = vld [vmem:[%s5005_s2 + $0x258] sm:$0xff] }
  0x8d   : > { %v615_v35 = vld [vmem:[#allocation2 + $0x28] sm:$0xff]  ;;  %v431_v36 = vpop.permute.xlu1 %430  ;;  %v429_v38 = vpop.permute.xlu0 %428  ;;  %3221 = vmatpush1.bf16.msra.mxu1 %v4081_v31 }
  0x8e   : > { %v741_v10 = vld [vmem:[#allocation2 + $0x27] sm:$0xff]  ;;  %1639 = vmatprep.mubr.f32.mxu1 %v615_v35  ;;  %522 = vst.msk [vmem:[#allocation2 + $0x70] sm:$0xff] %vm516_vm1, %v431_v36  ;;  %521 = vst.msk [vmem:[#allocation2 + $0x68] sm:$0xff] %vm516_vm1, %v429_v38  ;;  %3159 = vmatprep.subr.bf16.mxu1 %v4102_v55 }
  0x8f   : > { %1854 = vmatprep.mubr.f32.mxu0 %v741_v10  ;;  %1640 = vmatmul.mubr.f32.gmra.mrb[4].mxu1 %v741_v10  ;;  %v617_v43 = vld [vmem:[#allocation2 + $0x48] sm:$0xff]  ;;  %v1490_v36 = vld [vmem:[%s5005_s2 + $0x260] sm:$0xff] }
  0x90   : > { %1855 = vmatmul.mubr.f32.vlgmr.msra.gmra.mrb[0].mxu0 %v677_v32  ;;  %v743_v50 = vld [vmem:[#allocation2 + $0x47] sm:$0xff]  ;;  %v3078_v32 = vpack.c.bf16 %v1489_v26, %v1488_v25 }
  0x91   : > { %3064 = vmatpush1.bf16.msra.mxu0 %v3063_v34  ;;  %v616_v47 = vld [vmem:[#allocation2 + $0x30] sm:$0xff]  ;;  %v435_v52 = vpop.permute.xlu1 %434  ;;  %v433_v54 = vpop.permute.xlu0 %432  ;;  %v1491_v38 = vld [vmem:[%s5005_s2 + $0x268] sm:$0xff]  ;;  %v1498_v26 = vld [vmem:[%s5005_s2 + $0x2a0] sm:$0xff] }
  0x92   : > { %v742_v49 = vld [vmem:[#allocation2 + $0x2f] sm:$0xff]  ;;  %3065 = vmatprep.subr.bf16.mxu0 %v5008_v3  ;;  %1644 = vmatprep.mubr.f32.mxu1 %v616_v47  ;;  %524 = vst.msk [vmem:[#allocation2 + $0x90] sm:$0xff] %vm516_vm1, %v435_v52  ;;  %523 = vst.msk [vmem:[#allocation2 + $0x88] sm:$0xff] %vm516_vm1, %v433_v54  ;;  %v3081_v41 = vpack.c.bf16 %v1491_v38, %v1490_v36  ;;  %v1493_v47 = vld [vmem:[%s5005_s2 + $0x278] sm:$0xff] }
  0x93   : > { %1859 = vmatprep.mubr.f32.mxu0 %v742_v49  ;;  %1645 = vmatmul.mubr.f32.gmra.mrb[6].mxu1 %v742_v49  ;;  %v4112_v59 = vld [vmem:[#allocation2 + $0x50] sm:$0xff]  ;;  %v3084_v52 = vpack.c.bf16 %v1493_v47, %v1492_v46 }
  0x94   : > { %1860 = vmatmul.mubr.f32.gmra.mrb[2].mxu0 %v678_v42  ;;  %1649 = vmatprep.mubr.f32.mxu1 %v617_v43  ;;  %v4115_v1 = vld [vmem:[#allocation2 + $0x29] sm:$0xff]  ;;  %v4130_v14 = vld [vmem:[#allocation2 + $0x31] sm:$0xff] }
  0x95   : > { %1864 = vmatprep.mubr.f32.mxu0 %v743_v50  ;;  %3067 = vmatpush1.bf16.msra.mxu0 %v3066_v51  ;;  %v439_v62 = vpop.permute.xlu1 %438  ;;  %v437_v63 = vpop.permute.xlu0 %436  ;;  %v744_v5 = vld [vmem:[#allocation2 + $0x4f] sm:$0xff]  ;;  %v745_v8 = vld [vmem:[#allocation2 + $0x67] sm:$0xff] }
  0x96   : > { %3068 = vmatprep.subr.bf16.mxu0 %v5008_v3  ;;  %526 = vst.msk [vmem:[#allocation2 + $0xb0] sm:$0xff] %vm516_vm1, %v439_v62  ;;  %525 = vst.msk [vmem:[#allocation2 + $0xa8] sm:$0xff] %vm516_vm1, %v437_v63  ;;  %v4128_v7 = vld [vmem:[#allocation2 + $0x68] sm:$0xff]  ;;  %v4143_v19 = vld [vmem:[#allocation2 + $0x70] sm:$0xff] }
  0x97   : > { %1650 = vmatmul.mubr.f32.gmra.mrb[8].mxu1 %v743_v50  ;;  %v4145_v24 = vld [vmem:[#allocation2 + $0x49] sm:$0xff]  ;;  %v4160_v10 = vld [vmem:[#allocation2 + $0x51] sm:$0xff] }
  0x98   : > { %1865 = vmatmul.mubr.f32.gmra.mrb[4].mxu0 %v4115_v1  ;;  %1654 = vmatprep.mubr.f32.mxu1 %v4112_v59  ;;  %v746_v27 = vld [vmem:[#allocation2 + $0x6f] sm:$0xff] }
  0x99   : > { %1869 = vmatprep.mubr.f32.mxu0 %v744_v5  ;;  %3070 = vmatpush1.bf16.msra.mxu0 %v3069_v60  ;;  %v443_v12 = vpop.permute.xlu1 %442  ;;  %v441_v13 = vpop.permute.xlu0 %440  ;;  %v4158_v28 = vld [vmem:[#allocation2 + $0x88] sm:$0xff]  ;;  %v4173_v39 = vld [vmem:[#allocation2 + $0x90] sm:$0xff]  ;;  %v1494_v60 = vld [vmem:[%s5005_s2 + $0x280] sm:$0xff] }
  0x9a   : > { %3071 = vmatprep.subr.bf16.mxu0 %v5008_v3  ;;  %528 = vst.msk [vmem:[#allocation2 + $0xd0] sm:$0xff] %vm516_vm1, %v443_v12  ;;  %527 = vst.msk [vmem:[#allocation2 + $0xc8] sm:$0xff] %vm516_vm1, %v441_v13  ;;  %v747_v30 = vld [vmem:[#allocation2 + $0x87] sm:$0xff]  ;;  %v748_v49 = vld [vmem:[#allocation2 + $0x8f] sm:$0xff] }
  0x9b   : > { %1655 = vmatmul.mubr.f32.gmra.mrb[10].mxu1 %v744_v5  ;;  %v4175_v44 = vld [vmem:[#allocation2 + $0x69] sm:$0xff]  ;;  %v4190_v58 = vld [vmem:[#allocation2 + $0x71] sm:$0xff] }
  0x9c   : > { %1870 = vmatmul.mubr.f32.gmra.mrb[6].mxu0 %v4130_v14  ;;  %1659 = vmatprep.mubr.f32.mxu1 %v4128_v7  ;;  %v1495_v62 = vld [vmem:[%s5005_s2 + $0x288] sm:$0xff]  ;;  %v1497_v12 = vld [vmem:[%s5005_s2 + $0x298] sm:$0xff]  ;;  %v1500_v38 = vld [vmem:[%s5005_s2 + $0x2b0] sm:$0xff] }
  0x9d   : > { %1874 = vmatprep.mubr.f32.mxu0 %v745_v8  ;;  %3073 = vmatpush1.bf16.msra.mxu0 %v3072_v11  ;;  %v447_v21 = vpop.permute.xlu1 %446  ;;  %v445_v22 = vpop.permute.xlu0 %444  ;;  %v4188_v50 = vld [vmem:[#allocation2 + $0xa8] sm:$0xff]  ;;  %v4203_v63 = vld [vmem:[#allocation2 + $0xb0] sm:$0xff]  ;;  %v3087_v2 = vpack.c.bf16 %v1495_v62, %v1494_v60 }
  0x9e   : > { %3074 = vmatprep.subr.bf16.mxu0 %v5008_v3  ;;  %530 = vst.msk [vmem:[#allocation2 + $0xf0] sm:$0xff] %vm516_vm1, %v447_v21  ;;  %529 = vst.msk [vmem:[#allocation2 + $0xe8] sm:$0xff] %vm516_vm1, %v445_v22  ;;  %v749_v51 = vld [vmem:[#allocation2 + $0xa7] sm:$0xff]  ;;  %v1496_v11 = vld [vmem:[%s5005_s2 + $0x290] sm:$0xff] }
  0x9f   : > { %1660 = vmatmul.mubr.f32.gmra.mrb[12].mxu1 %v745_v8  ;;  %v4205_v8 = vld [vmem:[#allocation2 + $0x89] sm:$0xff]  ;;  %v4222_v25 = vld [vmem:[#allocation2 + $0x91] sm:$0xff] }
  0xa0   : > { %1875 = vmatmul.mubr.f32.gmra.mrb[8].mxu0 %v4145_v24  ;;  %1664 = vmatprep.mubr.f32.mxu1 %v4143_v19  ;;  %v750_v13 = vld [vmem:[#allocation2 + $0xaf] sm:$0xff] }
  0xa1   : > { %1879 = vmatprep.mubr.f32.mxu0 %v746_v27  ;;  %3076 = vmatpush1.bf16.msra.mxu0 %v3075_v20  ;;  %v451_v34 = vpop.permute.xlu1 %450  ;;  %v449_v35 = vpop.permute.xlu0 %448  ;;  %v4218_v16 = vld [vmem:[#allocation2 + $0xc8] sm:$0xff]  ;;  %v3090_v20 = vpack.c.bf16 %v1497_v12, %v1496_v11  ;;  %v1504_v11 = vld [vmem:[%s5005_s2 + $0x2d0] sm:$0xff]  ;;  %v1505_v12 = vld [vmem:[%s5005_s2 + $0x2d8] sm:$0xff] }
  0xa2   : > { %3077 = vmatprep.subr.bf16.mxu0 %v5008_v3  ;;  %532 = vst.msk [vmem:[#allocation2 + $0x110] sm:$0xff] %vm516_vm1, %v451_v34  ;;  %531 = vst.msk [vmem:[#allocation2 + $0x108] sm:$0xff] %vm516_vm1, %v449_v35  ;;  %v4220_v17 = vld [vmem:[#allocation2 + $0xc7] sm:$0xff] }
  0xa3   : > { %1665 = vmatmul.mubr.f32.gmra.mrb[14].mxu1 %v746_v27  ;;  %v1499_v27 = vld [vmem:[%s5005_s2 + $0x2a8] sm:$0xff] }
  0xa4   : > { %1880 = vmatmul.mubr.f32.gmra.mrb[10].mxu0 %v4160_v10  ;;  %1669 = vmatprep.mubr.f32.mxu1 %v4158_v28  ;;  %v4238_v36 = vld [vmem:[#allocation2 + $0xa9] sm:$0xff] }
  0xa5   : > { %1884 = vmatprep.mubr.f32.mxu0 %v747_v30  ;;  %3079 = vmatpush1.bf16.msra.mxu0 %v3078_v32  ;;  %v455_v42 = vpop.permute.xlu1 %454  ;;  %v453_v43 = vpop.permute.xlu0 %452  ;;  %v3093_v32 = vpack.c.bf16 %v1499_v27, %v1498_v26  ;;  %v4257_v46 = vld [vmem:[#allocation2 + $0xe7] sm:$0xff]  ;;  %v4274_v60 = vld [vmem:[#allocation2 + $0xf0] sm:$0xff] }
  0xa6   : > { %3080 = vmatprep.subr.bf16.mxu0 %v5008_v3  ;;  %534 = vst.msk [vmem:[#allocation2 + $0x130] sm:$0xff] %vm516_vm1, %v455_v42  ;;  %533 = vst.msk [vmem:[#allocation2 + $0x128] sm:$0xff] %vm516_vm1, %v453_v43  ;;  %v4251_v42 = vld [vmem:[#allocation2 + $0xcf] sm:$0xff] }
  0xa7   : > { %1670 = vmatmul.mubr.f32.gmra.mrb[16].mxu1 %v747_v30  ;;  %v4236_v30 = vld [vmem:[#allocation2 + $0xd0] sm:$0xff]  ;;  %v4255_v43 = vld [vmem:[#allocation2 + $0xe8] sm:$0xff] }
  0xa8   : > { %1885 = vmatmul.mubr.f32.gmra.mrb[12].mxu0 %v4175_v44  ;;  %1674 = vmatprep.mubr.f32.mxu1 %v4173_v39  ;;  %v4297_v27 = vld [vmem:[#allocation2 + $0xd1] sm:$0xff] }
  0xa9   : > { %1889 = vmatprep.mubr.f32.mxu0 %v748_v49  ;;  %3082 = vmatpush1.bf16.msra.mxu0 %v3081_v41  ;;  %v459_v54 = vpop.permute.xlu1 %458  ;;  %v457_v57 = vpop.permute.xlu0 %456  ;;  %v1501_v41 = vld [vmem:[%s5005_s2 + $0x2b8] sm:$0xff] }
  0xaa   : > { %3083 = vmatprep.subr.bf16.mxu0 %v5008_v3  ;;  %536 = vst.msk [vmem:[#allocation2 + $0x150] sm:$0xff] %vm516_vm1, %v459_v54  ;;  %535 = vst.msk [vmem:[#allocation2 + $0x148] sm:$0xff] %vm516_vm1, %v457_v57  ;;  %v3096_v47 = vpack.c.bf16 %v1501_v41, %v1500_v38  ;;  %v1502_v54 = vld [vmem:[%s5005_s2 + $0x2c0] sm:$0xff]  ;;  %v1503_v57 = vld [vmem:[%s5005_s2 + $0x2c8] sm:$0xff] }
  0xab   : > { %1675 = vmatmul.mubr.f32.gmra.mrb[18].mxu1 %v748_v49  ;;  %v3099_v62 = vpack.c.bf16 %v1503_v57, %v1502_v54  ;;  %v4312_v38 = vld [vmem:[#allocation2 + $0x110] sm:$0xff] }
  0xac   : > { %1890 = vmatmul.mubr.f32.gmra.mrb[14].mxu0 %v4190_v58  ;;  %1679 = vmatprep.mubr.f32.mxu1 %v4188_v50  ;;  %v4325_v54 = vld [vmem:[#allocation2 + $0x10f] sm:$0xff] }
  0xad   : > { %1894 = vmatprep.mubr.f32.mxu0 %v749_v51  ;;  %3085 = vmatpush1.bf16.msra.mxu0 %v3084_v52  ;;  %v463_v4 = vpop.permute.xlu1 %462  ;;  %v461_v5 = vpop.permute.xlu0 %460  ;;  %v4259_v52 = vld [vmem:[#allocation2 + $0xb1] sm:$0xff]  ;;  %v4329_v57 = vld [vmem:[#allocation2 + $0x128] sm:$0xff] }
  0xae   : > { %3086 = vmatprep.subr.bf16.mxu0 %v5008_v3  ;;  %538 = vst.msk [vmem:[#allocation2 + $0x170] sm:$0xff] %vm516_vm1, %v463_v4  ;;  %537 = vst.msk [vmem:[#allocation2 + $0x168] sm:$0xff] %vm516_vm1, %v461_v5  ;;  %v4276_v5 = vld [vmem:[#allocation2 + $0xc9] sm:$0xff] }
  0xaf   : > { %1680 = vmatmul.mubr.f32.gmra.mrb[20].mxu1 %v749_v51 }
  0xb0   : > { %1895 = vmatmul.mubr.f32.gmra.mrb[16].mxu0 %v4205_v8  ;;  %1684 = vmatprep.mubr.f32.mxu1 %v4203_v63 }
  0xb1   : > { %1899 = vmatprep.mubr.f32.mxu0 %v750_v13  ;;  %3088 = vmatpush1.bf16.msra.mxu0 %v3087_v2  ;;  %v467_v21 = vpop.permute.xlu1 %466  ;;  %v465_v22 = vpop.permute.xlu0 %464  ;;  %v4395_v18 = vld [vmem:[#allocation2 + $0x151] sm:$0xff] }
  0xb2   : > { %3089 = vmatprep.subr.bf16.mxu0 %v5008_v3  ;;  %540 = vst.msk [vmem:[#allocation2 + $0x190] sm:$0xff] %vm516_vm1, %v467_v21  ;;  %539 = vst.msk [vmem:[#allocation2 + $0x188] sm:$0xff] %vm516_vm1, %v465_v22  ;;  %v4295_v21 = vld [vmem:[#allocation2 + $0x107] sm:$0xff]  ;;  %v3102_v22 = vpack.c.bf16 %v1505_v12, %v1504_v11  ;;  %v4340_v11 = vld [vmem:[#allocation2 + $0x130] sm:$0xff] }
  0xb3   : > { %1685 = vmatmul.mubr.f32.gmra.mrb[22].mxu1 %v750_v13  ;;  %v4289_v13 = vld [vmem:[#allocation2 + $0xef] sm:$0xff]  ;;  %5076 = vst [vmem:[#allocation17_spill] sm:$0xff] %v4395_v18 }
  0xb4   : > { %1900 = vmatmul.mubr.f32.gmra.mrb[18].mxu0 %v4222_v25  ;;  %1689 = vmatprep.mubr.f32.mxu1 %v4218_v16  ;;  %v4342_v12 = vld [vmem:[#allocation2 + $0x109] sm:$0xff] }
  0xb5   : > { %1904 = vmatprep.mubr.f32.mxu0 %v4220_v17  ;;  %3091 = vmatpush1.bf16.msra.mxu0 %v3090_v20  ;;  %v471_v34 = vpop.permute.xlu1 %470  ;;  %v469_v35 = vpop.permute.xlu0 %468  ;;  %v4293_v20 = vld [vmem:[#allocation2 + $0x108] sm:$0xff]  ;;  %5071 = vst [vmem:[#allocation12_spill] sm:$0xff] %v4342_v12  ;;  %v4381_v31 = vld [vmem:[#allocation2 + $0x170] sm:$0xff] }
  0xb6   : > { %3092 = vmatprep.subr.bf16.mxu0 %v5008_v3  ;;  %542 = vst.msk [vmem:[#allocation2 + $0x1b0] sm:$0xff] %vm516_vm1, %v471_v34  ;;  %541 = vst.msk [vmem:[#allocation2 + $0x1a8] sm:$0xff] %vm516_vm1, %v469_v35  ;;  %v1506_v34 = vld [vmem:[%s5005_s2 + $0x2e0] sm:$0xff]  ;;  %v1507_v35 = vld [vmem:[%s5005_s2 + $0x2e8] sm:$0xff] }
  0xb7   : > { %1690 = vmatmul.mubr.f32.gmra.mrb[24].mxu1 %v4220_v17  ;;  %v3105_v41 = vpack.c.bf16 %v1507_v35, %v1506_v34  ;;  %v4355_v34 = vld [vmem:[#allocation2 + $0x111] sm:$0xff] }
  0xb8   : > { %1905 = vmatmul.mubr.f32.gmra.mrb[20].mxu0 %v4238_v36  ;;  %1694 = vmatprep.mubr.f32.mxu1 %v4236_v30  ;;  %5072 = vst [vmem:[#allocation13_spill] sm:$0xff] %v4355_v34  ;;  %v4361_v35 = vld [vmem:[#allocation2 + $0x150] sm:$0xff] }
  0xb9   : > { %1909 = vmatprep.mubr.f32.mxu0 %v4251_v42  ;;  %3094 = vmatpush1.bf16.msra.mxu0 %v3093_v32  ;;  %v475_v49 = vpop.permute.xlu1 %474  ;;  %v473_v51 = vpop.permute.xlu0 %472  ;;  %v4387_v23 = vld [vmem:[#allocation2 + $0x16f] sm:$0xff] }
  0xba   : > { %3095 = vmatprep.subr.bf16.mxu0 %v5008_v3  ;;  %544 = vst.msk [vmem:[#allocation2 + $0x1d0] sm:$0xff] %vm516_vm1, %v475_v49  ;;  %543 = vst.msk [vmem:[#allocation2 + $0x1c8] sm:$0xff] %vm516_vm1, %v473_v51  ;;  %v1508_v49 = vld [vmem:[%s5005_s2 + $0x2f0] sm:$0xff]  ;;  %v1509_v51 = vld [vmem:[%s5005_s2 + $0x2f8] sm:$0xff] }
  0xbb   : > { %1695 = vmatmul.mubr.f32.gmra.mrb[26].mxu1 %v4251_v42  ;;  %v4407_v15 = vld [vmem:[#allocation2 + $0x18f] sm:$0xff] }
  0xbc   : > { %1910 = vmatmul.mubr.f32.gmra.mrb[22].mxu0 %v4259_v52  ;;  %1699 = vmatprep.mubr.f32.mxu1 %v4255_v43  ;;  %5079 = vst [vmem:[#allocation20_spill] sm:$0xff] %v4407_v15  ;;  %v4415_v9 = vld [vmem:[#allocation2 + $0x171] sm:$0xff] }
  0xbd   : > { %1914 = vmatprep.mubr.f32.mxu0 %v4257_v46  ;;  %3097 = vmatpush1.bf16.msra.mxu0 %v3096_v47  ;;  %v479_v2 = vpop.permute.xlu1 %478  ;;  %v477_v4 = vpop.permute.xlu0 %476  ;;  %v4314_v47 = vld [vmem:[#allocation2 + $0xe9] sm:$0xff]  ;;  %5082 = vst [vmem:[#allocation23_spill] sm:$0xff] %v4415_v9 }
  0xbe   : > { %3098 = vmatprep.subr.bf16.mxu0 %v5008_v3  ;;  %546 = vst.msk [vmem:[#allocation2 + $0x1f0] sm:$0xff] %vm516_vm1, %v479_v2  ;;  %545 = vst.msk [vmem:[#allocation2 + $0x1e8] sm:$0xff] %vm516_vm1, %v477_v4  ;;  %v3108_v2 = vpack.c.bf16 %v1509_v51, %v1508_v49  ;;  %v4333_v4 = vld [vmem:[#allocation2 + $0xf1] sm:$0xff]  ;;  %v4371_v51 = vld [vmem:[#allocation2 + $0x168] sm:$0xff] }
  0xbf   : > { %1700 = vmatmul.mubr.f32.gmra.mrb[28].mxu1 %v4257_v46  ;;  %5069 = vst [vmem:[#allocation10_spill] sm:$0xff] %v4314_v47  ;;  %5070 = vst [vmem:[#allocation11_spill] sm:$0xff] %v4333_v4  ;;  %v4367_v49 = vld [vmem:[#allocation2 + $0x14f] sm:$0xff] }
  0xc0   : > { %1915 = vmatmul.mubr.f32.gmra.mrb[24].mxu0 %v4276_v5  ;;  %1704 = vmatprep.mubr.f32.mxu1 %v4274_v60  ;;  %v4427_v6 = vld [vmem:[#allocation2 + $0x1af] sm:$0xff] }
  0xc1   : > { %1919 = vmatprep.mubr.f32.mxu0 %v4289_v13  ;;  %3100 = vmatpush1.bf16.msra.mxu0 %v3099_v62  ;;  %v483_v26 = vpop.permute.xlu1 %482  ;;  %v4331_v62 = vld [vmem:[#allocation2 + $0x127] sm:$0xff]  ;;  %5085 = vst [vmem:[#allocation26_spill] sm:$0xff] %v4427_v6 }
  0xc2   : > { %3101 = vmatprep.subr.bf16.mxu0 %v5008_v3  ;;  %548 = vst.msk [vmem:[#allocation2 + $0x210] sm:$0xff] %vm516_vm1, %v483_v26  ;;  %v481_v32 = vpop.permute.xlu0 %480  ;;  %v4351_v26 = vld [vmem:[#allocation2 + $0x148] sm:$0xff] }
  0xc3   : > { %1705 = vmatmul.mubr.f32.gmra.mrb[30].mxu1 %v4289_v13  ;;  %547 = vst.msk [vmem:[#allocation2 + $0x208] sm:$0xff] %vm516_vm1, %v481_v32  ;;  %v4353_v32 = vld [vmem:[#allocation2 + $0x147] sm:$0xff] }
  0xc4   : > { %1920 = vmatmul.mubr.f32.gmra.mrb[26].mxu0 %v4297_v27  ;;  %1709 = vmatprep.mubr.f32.mxu1 %v4293_v20 }
  0xc5   : > { %1924 = vmatprep.mubr.f32.mxu0 %v4295_v21  ;;  %3103 = vmatpush1.bf16.msra.mxu0 %v3102_v22  ;;  %v4347_v22 = vld [vmem:[#allocation2 + $0x12f] sm:$0xff] }
  0xc6   : > { %3104 = vmatprep.subr.bf16.mxu0 %v5008_v3 }
  0xc7   : > { %1710 = vmatmul.mubr.f32.gmra.mrb[32].mxu1 %v4295_v21 }
  0xc8   : > { %1925 = vmatmul.mubr.f32.gmra.mrb[28].mxu0 %v4314_v47  ;;  %1714 = vmatprep.mubr.f32.mxu1 %v4312_v38  ;;  %v4423_v47 = vld [vmem:[#allocation2 + $0x189] sm:$0xff] }
  0xc9   : > { %1929 = vmatprep.mubr.f32.mxu0 %v4325_v54  ;;  %3106 = vmatpush1.bf16.msra.mxu0 %v3105_v41  ;;  %v4363_v41 = vld [vmem:[#allocation2 + $0x129] sm:$0xff]  ;;  %5084 = vst [vmem:[#allocation25_spill] sm:$0xff] %v4423_v47 }
  0xca   : > { %3107 = vmatprep.subr.bf16.mxu0 %v5008_v3  ;;  %5073 = vst [vmem:[#allocation14_spill] sm:$0xff] %v4363_v41 }
  0xcb   : > { %1715 = vmatmul.mubr.f32.gmra.mrb[34].mxu1 %v4325_v54 }
  0xcc   : > { %1930 = vmatmul.mubr.f32.gmra.mrb[30].mxu0 %v4333_v4  ;;  %1719 = vmatprep.mubr.f32.mxu1 %v4329_v57  ;;  %v4411_v4 = vld [vmem:[#allocation2 + $0x1a8] sm:$0xff] }
  0xcd   : > { %1934 = vmatprep.mubr.f32.mxu0 %v4331_v62  ;;  %3109 = vmatpush1.bf16.msra.mxu0 %v3108_v2  ;;  %v4373_v2 = vld [vmem:[#allocation2 + $0x167] sm:$0xff]  ;;  %5080 = vst [vmem:[#allocation21_spill] sm:$0xff] %v4411_v4 }
  0xce   : > { %3110 = vmatprep.subr.bf16.mxu0 %v5008_v3  ;;  %v4375_v3 = vld [vmem:[#allocation2 + $0x131] sm:$0xff] }
  0xcf   : > { %1720 = vmatmul.mubr.f32.gmra.mrb[36].mxu1 %v4331_v62  ;;  %5074 = vst [vmem:[#allocation15_spill] sm:$0xff] %v4375_v3 }
  0xd0   : > { %1935 = vmatmul.mubr.f32.gmra.mrb[32].mxu0 %v4342_v12  ;;  %1724 = vmatprep.mubr.f32.mxu1 %v4340_v11  ;;  %v4403_v12 = vld [vmem:[#allocation2 + $0x169] sm:$0xff] }
  0xd1   : > { %1939 = vmatprep.mubr.f32.mxu0 %v4347_v22  ;;  %5078 = vst [vmem:[#allocation19_spill] sm:$0xff] %v4403_v12 }
  0xd3   : > { %1725 = vmatmul.mubr.f32.gmra.mrb[38].mxu1 %v4347_v22 }
  0xd4   : > { %1940 = vmatmul.mubr.f32.gmra.mrb[34].mxu0 %v4355_v34  ;;  %1729 = vmatprep.mubr.f32.mxu1 %v4351_v26  ;;  %v4391_v34 = vld [vmem:[#allocation2 + $0x188] sm:$0xff] }
  0xd5   : > { %1944 = vmatprep.mubr.f32.mxu0 %v4353_v32 }
  0xd7   : > { %1730 = vmatmul.mubr.f32.gmra.mrb[40].mxu1 %v4353_v32 }
  0xd8   : > { %1945 = vmatmul.mubr.f32.gmra.mrb[36].mxu0 %v4363_v41  ;;  %1734 = vmatprep.mubr.f32.mxu1 %v4361_v35  ;;  %v4383_v41 = vld [vmem:[#allocation2 + $0x149] sm:$0xff] }
  0xd9   : > { %1949 = vmatprep.mubr.f32.mxu0 %v4367_v49  ;;  %5075 = vst [vmem:[#allocation16_spill] sm:$0xff] %v4383_v41 }
  0xdb   : > { %1735 = vmatmul.mubr.f32.gmra.mrb[42].mxu1 %v4367_v49 }
  0xdc   : > { %1950 = vmatmul.mubr.f32.gmra.mrb[38].mxu0 %v4375_v3  ;;  %1739 = vmatprep.mubr.f32.mxu1 %v4371_v51  ;;  %v4393_v3 = vld [vmem:[#allocation2 + $0x187] sm:$0xff] }
  0xdd   : > { %1954 = vmatprep.mubr.f32.mxu0 %v4373_v2 }
  0xdf   : > { %1740 = vmatmul.mubr.f32.gmra.mrb[44].mxu1 %v4373_v2 }
  0xe0   : > { %1955 = vmatmul.mubr.f32.gmra.mrb[40].mxu0 %v4383_v41  ;;  %1744 = vmatprep.mubr.f32.mxu1 %v4381_v31  ;;  %v4401_v41 = vld [vmem:[#allocation2 + $0x190] sm:$0xff] }
  0xe1   : > { %1959 = vmatprep.mubr.f32.mxu0 %v4387_v23  ;;  %5077 = vst [vmem:[#allocation18_spill] sm:$0xff] %v4401_v41 }
  0xe3   : > { %1745 = vmatmul.mubr.f32.gmra.mrb[46].mxu1 %v4387_v23 }
  0xe4   : > { %1960 = vmatmul.mubr.f32.gmra.mrb[42].mxu0 %v4395_v18  ;;  %1749 = vmatprep.mubr.f32.mxu1 %v4391_v34  ;;  %v4413_v18 = vld [vmem:[#allocation2 + $0x1a7] sm:$0xff] }
  0xe5   : > { %1964 = vmatprep.mubr.f32.mxu0 %v4393_v3  ;;  %5081 = vst [vmem:[#allocation22_spill] sm:$0xff] %v4413_v18 }
  0xe7   : > { %1750 = vmatmul.mubr.f32.gmra.mrb[48].mxu1 %v4393_v3 }
  0xe8   : > { %1965 = vmatmul.mubr.f32.gmra.mrb[44].mxu0 %v4403_v12  ;;  %1754 = vmatprep.mubr.f32.mxu1 %v4401_v41  ;;  %v4421_v12 = vld [vmem:[#allocation2 + $0x1b0] sm:$0xff]  ;;  %v1547_v41 = vld [vmem:[%s5005_s2 + $0x428] sm:$0xff] }
  0xe9   : > { %1969 = vmatprep.mubr.f32.mxu0 %v4407_v15  ;;  %5083 = vst [vmem:[#allocation24_spill] sm:$0xff] %v4421_v12 }
  0xeb   : > { %1755 = vmatmul.mubr.f32.gmra.mrb[50].mxu1 %v4407_v15  ;;  %v4431_v15 = vld [vmem:[#allocation2 + $0x1c8] sm:$0xff] }
  0xec   : > { %1970 = vmatmul.mubr.f32.gmra.mrb[46].mxu0 %v4415_v9  ;;  %1759 = vmatprep.mubr.f32.mxu1 %v4411_v4  ;;  %5086 = vst [vmem:[#allocation27_spill] sm:$0xff] %v4431_v15  ;;  %v4433_v9 = vld [vmem:[#allocation2 + $0x1c7] sm:$0xff]  ;;  %v4435_v4 = vld [vmem:[#allocation2 + $0x191] sm:$0xff] }
  0xed   : > { %1974 = vmatprep.mubr.f32.mxu0 %v4413_v18  ;;  %5087 = vst [vmem:[#allocation28_spill] sm:$0xff] %v4433_v9  ;;  %5088 = vst [vmem:[#allocation29_spill] sm:$0xff] %v4435_v4 }
  0xef   : > { %1760 = vmatmul.mubr.f32.gmra.mrb[52].mxu1 %v4413_v18  ;;  %v4443_v18 = vld [vmem:[#allocation2 + $0x1a9] sm:$0xff] }
  0xf0   : > { %1975 = vmatmul.mubr.f32.gmra.mrb[48].mxu0 %v4423_v47  ;;  %1764 = vmatprep.mubr.f32.mxu1 %v4421_v12  ;;  %v4441_v47 = vld [vmem:[#allocation2 + $0x1d0] sm:$0xff]  ;;  %5090 = vst [vmem:[#allocation31_spill] sm:$0xff] %v4443_v18 }
  0xf1   : > { %1979 = vmatprep.mubr.f32.mxu0 %v4427_v6  ;;  %5089 = vst [vmem:[#allocation30_spill] sm:$0xff] %v4441_v47  ;;  %v4447_v12 = vld [vmem:[#allocation2 + $0x1cf] sm:$0xff] }
  0xf2   : > { %5091 = vst [vmem:[#allocation32_spill] sm:$0xff] %v4447_v12 }
  0xf3   : > { %1765 = vmatmul.mubr.f32.gmra.mrb[54].mxu1 %v4427_v6  ;;  %v4451_v6 = vld [vmem:[#allocation2 + $0x1e8] sm:$0xff] }
  0xf4   : > { %1980 = vmatmul.mubr.f32.gmra.mrb[50].mxu0 %v4435_v4  ;;  %1769 = vmatprep.mubr.f32.mxu1 %v4431_v15  ;;  %5092 = vst [vmem:[#allocation33_spill] sm:$0xff] %v4451_v6  ;;  %v4453_v4 = vld [vmem:[#allocation2 + $0x1e7] sm:$0xff]  ;;  %v4455_v15 = vld [vmem:[#allocation2 + $0x1b1] sm:$0xff] }
  0xf5   : > { %1984 = vmatprep.mubr.f32.mxu0 %v4433_v9  ;;  %5093 = vst [vmem:[#allocation34_spill] sm:$0xff] %v4453_v4  ;;  %5094 = vst [vmem:[#allocation35_spill] sm:$0xff] %v4455_v15 }
  0xf7   : > { %1770 = vmatmul.mubr.f32.gmra.mrb[56].mxu1 %v4433_v9  ;;  %v4463_v9 = vld [vmem:[#allocation2 + $0x1c9] sm:$0xff] }
  0xf8   : > { %1985 = vmatmul.mubr.f32.gmra.mrb[52].mxu0 %v4443_v18  ;;  %1774 = vmatprep.mubr.f32.mxu1 %v4441_v47  ;;  %v4461_v18 = vld [vmem:[#allocation2 + $0x1f0] sm:$0xff]  ;;  %5096 = vst [vmem:[#allocation37_spill] sm:$0xff] %v4463_v9 }
  0xf9   : > { %1989 = vmatprep.mubr.f32.mxu0 %v4447_v12  ;;  %5095 = vst [vmem:[#allocation36_spill] sm:$0xff] %v4461_v18  ;;  %v4467_v47 = vld [vmem:[#allocation2 + $0x1ef] sm:$0xff] }
  0xfa   : > { %5097 = vst [vmem:[#allocation38_spill] sm:$0xff] %v4467_v47 }
  0xfb   : > { %1775 = vmatmul.mubr.f32.gmra.mrb[58].mxu1 %v4447_v12  ;;  %v4471_v12 = vld [vmem:[#allocation2 + $0x207] sm:$0xff] }
  0xfc   : > { %1990 = vmatmul.mubr.f32.gmra.mrb[54].mxu0 %v4455_v15  ;;  %1779 = vmatprep.mubr.f32.mxu1 %v4451_v6  ;;  %v4473_v15 = vld [vmem:[#allocation2 + $0x1d1] sm:$0xff] }
  0xfd   : > { %1994 = vmatprep.mubr.f32.mxu0 %v4453_v4  ;;  %5098 = vst [vmem:[#allocation39_spill] sm:$0xff] %v4473_v15 }
  0xff   : > { %1780 = vmatmul.mubr.f32.gmra.mrb[60].mxu1 %v4453_v4  ;;  %v1544_v4 = vld [vmem:[%s5005_s2 + $0x410] sm:$0xff] }
 0x100   : > { %1995 = vmatmul.mubr.f32.gmra.mrb[56].mxu0 %v4463_v9  ;;  %1784 = vmatprep.mubr.f32.mxu1 %v4461_v18  ;;  %v1545_v9 = vld [vmem:[%s5005_s2 + $0x418] sm:$0xff]  ;;  %v4485_v18 = vld [vmem:[#allocation2 + $0x1e9] sm:$0xff] }
 0x101   : > { %1999 = vmatprep.mubr.f32.mxu0 %v4467_v47  ;;  %5099 = vst [vmem:[#allocation40_spill] sm:$0xff] %v4485_v18  ;;  %v3162_v6 = vpack.c.bf16 %v1545_v9, %v1544_v4  ;;  %v4500_v9 = vld [vmem:[#allocation2 + $0x1f1] sm:$0xff]  ;;  %v805_v4 = vld [vmem:[#allocation2 + $0x28] sm:$0xff] }
 0x103   : > { %1785 = vmatmul.mubr.f32.gmra.mrb[62].mxu1 %v4467_v47  ;;  %v1546_v47 = vld [vmem:[%s5005_s2 + $0x420] sm:$0xff] }
 0x104   : > { %2000 = vmatmul.mubr.f32.gmra.mrb[58].mxu0 %v4473_v15  ;;  %2344 = vmatprep.mubr.f32.mxu1 %v4218_v16  ;;  %v4489_v15 = vld [vmem:[#allocation2 + $0x20f] sm:$0xff] }
 0x105   : > { %2004 = vmatprep.mubr.f32.mxu0 %v4471_v12 }
 0x107   : > { %2345 = vmatmul.mubr.f32.vlgmr.msra.gmra.mrb[64].mxu1 %v4220_v17  ;;  %v3166_v17 = vpack.c.bf16 %v1547_v41, %v1546_v47  ;;  %v1550_v47 = vld [vmem:[%s5005_s2 + $0x440] sm:$0xff]  ;;  %v1551_v41 = vld [vmem:[%s5005_s2 + $0x448] sm:$0xff] }
 0x108   : > { %2005 = vmatmul.mubr.f32.gmra.mrb[60].mxu0 %v4485_v18  ;;  %2349 = vmatprep.mubr.f32.mxu1 %v4236_v30  ;;  %v1548_v18 = vld [vmem:[%s5005_s2 + $0x430] sm:$0xff] }
 0x109   : > { %2009 = vmatprep.mubr.f32.mxu0 %v4489_v15  ;;  %3161 = vmatpush3.bf16.msra.mxu1 %v4102_v55  ;;  %v1549_v55 = vld [vmem:[%s5005_s2 + $0x438] sm:$0xff] }
 0x10a   : > { %3163 = vmatprep.subr.bf16.mxu1 %v3162_v6 }
 0x10b   : > { %2350 = vmatmul.mubr.f32.gmra.mrb[66].mxu1 %v4251_v42  ;;  %v806_v42 = vld [vmem:[#allocation2 + $0x30] sm:$0xff] }
 0x10c   : > { %2010 = vmatmul.mubr.f32.gmra.mrb[62].mxu0 %v4500_v9  ;;  %2354 = vmatprep.mubr.f32.mxu1 %v4255_v43 }
 0x10d   : > { %2079 = vmatprep.mubr.f32.mxu0 %v4115_v1  ;;  %3165 = vmatpush3.bf16.msra.mxu1 %v3162_v6  ;;  %v5100_v6 = vmov 0.0|0.0   ;;  %v3170_v1 = vpack.c.bf16 %v1549_v55, %v1548_v18  ;;  %v4527_v18 = vld [vmem:[#allocation2 + $0x48] sm:$0xff] }
 0x10e   : > { %3167 = vmatprep.subr.bf16.mxu1 %v3166_v17 }
 0x10f   : > { %2355 = vmatmul.mubr.f32.gmra.mrb[68].mxu1 %v4257_v46  ;;  %v1553_v46 = vld [vmem:[%s5005_s2 + $0x458] sm:$0xff] }
 0x110   : > { %2080 = vmatmul.mubr.f32.vlgmr.msra.gmra.mrb[0].mxu0 %v805_v4  ;;  %2359 = vmatprep.mubr.f32.mxu1 %v4274_v60 }
 0x111   : > { %3112 = vmatpush1.bf16.msra.mxu0 %v3897_v29  ;;  %2084 = vmatprep.mubr.f32.mxu0 %v4130_v14  ;;  %v3174_v29 = vpack.c.bf16 %v1551_v41, %v1550_v47  ;;  %v1552_v14 = vld [vmem:[%s5005_s2 + $0x450] sm:$0xff] }
 0x112   : > { %3113 = vmatprep.subr.bf16.mxu0 %v5100_v6  ;;  %3169 = vmatpush3.bf16.msra.mxu1 %v3166_v17  ;;  %v1065_v41 = vld [vmem:[#allocation2 + $0x71] sm:$0xff] }
 0x113   : > { %2360 = vmatmul.mubr.f32.gmra.mrb[70].mxu1 %v4289_v13  ;;  %3171 = vmatprep.subr.bf16.mxu1 %v3170_v1  ;;  %v1555_v13 = vld [vmem:[%s5005_s2 + $0x468] sm:$0xff] }
 0x114   : > { %2085 = vmatmul.mubr.f32.gmra.mrb[2].mxu0 %v806_v42  ;;  %2364 = vmatprep.mubr.f32.mxu1 %v4293_v20  ;;  %v5132_v42 = vld [vmem:[#allocation29_spill] sm:$0xff] }
 0x115   : > { %2089 = vmatprep.mubr.f32.mxu0 %v4145_v24  ;;  %3115 = vmatpush1.bf16.msra.mxu0 %v3909_v33  ;;  %v3178_v33 = vpack.c.bf16 %v1553_v46, %v1552_v14  ;;  %v1554_v24 = vld [vmem:[%s5005_s2 + $0x460] sm:$0xff]  ;;  %v5133_v14 = vld [vmem:[#allocation31_spill] sm:$0xff] }
 0x116   : > { %3116 = vmatprep.subr.bf16.mxu0 %v5100_v6  ;;  %3173 = vmatpush3.bf16.msra.mxu1 %v3170_v1 }
 0x117   : > { %2365 = vmatmul.mubr.f32.gmra.mrb[72].mxu1 %v4295_v21  ;;  %3175 = vmatprep.subr.bf16.mxu1 %v3174_v29  ;;  %v5122_v21 = vld [vmem:[#allocation9_spill] sm:$0xff] }
 0x118   : > { %2090 = vmatmul.mubr.f32.gmra.mrb[4].mxu0 %v4527_v18  ;;  %2369 = vmatprep.mubr.f32.mxu1 %v4312_v38 }
 0x119   : > { %2094 = vmatprep.mubr.f32.mxu0 %v4160_v10  ;;  %3118 = vmatpush1.bf16.msra.mxu0 %v3923_v37  ;;  %v3182_v37 = vpack.c.bf16 %v1555_v13, %v1554_v24  ;;  %v1556_v10 = vld [vmem:[%s5005_s2 + $0x470] sm:$0xff]  ;;  %v5134_v13 = vld [vmem:[#allocation35_spill] sm:$0xff] }
 0x11a   : > { %3119 = vmatprep.subr.bf16.mxu0 %v5100_v6  ;;  %3177 = vmatpush3.bf16.msra.mxu1 %v3174_v29  ;;  %v1066_v29 = vld [vmem:[#allocation2 + $0x89] sm:$0xff] }
 0x11b   : > { %2370 = vmatmul.mubr.f32.gmra.mrb[74].mxu1 %v4325_v54  ;;  %3179 = vmatprep.subr.bf16.mxu1 %v3178_v33  ;;  %v5125_v54 = vld [vmem:[#allocation36_spill] sm:$0xff]  ;;  %v1068_v24 = vld [vmem:[#allocation2 + $0xa9] sm:$0xff] }
 0x11c   : > { %2095 = vmatmul.mubr.f32.gmra.mrb[6].mxu0 %v4112_v59  ;;  %2374 = vmatprep.mubr.f32.mxu1 %v4329_v57  ;;  %v1557_v59 = vld [vmem:[%s5005_s2 + $0x478] sm:$0xff] }
 0x11d   : > { %2099 = vmatprep.mubr.f32.mxu0 %v4175_v44  ;;  %3121 = vmatpush1.bf16.msra.mxu0 %v3933_v40  ;;  %v3186_v40 = vpack.c.bf16 %v1557_v59, %v1556_v10  ;;  %v1069_v10 = vld [vmem:[#allocation2 + $0xb1] sm:$0xff] }
 0x11e   : > { %3122 = vmatprep.subr.bf16.mxu0 %v5100_v6  ;;  %3181 = vmatpush3.bf16.msra.mxu1 %v3178_v33  ;;  %v1067_v33 = vld [vmem:[#allocation2 + $0x91] sm:$0xff] }
 0x11f   : > { %2375 = vmatmul.mubr.f32.gmra.mrb[76].mxu1 %v4331_v62  ;;  %3183 = vmatprep.subr.bf16.mxu1 %v3182_v37  ;;  %v5126_v62 = vld [vmem:[#allocation38_spill] sm:$0xff] }
 0x120   : > { %2100 = vmatmul.mubr.f32.gmra.mrb[8].mxu0 %v4128_v7  ;;  %2379 = vmatprep.mubr.f32.mxu1 %v4340_v11 }
 0x121   : > { %2104 = vmatprep.mubr.f32.mxu0 %v4190_v58  ;;  %3124 = vmatpush1.bf16.msra.mxu0 %v3947_v45  ;;  %v5111_v58 = vld [vmem:[#allocation26_spill] sm:$0xff] }
 0x122   : > { %3125 = vmatprep.subr.bf16.mxu0 %v5100_v6  ;;  %3185 = vmatpush3.bf16.msra.mxu1 %v3182_v37  ;;  %v4566_v44 = vpop.f32.mrb[0].mxu1 }
 0x123   : > { %2380 = vmatmul.mubr.f32.gmra.mrb[78].mxu1 %v4347_v22  ;;  %v1633_v7 = vpop.f32.mrb[1].mxu1  ;;  %3187 = vmatprep.subr.bf16.mxu1 %v3186_v40  ;;  %v5127_v22 = vld [vmem:[#allocation16_spill] sm:$0xff] }
 0x124   : > { %2105 = vmatmul.mubr.f32.gmra.mrb[10].mxu0 %v4143_v19  ;;  %2384 = vmatprep.mubr.f32.mxu1 %v4351_v26  ;;  %v5135_v7 = vld [vmem:[#allocation37_spill] sm:$0xff] }
 0x125   : > { %2109 = vmatprep.mubr.f32.mxu0 %v4205_v8  ;;  %3127 = vmatpush1.bf16.msra.mxu0 %v3957_v48  ;;  %v5101_v48 = vld [vmem:[#allocation18_spill] sm:$0xff]  ;;  %v5113_v8 = vld [vmem:[#allocation27_spill] sm:$0xff] }
 0x126   : > { %3128 = vmatprep.subr.bf16.mxu0 %v5100_v6  ;;  %v4574_v45 = vpop.f32.mrb[2].mxu1  ;;  %3189 = vmatpush3.bf16.msra.mxu1 %v3186_v40  ;;  %v1070_v40 = vld [vmem:[#allocation2 + $0xc9] sm:$0xff] }
 0x127   : > { %2385 = vmatmul.mubr.f32.gmra.mrb[80].mxu1 %v4353_v32  ;;  %v1638_v19 = vpop.f32.mrb[3].mxu1  ;;  %v5128_v32 = vld [vmem:[#allocation17_spill] sm:$0xff] }
 0x128   : > { %2110 = vmatmul.mubr.f32.gmra.mrb[12].mxu0 %v4158_v28  ;;  %2389 = vmatprep.mubr.f32.mxu1 %v4361_v35  ;;  %v5108_v28 = vld [vmem:[#allocation11_spill] sm:$0xff] }
 0x129   : > { %2114 = vmatprep.mubr.f32.mxu0 %v4222_v25  ;;  %3130 = vmatpush1.bf16.msra.mxu0 %v3971_v53  ;;  %v5102_v53 = vld [vmem:[#allocation4_spill] sm:$0xff] }
 0x12a   : > { %3131 = vmatprep.subr.bf16.mxu0 %v5100_v6  ;;  %v5115_v25 = vld [vmem:[#allocation28_spill] sm:$0xff] }
 0x12b   : > { %2390 = vmatmul.mubr.f32.gmra.mrb[82].mxu1 %v4367_v49  ;;  %v3401_v49 = vld [vmem:[#allocation2] sm:$0xff] }
 0x12c   : > { %2115 = vmatmul.mubr.f32.gmra.mrb[14].mxu0 %v4173_v39  ;;  %2394 = vmatprep.mubr.f32.mxu1 %v4371_v51  ;;  %v5109_v39 = vld [vmem:[#allocation24_spill] sm:$0xff] }
 0x12d   : > { %2119 = vmatprep.mubr.f32.mxu0 %v4238_v36  ;;  %3133 = vmatpush1.bf16.msra.mxu0 %v3981_v56  ;;  %v5103_v56 = vld [vmem:[#allocation20_spill] sm:$0xff]  ;;  %v5117_v36 = vld [vmem:[#allocation30_spill] sm:$0xff] }
 0x12e   : > { %3134 = vmatprep.subr.bf16.mxu0 %v5100_v6 }
 0x12f   : > { %2395 = vmatmul.mubr.f32.gmra.mrb[84].mxu1 %v4373_v2  ;;  %v964_v2 = vld [vmem:[#allocation2 + $0x227] sm:$0xff] }
 0x130   : > { %2120 = vmatmul.mubr.f32.gmra.mrb[16].mxu0 %v4188_v50  ;;  %2399 = vmatprep.mubr.f32.mxu1 %v4381_v31  ;;  %v5110_v50 = vld [vmem:[#allocation6_spill] sm:$0xff] }
 0x131   : > { %2124 = vmatprep.mubr.f32.mxu0 %v4259_v52  ;;  %3136 = vmatpush1.bf16.msra.mxu0 %v3995_v61  ;;  %v5104_v61 = vld [vmem:[#allocation10_spill] sm:$0xff]  ;;  %v5119_v52 = vld [vmem:[#allocation32_spill] sm:$0xff] }
 0x132   : > { %3137 = vmatprep.subr.bf16.mxu0 %v5100_v6 }
 0x133   : > { %2400 = vmatmul.mubr.f32.gmra.mrb[86].mxu1 %v4387_v23  ;;  %v5106_v23 = vld [vmem:[#allocation5_spill] sm:$0xff] }
 0x134   : > { %2125 = vmatmul.mubr.f32.gmra.mrb[18].mxu0 %v4203_v63  ;;  %2404 = vmatprep.mubr.f32.mxu1 %v4391_v34  ;;  %v5112_v63 = vld [vmem:[#allocation12_spill] sm:$0xff] }
 0x135   : > { %2129 = vmatprep.mubr.f32.mxu0 %v4276_v5  ;;  %3139 = vmatpush1.bf16.msra.mxu0 %v4005_v0  ;;  %v5105_v0 = vld [vmem:[#allocation21_spill] sm:$0xff] }
 0x136   : > { %3140 = vmatprep.subr.bf16.mxu0 %v5100_v6  ;;  %v5121_v5 = vld [vmem:[#allocation33_spill] sm:$0xff] }
 0x137   : > { %2405 = vmatmul.mubr.f32.gmra.mrb[88].mxu1 %v4393_v3  ;;  %v5107_v3 = vld [vmem:[#allocation22_spill] sm:$0xff] }
 0x138   : > { %2130 = vmatmul.mubr.f32.gmra.mrb[20].mxu0 %v4218_v16  ;;  %2409 = vmatprep.mubr.f32.mxu1 %v5101_v48  ;;  %v5114_v16 = vld [vmem:[#allocation7_spill] sm:$0xff] }
 0x139   : > { %2134 = vmatprep.mubr.f32.mxu0 %v4297_v27  ;;  %3142 = vmatpush1.bf16.msra.mxu0 %v5102_v53  ;;  %v5124_v27 = vld [vmem:[#allocation15_spill] sm:$0xff] }
 0x13a   : > { %3143 = vmatprep.subr.bf16.mxu0 %v5100_v6 }
 0x13b   : > { %2410 = vmatmul.mubr.f32.gmra.mrb[90].mxu1 %v5103_v56  ;;  %v1072_v56 = vld [vmem:[#allocation2 + $0xe9] sm:$0xff] }
 0x13c   : > { %2135 = vmatmul.mubr.f32.gmra.mrb[22].mxu0 %v4236_v30  ;;  %2414 = vmatprep.mubr.f32.mxu1 %v5105_v0  ;;  %v5116_v30 = vld [vmem:[#allocation13_spill] sm:$0xff] }
 0x13d   : > { %2139 = vmatprep.mubr.f32.mxu0 %v5104_v61  ;;  %3145 = vmatpush1.bf16.msra.mxu0 %v5106_v23  ;;  %v5136_v61 = vld [vmem:[#allocation39_spill] sm:$0xff] }
 0x13e   : > { %3146 = vmatprep.subr.bf16.mxu0 %v5100_v6  ;;  %v1073_v23 = vld [vmem:[#allocation2 + $0xf1] sm:$0xff] }
 0x13f   : > { %2415 = vmatmul.mubr.f32.gmra.mrb[92].mxu1 %v5107_v3 }
 0x140   : > { %2140 = vmatmul.mubr.f32.gmra.mrb[24].mxu0 %v4255_v43  ;;  %2419 = vmatprep.mubr.f32.mxu1 %v5109_v39  ;;  %v5118_v43 = vld [vmem:[#allocation8_spill] sm:$0xff] }
 0x141   : > { %2144 = vmatprep.mubr.f32.mxu0 %v5108_v28  ;;  %3148 = vmatpush1.bf16.msra.mxu0 %v5110_v50  ;;  %v1074_v28 = vld [vmem:[#allocation2 + $0x109] sm:$0xff] }
 0x142   : > { %3149 = vmatprep.subr.bf16.mxu0 %v5100_v6 }
 0x143   : > { %2420 = vmatmul.mubr.f32.gmra.mrb[94].mxu1 %v5111_v58  ;;  %v1075_v58 = vld [vmem:[#allocation2 + $0x111] sm:$0xff] }
 0x144   : > { %2145 = vmatmul.mubr.f32.gmra.mrb[26].mxu0 %v4274_v60  ;;  %2424 = vmatprep.mubr.f32.mxu1 %v5113_v8  ;;  %v5120_v60 = vld [vmem:[#allocation14_spill] sm:$0xff] }
 0x145   : > { %2149 = vmatprep.mubr.f32.mxu0 %v5112_v63  ;;  %3151 = vmatpush1.bf16.msra.mxu0 %v5114_v16 }
 0x146   : > { %3152 = vmatprep.subr.bf16.mxu0 %v5100_v6 }
 0x147   : > { %2425 = vmatmul.mubr.f32.gmra.mrb[96].mxu1 %v5115_v25  ;;  %v1077_v25 = vld [vmem:[#allocation2 + $0x131] sm:$0xff] }
 0x148   : > { %2150 = vmatmul.mubr.f32.gmra.mrb[28].mxu0 %v4293_v20  ;;  %2429 = vmatprep.mubr.f32.mxu1 %v5117_v36  ;;  %v5123_v20 = vld [vmem:[#allocation34_spill] sm:$0xff] }
 0x149   : > { %2154 = vmatprep.mubr.f32.mxu0 %v5116_v30  ;;  %3154 = vmatpush1.bf16.msra.mxu0 %v5118_v43  ;;  %v1078_v43 = vld [vmem:[#allocation2 + $0x149] sm:$0xff] }
 0x14a   : > { %3155 = vmatprep.subr.bf16.mxu0 %v5100_v6  ;;  %v1063_v6 = vld [vmem:[#allocation2 + $0x51] sm:$0xff] }
 0x14b   : > { %2430 = vmatmul.mubr.f32.gmra.mrb[98].mxu1 %v5119_v52 }
 0x14c   : > { %2155 = vmatmul.mubr.f32.gmra.mrb[30].mxu0 %v4312_v38  ;;  %2434 = vmatprep.mubr.f32.mxu1 %v5121_v5  ;;  %v4641_v38 = vld [vmem:[#allocation2 + $0x208] sm:$0xff] }
 0x14d   : > { %2159 = vmatprep.mubr.f32.mxu0 %v5120_v60  ;;  %3157 = vmatpush1.bf16.msra.mxu0 %v5122_v21  ;;  %v1079_v60 = vld [vmem:[#allocation2 + $0x151] sm:$0xff] }
 0x14e   : > { %v900_v21 = vld [vmem:[#allocation2 + $0x211] sm:$0xff] }
 0x14f   : > { %2435 = vmatmul.mubr.f32.gmra.mrb[100].mxu1 %v5123_v20 }
 0x150   : > { %2160 = vmatmul.mubr.f32.gmra.mrb[32].mxu0 %v4329_v57  ;;  %2439 = vmatprep.mubr.f32.mxu1 %v5125_v54  ;;  %v4647_v57 = vld [vmem:[#allocation2 + $0x210] sm:$0xff] }
 0x151   : > { %2164 = vmatprep.mubr.f32.mxu0 %v5124_v27 }
 0x153   : > { %2440 = vmatmul.mubr.f32.gmra.mrb[102].mxu1 %v5126_v62  ;;  %v934_v62 = vld [vmem:[#allocation2 + $0x47] sm:$0xff] }
 0x154   : > { %2165 = vmatmul.mubr.f32.gmra.mrb[34].mxu0 %v4340_v11  ;;  %2444 = vmatprep.mubr.f32.mxu1 %v4641_v38  ;;  %v5129_v11 = vld [vmem:[#allocation19_spill] sm:$0xff] }
 0x155   : > { %2169 = vmatprep.mubr.f32.mxu0 %v5127_v22  ;;  %v999_v22 = vld [vmem:[#allocation2 + $0x50] sm:$0xff] }
 0x157   : > { %2445 = vmatmul.mubr.f32.gmra.mrb[104].mxu1 %v4471_v12  ;;  %v965_v12 = vld [vmem:[#allocation2 + $0x22f] sm:$0xff] }
 0x158   : > { %2170 = vmatmul.mubr.f32.gmra.mrb[36].mxu0 %v4351_v26  ;;  %2449 = vmatprep.mubr.f32.mxu1 %v4647_v57  ;;  %v5130_v26 = vld [vmem:[#allocation23_spill] sm:$0xff] }
 0x159   : > { %2174 = vmatprep.mubr.f32.mxu0 %v5128_v32 }
 0x15b   : > { %2450 = vmatmul.mubr.f32.gmra.mrb[106].mxu1 %v4489_v15  ;;  %v5131_v15 = vld [vmem:[#allocation25_spill] sm:$0xff] }
 0x15c   : > { %2175 = vmatmul.mubr.f32.gmra.mrb[38].mxu0 %v4361_v35  ;;  %2454 = vmatprep.mubr.f32.mxu1 %v3401_v49  ;;  %v1062_v35 = vld [vmem:[#allocation2 + $0x49] sm:$0xff] }
 0x15d   : > { %2179 = vmatprep.mubr.f32.mxu0 %v5129_v11 }
 0x15f   : > { %2455 = vmatmul.mubr.f32.gmra.mrb[108].mxu1 %v964_v2  ;;  %v936_v2 = vld [vmem:[#allocation2 + $0x67] sm:$0xff] }
 0x160   : > { %2180 = vmatmul.mubr.f32.gmra.mrb[40].mxu0 %v4371_v51  ;;  %2459 = vmatprep.mubr.f32.mxu1 %v3401_v49  ;;  %v1064_v51 = vld [vmem:[#allocation2 + $0x69] sm:$0xff] }
 0x161   : > { %2184 = vmatprep.mubr.f32.mxu0 %v5130_v26 }
 0x162   : > { %v4656_v17 = vpop.f32.mrb[4].mxu1 }
 0x163   : > { %v1643_v4 = vpop.f32.mrb[5].mxu1  ;;  %2460 = vmatmul.mubr.f32.gmra.mrb[110].mxu1 %v965_v12  ;;  %v1001_v12 = vld [vmem:[#allocation2 + $0x70] sm:$0xff] }
 0x164   : > { %2185 = vmatmul.mubr.f32.gmra.mrb[42].mxu0 %v4381_v31  ;;  %2918 = vmatprep.mubr.f32.mxu1 %v1062_v35  ;;  %v937_v35 = vld [vmem:[#allocation2 + $0x6f] sm:$0xff] }
 0x165   : > { %2189 = vmatprep.mubr.f32.mxu0 %v5131_v15 }
 0x166   : > { %v4660_v55 = vpop.f32.mrb[6].mxu1 }
 0x167   : > { %v1648_v1 = vpop.f32.mrb[7].mxu1  ;;  %2919 = vmatmul.mubr.f32.vlgmr.msra.gmra.mrb[112].mxu1 %v1063_v6  ;;  %v1002_v6 = vld [vmem:[#allocation2 + $0x88] sm:$0xff] }
 0x168   : > { %2190 = vmatmul.mubr.f32.gmra.mrb[44].mxu0 %v4391_v34  ;;  %2921 = vmatprep.mubr.f32.mxu1 %v1064_v51  ;;  %v1092_v1 = vld [vmem:[#allocation2 + $0x229] sm:$0xff] }
 0x169   : > { %2194 = vmatprep.mubr.f32.mxu0 %v5132_v42 }
 0x16a   : > { %v4664_v47 = vpop.f32.mrb[8].mxu1 }
 0x16b   : > { %v1653_v31 = vpop.f32.mrb[9].mxu1  ;;  %2922 = vmatmul.mubr.f32.gmra.mrb[114].mxu1 %v1065_v41 }
 0x16c   : > { %2195 = vmatmul.mubr.f32.gmra.mrb[46].mxu0 %v5101_v48  ;;  %2924 = vmatprep.mubr.f32.mxu1 %v1066_v29  ;;  %v1071_v48 = vld [vmem:[#allocation2 + $0xd1] sm:$0xff] }
 0x16d   : > { %2199 = vmatprep.mubr.f32.mxu0 %v5133_v14  ;;  %v1003_v31 = vld [vmem:[#allocation2 + $0x90] sm:$0xff] }
 0x16e   : > { %v4668_v46 = vpop.f32.mrb[10].mxu1  ;;  %v1093_v29 = vld [vmem:[#allocation2 + $0x231] sm:$0xff] }
 0x16f   : > { %v1658_v34 = vpop.f32.mrb[11].mxu1  ;;  %2925 = vmatmul.mubr.f32.gmra.mrb[116].mxu1 %v1067_v33  ;;  %v939_v33 = vld [vmem:[#allocation2 + $0x8f] sm:$0xff] }
 0x170   : > { %2200 = vmatmul.mubr.f32.gmra.mrb[48].mxu0 %v5105_v0  ;;  %2927 = vmatprep.mubr.f32.mxu1 %v1068_v24 }
 0x171   : > { %2204 = vmatprep.mubr.f32.mxu0 %v5134_v13 }
 0x172   : > { %v4672_v37 = vpop.f32.mrb[12].mxu1 }
 0x173   : > { %v1663_v59 = vpop.f32.mrb[13].mxu1  ;;  %2928 = vmatmul.mubr.f32.gmra.mrb[118].mxu1 %v1069_v10 }
 0x174   : > { %2205 = vmatmul.mubr.f32.gmra.mrb[50].mxu0 %v5109_v39  ;;  %2930 = vmatprep.mubr.f32.mxu1 %v1070_v40  ;;  %v5137_v39 = vld [vmem:[#allocation40_spill] sm:$0xff]  ;;  %v1005_v59 = vld [vmem:[#allocation2 + $0xb0] sm:$0xff] }
 0x175   : > { %2209 = vmatprep.mubr.f32.mxu0 %v5135_v7 }
 0x176   : > { %v4676_v19 = vpop.f32.mrb[14].mxu1 }
 0x177   : > { %v1668_v53 = vpop.f32.mrb[15].mxu1  ;;  %2931 = vmatmul.mubr.f32.gmra.mrb[120].mxu1 %v1071_v48 }
 0x178   : > { %2210 = vmatmul.mubr.f32.gmra.mrb[52].mxu0 %v5113_v8  ;;  %2933 = vmatprep.mubr.f32.mxu1 %v1072_v56  ;;  %v1076_v8 = vld [vmem:[#allocation2 + $0x129] sm:$0xff] }
 0x179   : > { %2214 = vmatprep.mubr.f32.mxu0 %v5136_v61 }
 0x17a   : > { %v4680_v0 = vpop.f32.mrb[16].mxu1 }
 0x17b   : > { %v1673_v3 = vpop.f32.mrb[17].mxu1  ;;  %2934 = vmatmul.mubr.f32.gmra.mrb[122].mxu1 %v1073_v23 }
 0x17c   : > { %2215 = vmatmul.mubr.f32.gmra.mrb[54].mxu0 %v5117_v36  ;;  %2936 = vmatprep.mubr.f32.mxu1 %v1074_v28  ;;  %v899_v36 = vld [vmem:[#allocation2 + $0x209] sm:$0xff] }
 0x17d   : > { %2219 = vmatprep.mubr.f32.mxu0 %v5137_v39 }
 0x17e   : > { %v4684_v50 = vpop.f32.mrb[18].mxu1 }
 0x17f   : > { %v1678_v63 = vpop.f32.mrb[19].mxu1  ;;  %2937 = vmatmul.mubr.f32.gmra.mrb[124].mxu1 %v1075_v58 }
 0x180   : > { %2220 = vmatmul.mubr.f32.gmra.mrb[56].mxu0 %v5121_v5  ;;  %2939 = vmatprep.mubr.f32.mxu1 %v1076_v8 }
 0x181   : > { %2224 = vmatprep.mubr.f32.mxu0 %v4500_v9 }
 0x182   : > { %v4688_v16 = vpop.f32.mrb[20].mxu1 }
 0x183   : > { %v1683_v30 = vpop.f32.mrb[21].mxu1  ;;  %2940 = vmatmul.mubr.f32.gmra.mrb[126].mxu1 %v1077_v25 }
 0x184   : > { %2225 = vmatmul.mubr.f32.gmra.mrb[58].mxu0 %v5125_v54  ;;  %2942 = vmatprep.mubr.f32.mxu1 %v1078_v43 }
 0x185   : > { %2229 = vmatprep.mubr.f32.mxu0 %v899_v36 }
 0x186   : > { %v4691_v52 = vpop.f32.mrb[22].mxu1 }
 0x187   : > { %v1688_v5 = vpop.f32.mrb[23].mxu1  ;;  %2943 = vmatmul.mubr.f32.gmra.mrb[128].mxu1 %v1079_v60 }
 0x188   : > { %2230 = vmatmul.mubr.f32.gmra.mrb[60].mxu0 %v4641_v38  ;;  %2945 = vmatprep.mubr.f32.mxu1 %v5129_v11 }
 0x189   : > { %2234 = vmatprep.mubr.f32.mxu0 %v900_v21 }
 0x18a   : > { %v4695_v20 = vpop.f32.mrb[24].mxu1 }
 0x18b   : > { %v1693_v27 = vpop.f32.mrb[25].mxu1  ;;  %2946 = vmatmul.mubr.f32.gmra.mrb[130].mxu1 %v5130_v26 }
 0x18c   : > { %2235 = vmatmul.mubr.f32.gmra.mrb[62].mxu0 %v4647_v57  ;;  %2948 = vmatprep.mubr.f32.mxu1 %v5131_v15  ;;  %v935_v57 = vld [vmem:[#allocation2 + $0x4f] sm:$0xff] }
 0x18d   : > { %2304 = vmatprep.mubr.f32.mxu0 %v4527_v18  ;;  %v1000_v18 = vld [vmem:[#allocation2 + $0x68] sm:$0xff] }
 0x18e   : > { %v4701_v54 = vpop.f32.mrb[26].mxu1 }
 0x18f   : > { %v1698_v38 = vpop.f32.mrb[27].mxu1  ;;  %2949 = vmatmul.mubr.f32.gmra.mrb[132].mxu1 %v5132_v42  ;;  %v938_v42 = vld [vmem:[#allocation2 + $0x87] sm:$0xff] }
 0x190   : > { %2305 = vmatmul.mubr.f32.vlgmr.msra.gmra.mrb[0].mxu0 %v934_v62  ;;  %2951 = vmatprep.mubr.f32.mxu1 %v5133_v14 }
 0x191   : > { %2309 = vmatprep.mubr.f32.mxu0 %v999_v22 }
 0x192   : > { %v4705_v32 = vpop.f32.mrb[28].mxu1 }
 0x193   : > { %v1703_v11 = vpop.f32.mrb[29].mxu1  ;;  %2952 = vmatmul.mubr.f32.gmra.mrb[134].mxu1 %v5134_v13  ;;  %v940_v13 = vld [vmem:[#allocation2 + $0xa7] sm:$0xff] }
 0x194   : > { %2310 = vmatmul.mubr.f32.gmra.mrb[2].mxu0 %v935_v57  ;;  %2954 = vmatprep.mubr.f32.mxu1 %v5135_v7  ;;  %v941_v7 = vld [vmem:[#allocation2 + $0xaf] sm:$0xff] }
 0x195   : > { %2314 = vmatprep.mubr.f32.mxu0 %v1000_v18 }
 0x196   : > { %v4709_v49 = vpop.f32.mrb[30].mxu1 }
 0x197   : > { %v1708_v26 = vpop.f32.mrb[31].mxu1  ;;  %2955 = vmatmul.mubr.f32.gmra.mrb[136].mxu1 %v5136_v61 }
 0x198   : > { %2315 = vmatmul.mubr.f32.gmra.mrb[4].mxu0 %v936_v2  ;;  %2957 = vmatprep.mubr.f32.mxu1 %v5137_v39 }
 0x199   : > { %2319 = vmatprep.mubr.f32.mxu0 %v1001_v12 }
 0x19a   : > { %v4713_v4 = vpop.f32.mrb[32].mxu1 }
 0x19b   : > { %v1713_v15 = vpop.f32.mrb[33].mxu1  ;;  %2958 = vmatmul.mubr.f32.gmra.mrb[138].mxu1 %v4500_v9  ;;  %v1004_v9 = vld [vmem:[#allocation2 + $0xa8] sm:$0xff] }
 0x19c   : > { %2320 = vmatmul.mubr.f32.gmra.mrb[6].mxu0 %v937_v35  ;;  %2960 = vmatprep.mubr.f32.mxu1 %v899_v36 }
 0x19d   : > { %2324 = vmatprep.mubr.f32.mxu0 %v1002_v6 }
 0x19e   : > { %v4716_v51 = vpop.f32.mrb[34].mxu1 }
 0x19f   : > { %v1718_v41 = vpop.f32.mrb[35].mxu1  ;;  %2961 = vmatmul.mubr.f32.gmra.mrb[140].mxu1 %v900_v21 }
 0x1a0   : > { %2325 = vmatmul.mubr.f32.gmra.mrb[8].mxu0 %v938_v42  ;;  %2963 = vmatprep.mubr.f32.mxu1 %v1092_v1 }
 0x1a1   : > { %2329 = vmatprep.mubr.f32.mxu0 %v1003_v31 }
 0x1a2   : > { %v4718_v14 = vpop.f32.mrb[36].mxu1 }
 0x1a3   : > { %v1723_v34 = vpop.f32.mrb[37].mxu1  ;;  %2964 = vmatmul.mubr.f32.gmra.mrb[142].mxu1 %v1093_v29 }
 0x1a4   : > { %2330 = vmatmul.mubr.f32.gmra.mrb[10].mxu0 %v939_v33 }
 0x1a5   : > { %2334 = vmatprep.mubr.f32.mxu0 %v1004_v9 }
 0x1a6   : > { %v4720_v24 = vpop.f32.mrb[38].mxu1 }
 0x1a7   : > { %v1728_v10 = vpop.f32.mrb[39].mxu1 }
 0x1a8   : > { %2335 = vmatmul.mubr.f32.gmra.mrb[12].mxu0 %v940_v13 }
 0x1a9   : > { %2339 = vmatprep.mubr.f32.mxu0 %v1005_v59 }
 0x1aa   : > { %v4722_v40 = vpop.f32.mrb[40].mxu1 }
 0x1ab   : > { %v1733_v48 = vpop.f32.mrb[41].mxu1 }
 0x1ac   : > { %2340 = vmatmul.mubr.f32.gmra.mrb[14].mxu0 %v941_v7  ;;  %v4755_v48 = vld [vmem:[%s5006_s3] ss:$0 sm:$0xff] }
 0x1ae   : > { %v4724_v53 = vpop.f32.mrb[42].mxu1 }
 0x1af   : > { %v1738_v56 = vpop.f32.mrb[43].mxu1 }
 0x1b0   : > { %v1672_v56 = vadd.f32 %v4755_v48, %v4680_v0  ;;  %v1682_v0 = vadd.f32 %v4755_v48, %v4688_v16  ;;  %v1692_v16 = vadd.f32 %v4755_v48, %v4695_v20  ;;  %v1702_v20 = vadd.f32 %v4755_v48, %v4705_v32 }
 0x1b1   : > { %v1712_v32 = vadd.f32 %v4755_v48, %v4713_v4 }
 0x1b2   : > { %v4726_v61 = vpop.f32.mrb[44].mxu1 }
 0x1b3   : > { %v1743_v23 = vpop.f32.mrb[45].mxu1 }
 0x1b6   : > { %v4728_v3 = vpop.f32.mrb[46].mxu1 }
 0x1b7   : > { %v1748_v28 = vpop.f32.mrb[47].mxu1 }
 0x1ba   : > { %v4730_v39 = vpop.f32.mrb[48].mxu1 }
 0x1bb   : > { %v1753_v58 = vpop.f32.mrb[49].mxu1 }
 0x1be   : > { %v4732_v63 = vpop.f32.mrb[50].mxu1 }
 0x1bf   : > { %v1758_v8 = vpop.f32.mrb[51].mxu1 }
 0x1c2   : > { %v4734_v25 = vpop.f32.mrb[52].mxu1 }
 0x1c3   : > { %v1763_v30 = vpop.f32.mrb[53].mxu1 }
 0x1c6   : > { %v4736_v36 = vpop.f32.mrb[54].mxu1 }
 0x1c7   : > { %v1768_v43 = vpop.f32.mrb[55].mxu1 }
 0x1c8   : > { %v1677_v43 = vadd.f32 %v4755_v48, %v4684_v50  ;;  %v1687_v50 = vadd.f32 %v4755_v48, %v4691_v52  ;;  %v1697_v52 = vadd.f32 %v4755_v48, %v4701_v54  ;;  %v1707_v54 = vadd.f32 %v4755_v48, %v4709_v49 }
 0x1ca   : > { %v4738_v60 = vpop.f32.mrb[56].mxu1 }
 0x1cb   : > { %v1773_v5 = vpop.f32.mrb[57].mxu1 }
 0x1ce   : > { %v4740_v21 = vpop.f32.mrb[58].mxu1 }
 0x1cf   : > { %v1778_v27 = vpop.f32.mrb[59].mxu1 }
 0x1d2   : > { %v4742_v62 = vpop.f32.mrb[60].mxu1 }
 0x1d3   : > { %v1783_v38 = vpop.f32.mrb[61].mxu1 }
 0x1d6   : > { %v4744_v22 = vpop.f32.mrb[62].mxu1 }
 0x1d7   : > { %v1788_v57 = vpop.f32.mrb[63].mxu1 }
 0x1da   : > { %v2346_v11 = vpop.f32.mrb[64].mxu1 }
 0x1db   : > { %v2348_v18 = vpop.f32.mrb[65].mxu1 }
 0x1de   : > { %v2351_v2 = vpop.f32.mrb[66].mxu1 }
 0x1df   : > { %v2353_v26 = vpop.f32.mrb[67].mxu1 }
 0x1e2   : > { %v2356_v12 = vpop.f32.mrb[68].mxu1 }
 0x1e3   : > { %v2358_v35 = vpop.f32.mrb[69].mxu1 }
 0x1e6   : > { %v2361_v15 = vpop.f32.mrb[70].mxu1 }
 0x1e7   : > { %v2363_v6 = vpop.f32.mrb[71].mxu1 }
 0x1ea   : > { %v2366_v1 = vpop.f32.mrb[72].mxu1 }
 0x1eb   : > { %v2368_v42 = vpop.f32.mrb[73].mxu1 }
 0x1ee   : > { %v2371_v41 = vpop.f32.mrb[74].mxu1 }
 0x1ef   : > { %v2373_v31 = vpop.f32.mrb[75].mxu1 }
 0x1f2   : > { %v2376_v29 = vpop.f32.mrb[76].mxu1 }
 0x1f3   : > { %v2378_v33 = vpop.f32.mrb[77].mxu1 }
 0x1f6   : > { %v4746_v34 = vpop.f32.mrb[78].mxu1 }
 0x1f7   : > { %v2383_v9 = vpop.f32.mrb[79].mxu1 }
 0x1fa   : > { %v4748_v13 = vpop.f32.mrb[80].mxu1 }
 0x1fb   : > { %v2388_v10 = vpop.f32.mrb[81].mxu1 }
 0x1fe   : > { %v4750_v59 = vpop.f32.mrb[82].mxu1 }
 0x1ff   : > { %v2393_v7 = vpop.f32.mrb[83].mxu1 }
 0x202   : > { %v4759_v28 = vpop.f32.mrb[84].mxu1 }
 0x203   : > { %v2121_v23 = vpop.f32.mrb[16].mxu0  ;;  %v2398_v30 = vpop.f32.mrb[85].mxu1 }
 0x204   : > { %v3239_v58 = vadd.f32 %v2121_v23, %v1672_v56  ;;  %v2123_v8 = vpop.f32.mrb[17].mxu0 }
 0x206   : > { %v4763_v5 = vadd.f32 %v3239_v58, %v2346_v11  ;;  %v4765_v38 = vpop.f32.mrb[86].mxu1 }
 0x207   : > { %v2126_v27 = vpop.f32.mrb[18].mxu0  ;;  %v2403_v26 = vpop.f32.mrb[87].mxu1 }
 0x208   : > { %v3242_v57 = vadd.f32 %v2126_v27, %v1677_v43  ;;  %v2128_v18 = vpop.f32.mrb[19].mxu0 }
 0x20a   : > { %v4769_v35 = vadd.f32 %v3242_v57, %v2351_v2  ;;  %v4771_v42 = vpop.f32.mrb[88].mxu1 }
 0x20b   : > { %v2131_v6 = vpop.f32.mrb[20].mxu0  ;;  %v2408_v9 = vpop.f32.mrb[89].mxu1 }
 0x20c   : > { %v3245_v31 = vadd.f32 %v2131_v6, %v1682_v0  ;;  %v2133_v33 = vpop.f32.mrb[21].mxu0 }
 0x20e   : > { %v4775_v11 = vadd.f32 %v3245_v31, %v2356_v12  ;;  %v4777_v7 = vpop.f32.mrb[90].mxu1 }
 0x20f   : > { %v2136_v10 = vpop.f32.mrb[22].mxu0  ;;  %v2413_v58 = vpop.f32.mrb[91].mxu1 }
 0x210   : > { %v3248_v56 = vadd.f32 %v2136_v10, %v1687_v50  ;;  %v2138_v23 = vpop.f32.mrb[23].mxu0 }
 0x212   : > { %v4781_v2 = vadd.f32 %v3248_v56, %v2361_v15  ;;  %v4783_v30 = vpop.f32.mrb[92].mxu1 }
 0x213   : > { %v2141_v8 = vpop.f32.mrb[24].mxu0  ;;  %v2418_v57 = vpop.f32.mrb[93].mxu1 }
 0x214   : > { %v3251_v43 = vadd.f32 %v2141_v8, %v1692_v16  ;;  %v2143_v27 = vpop.f32.mrb[25].mxu0 }
 0x216   : > { %v4787_v12 = vadd.f32 %v3251_v43, %v2366_v1  ;;  %v4789_v26 = vpop.f32.mrb[94].mxu1 }
 0x217   : > { %v2146_v18 = vpop.f32.mrb[26].mxu0  ;;  %v2423_v31 = vpop.f32.mrb[95].mxu1 }
 0x218   : > { %v3254_v0 = vadd.f32 %v2146_v18, %v1697_v52  ;;  %v2148_v6 = vpop.f32.mrb[27].mxu0 }
 0x21a   : > { %v4793_v15 = vadd.f32 %v3254_v0, %v2371_v41  ;;  %v4795_v9 = vpop.f32.mrb[96].mxu1 }
 0x21b   : > { %v2151_v33 = vpop.f32.mrb[28].mxu0  ;;  %v2428_v56 = vpop.f32.mrb[97].mxu1 }
 0x21c   : > { %v3257_v50 = vadd.f32 %v2151_v33, %v1702_v20  ;;  %v2153_v10 = vpop.f32.mrb[29].mxu0 }
 0x21e   : > { %v4799_v1 = vadd.f32 %v3257_v50, %v2376_v29  ;;  %v4801_v58 = vpop.f32.mrb[98].mxu1  ;;  %v1717_v29 = vadd.f32 %v4755_v48, %v4716_v51 }
 0x21f   : > { %v2156_v23 = vpop.f32.mrb[30].mxu0  ;;  %v2433_v43 = vpop.f32.mrb[99].mxu1 }
 0x220   : > { %v3260_v16 = vadd.f32 %v2156_v23, %v1707_v54  ;;  %v2158_v8 = vpop.f32.mrb[31].mxu0 }
 0x222   : > { %v4806_v41 = vadd.f32 %v3260_v16, %v4746_v34  ;;  %v4808_v57 = vpop.f32.mrb[100].mxu1  ;;  %v1722_v34 = vadd.f32 %v4755_v48, %v4718_v14 }
 0x223   : > { %v2161_v27 = vpop.f32.mrb[32].mxu0  ;;  %v2438_v49 = vpop.f32.mrb[101].mxu1 }
 0x224   : > { %v3263_v52 = vadd.f32 %v2161_v27, %v1712_v32  ;;  %v2163_v18 = vpop.f32.mrb[33].mxu0 }
 0x226   : > { %v4813_v0 = vadd.f32 %v3263_v52, %v4748_v13  ;;  %v4815_v31 = vpop.f32.mrb[102].mxu1  ;;  %v1727_v13 = vadd.f32 %v4755_v48, %v4720_v24 }
 0x227   : > { %v2166_v6 = vpop.f32.mrb[34].mxu0  ;;  %v2443_v33 = vpop.f32.mrb[103].mxu1 }
 0x228   : > { %v3266_v20 = vadd.f32 %v2166_v6, %v1717_v29  ;;  %v2168_v4 = vpop.f32.mrb[35].mxu0 }
 0x22a   : > { %v4820_v50 = vadd.f32 %v3266_v20, %v4750_v59  ;;  %v4822_v56 = vpop.f32.mrb[104].mxu1  ;;  %v1732_v59 = vadd.f32 %v4755_v48, %v4722_v40 }
 0x22b   : > { %v2171_v10 = vpop.f32.mrb[36].mxu0  ;;  %v2448_v23 = vpop.f32.mrb[105].mxu1 }
 0x22c   : > { %v3269_v54 = vadd.f32 %v2171_v10, %v1722_v34  ;;  %v2173_v51 = vpop.f32.mrb[37].mxu0 }
 0x22e   : > { %v4827_v16 = vadd.f32 %v3269_v54, %v4759_v28  ;;  %v4829_v43 = vpop.f32.mrb[106].mxu1  ;;  %v1737_v28 = vadd.f32 %v4755_v48, %v4724_v53 }
 0x22f   : > { %v2176_v8 = vpop.f32.mrb[38].mxu0  ;;  %v2453_v27 = vpop.f32.mrb[107].mxu1 }
 0x230   : > { %v3272_v32 = vadd.f32 %v2176_v8, %v1727_v13  ;;  %v2178_v14 = vpop.f32.mrb[39].mxu0 }
 0x232   : > { %v4834_v52 = vadd.f32 %v3272_v32, %v4765_v38  ;;  %v4836_v49 = vpop.f32.mrb[108].mxu1  ;;  %v1742_v38 = vadd.f32 %v4755_v48, %v4726_v61 }
 0x233   : > { %v2181_v18 = vpop.f32.mrb[40].mxu0  ;;  %v2458_v6 = vpop.f32.mrb[109].mxu1 }
 0x234   : > { %v3275_v29 = vadd.f32 %v2181_v18, %v1732_v59  ;;  %v2183_v24 = vpop.f32.mrb[41].mxu0  ;;  %v1752_v18 = vadd.f32 %v4755_v48, %v4730_v39 }
 0x236   : > { %v4841_v20 = vadd.f32 %v3275_v29, %v4771_v42  ;;  %v4843_v33 = vpop.f32.mrb[110].mxu1  ;;  %v1747_v42 = vadd.f32 %v4755_v48, %v4728_v3 }
 0x237   : > { %v2186_v4 = vpop.f32.mrb[42].mxu0  ;;  %v2463_v10 = vpop.f32.mrb[111].mxu1 }
 0x238   : > { %v3278_v34 = vadd.f32 %v2186_v4, %v1737_v28  ;;  %v2188_v40 = vpop.f32.mrb[43].mxu0  ;;  %v1757_v4 = vadd.f32 %v4755_v48, %v4732_v63 }
 0x23a   : > { %v4848_v54 = vadd.f32 %v3278_v34, %v4777_v7  ;;  %v4850_v23 = vpop.f32.mrb[112].mxu1 }
 0x23b   : > { %v2191_v51 = vpop.f32.mrb[44].mxu0  ;;  %v4852_v8 = vpop.f32.mrb[113].mxu1 }
 0x23c   : > { %v3281_v13 = vadd.f32 %v2191_v51, %v1742_v38  ;;  %v2193_v53 = vpop.f32.mrb[45].mxu0  ;;  %v1762_v51 = vadd.f32 %v4755_v48, %v4734_v25  ;;  %v1767_v25 = vadd.f32 %v4755_v48, %v4736_v36  ;;  %v1772_v36 = vadd.f32 %v4755_v48, %v4738_v60 }
 0x23d   : > { %v1777_v60 = vadd.f32 %v4755_v48, %v4740_v21  ;;  %v1782_v21 = vadd.f32 %v4755_v48, %v4742_v62  ;;  %v1787_v62 = vadd.f32 %v4755_v48, %v4744_v22  ;;  %v1632_v22 = vadd.f32 %v4755_v48, %v4566_v44 }
 0x23e   : > { %v4857_v32 = vadd.f32 %v3281_v13, %v4783_v30  ;;  %v4859_v27 = vpop.f32.mrb[114].mxu1  ;;  %v1637_v44 = vadd.f32 %v4755_v48, %v4574_v45  ;;  %v1642_v45 = vadd.f32 %v4755_v48, %v4656_v17 }
 0x23f   : > { %v2196_v14 = vpop.f32.mrb[46].mxu0  ;;  %v4861_v7 = vpop.f32.mrb[115].mxu1 }
 0x240   : > { %v3284_v61 = vadd.f32 %v2196_v14, %v1747_v42  ;;  %v2198_v59 = vpop.f32.mrb[47].mxu0 }
 0x242   : > { %v4866_v29 = vadd.f32 %v3284_v61, %v4789_v26  ;;  %v4868_v6 = vpop.f32.mrb[116].mxu1 }
 0x243   : > { %v2201_v24 = vpop.f32.mrb[48].mxu0  ;;  %v4870_v30 = vpop.f32.mrb[117].mxu1 }
 0x244   : > { %v3287_v3 = vadd.f32 %v2201_v24, %v1752_v18  ;;  %v2203_v28 = vpop.f32.mrb[49].mxu0 }
 0x246   : > { %v4875_v34 = vadd.f32 %v3287_v3, %v4795_v9  ;;  %v4877_v10 = vpop.f32.mrb[118].mxu1 }
 0x247   : > { %v2206_v40 = vpop.f32.mrb[50].mxu0  ;;  %v4879_v38 = vpop.f32.mrb[119].mxu1 }
 0x248   : > { %v3290_v39 = vadd.f32 %v2206_v40, %v1757_v4  ;;  %v2208_v26 = vpop.f32.mrb[51].mxu0 }
 0x24a   : > { %v4884_v13 = vadd.f32 %v3290_v39, %v4801_v58  ;;  %v2932_v42 = vpop.f32.mrb[120].mxu1 }
 0x24b   : > { %v2211_v53 = vpop.f32.mrb[52].mxu0  ;;  %v2577_v63 = vadd.f32 %v4769_v35, %v2932_v42  ;;  %v2571_v61 = vpop.f32.mrb[121].mxu1 }
 0x24c   : > { %v3293_v14 = vadd.f32 %v2211_v53, %v1762_v51  ;;  %v2213_v9 = vpop.f32.mrb[53].mxu0  ;;  %v2572_v59 = vadd.f32 %v4763_v5, %v2571_v61 }
 0x24d   : > { %v2699_v58 = vmax.f32 %v2577_v63, 0.0 }
 0x24e   : > { %v4897_v18 = vadd.f32 %v3293_v14, %v4808_v57  ;;  %v2698_v24 = vmax.f32 %v2572_v59, 0.0  ;;  %v2935_v3 = vpop.f32.mrb[122].mxu1 }
 0x24f   : > { %v2216_v35 = vpop.f32.mrb[54].mxu0  ;;  %2731 = vst [vmem:[%s4891_s17 + $0x48] sm:$0xff] %v2699_v58  ;;  %v2587_v4 = vadd.f32 %v4781_v2, %v2935_v3  ;;  %v2581_v39 = vpop.f32.mrb[123].mxu1 }
 0x250   : > { %v3296_v28 = vadd.f32 %v2216_v35, %v1767_v25  ;;  %v2218_v40 = vpop.f32.mrb[55].mxu0  ;;  %2730 = vst [vmem:[%s4891_s17 + $0x40] sm:$0xff] %v2698_v24  ;;  %v2582_v5 = vadd.f32 %v4775_v11, %v2581_v39 }
 0x251   : > { %v2701_v26 = vmax.f32 %v2587_v4, 0.0 }
 0x252   : > { %v4906_v57 = vadd.f32 %v3296_v28, %v4815_v31  ;;  %v2700_v51 = vmax.f32 %v2582_v5, 0.0  ;;  %v2938_v42 = vpop.f32.mrb[124].mxu1 }
 0x253   : > { %v2221_v53 = vpop.f32.mrb[56].mxu0  ;;  %2733 = vst [vmem:[%s4891_s17 + $0x58] sm:$0xff] %v2701_v26  ;;  %v2597_v2 = vadd.f32 %v4793_v15, %v2938_v42  ;;  %v2591_v9 = vpop.f32.mrb[125].mxu1 }
 0x254   : > { %v3299_v14 = vadd.f32 %v2221_v53, %v1772_v36  ;;  %v2223_v63 = vpop.f32.mrb[57].mxu0  ;;  %2732 = vst [vmem:[%s4891_s17 + $0x50] sm:$0xff] %v2700_v51  ;;  %v2592_v11 = vadd.f32 %v4787_v12, %v2591_v9 }
 0x255   : > { %v2703_v61 = vmax.f32 %v2597_v2, 0.0 }
 0x256   : > { %v4915_v31 = vadd.f32 %v3299_v14, %v4822_v56  ;;  %v2702_v59 = vmax.f32 %v2592_v11, 0.0  ;;  %v2941_v58 = vpop.f32.mrb[126].mxu1 }
 0x257   : > { %v2226_v25 = vpop.f32.mrb[58].mxu0  ;;  %2735 = vst [vmem:[%s4891_s17 + $0x68] sm:$0xff] %v2703_v61  ;;  %v2607_v15 = vadd.f32 %v4806_v41, %v2941_v58  ;;  %v2601_v3 = vpop.f32.mrb[127].mxu1 }
 0x258   : > { %v3302_v24 = vadd.f32 %v2226_v25, %v1777_v60  ;;  %v2228_v35 = vpop.f32.mrb[59].mxu0  ;;  %2734 = vst [vmem:[%s4891_s17 + $0x60] sm:$0xff] %v2702_v59  ;;  %v2602_v12 = vadd.f32 %v4799_v1, %v2601_v3 }
 0x259   : > { %v2705_v28 = vmax.f32 %v2607_v15, 0.0 }
 0x25a   : > { %v4924_v56 = vadd.f32 %v3302_v24, %v4829_v43  ;;  %v2704_v4 = vmax.f32 %v2602_v12, 0.0  ;;  %v2944_v39 = vpop.f32.mrb[128].mxu1 }
 0x25b   : > { %v2231_v40 = vpop.f32.mrb[60].mxu0  ;;  %2737 = vst [vmem:[%s4891_s17 + $0x78] sm:$0xff] %v2705_v28  ;;  %v2617_v41 = vadd.f32 %v4820_v50, %v2944_v39  ;;  %v2611_v26 = vpop.f32.mrb[129].mxu1 }
 0x25c   : > { %v3305_v5 = vadd.f32 %v2231_v40, %v1782_v21  ;;  %v2233_v36 = vpop.f32.mrb[61].mxu0  ;;  %2736 = vst [vmem:[%s4891_s17 + $0x70] sm:$0xff] %v2704_v4  ;;  %v2612_v1 = vadd.f32 %v4813_v0, %v2611_v26 }
 0x25d   : > { %v2707_v51 = vmax.f32 %v2617_v41, 0.0 }
 0x25e   : > { %v4933_v43 = vadd.f32 %v3305_v5, %v4836_v49  ;;  %v2706_v53 = vmax.f32 %v2612_v1, 0.0  ;;  %v2947_v14 = vpop.f32.mrb[130].mxu1 }
 0x25f   : > { %v2236_v42 = vpop.f32.mrb[62].mxu0  ;;  %2739 = vst [vmem:[%s4891_s17 + $0x88] sm:$0xff] %v2707_v51  ;;  %v2627_v50 = vadd.f32 %v4834_v52, %v2947_v14  ;;  %v2621_v9 = vpop.f32.mrb[131].mxu1 }
 0x260   : > { %v3308_v2 = vadd.f32 %v2236_v42, %v1787_v62  ;;  %v2238_v63 = vpop.f32.mrb[63].mxu0  ;;  %2738 = vst [vmem:[%s4891_s17 + $0x80] sm:$0xff] %v2706_v53  ;;  %v2622_v0 = vadd.f32 %v4827_v16, %v2621_v9 }
 0x261   : > { %v2709_v11 = vmax.f32 %v2627_v50, 0.0 }
 0x262   : > { %v4942_v49 = vadd.f32 %v3308_v2, %v4843_v33  ;;  %v2708_v60 = vmax.f32 %v2622_v0, 0.0  ;;  %v2950_v59 = vpop.f32.mrb[132].mxu1 }
 0x263   : > { %v2306_v61 = vpop.f32.mrb[0].mxu0  ;;  %2741 = vst [vmem:[%s4891_s17 + $0x98] sm:$0xff] %v2709_v11  ;;  %v2637_v52 = vadd.f32 %v4848_v54, %v2950_v59  ;;  %v2631_v24 = vpop.f32.mrb[133].mxu1 }
 0x264   : > { %v3223_v25 = vadd.f32 %v2306_v61, %v1632_v22  ;;  %v2308_v58 = vpop.f32.mrb[1].mxu0  ;;  %2740 = vst [vmem:[%s4891_s17 + $0x90] sm:$0xff] %v2708_v60  ;;  %v2632_v16 = vadd.f32 %v4841_v20, %v2631_v24 }
 0x265   : > { %v2711_v15 = vmax.f32 %v2637_v52, 0.0 }
 0x266   : > { %v2532_v33 = vadd.f32 %v3223_v25, %v4852_v8  ;;  %v2710_v35 = vmax.f32 %v2632_v16, 0.0  ;;  %v2953_v12 = vpop.f32.mrb[134].mxu1 }
 0x267   : > { %v2311_v3 = vpop.f32.mrb[2].mxu0  ;;  %2743 = vst [vmem:[%s4891_s17 + $0xa8] sm:$0xff] %v2711_v15  ;;  %v2647_v28 = vadd.f32 %v4866_v29, %v2953_v12  ;;  %v2641_v40 = vpop.f32.mrb[135].mxu1 }
 0x268   : > { %v2690_v21 = vmax.f32 %v2532_v33, 0.0  ;;  %v3225_v54 = vadd.f32 %v2311_v3, %v1637_v44  ;;  %v2313_v4 = vpop.f32.mrb[3].mxu0  ;;  %2742 = vst [vmem:[%s4891_s17 + $0xa0] sm:$0xff] %v2710_v35  ;;  %v2642_v20 = vadd.f32 %v4857_v32, %v2641_v40  ;;  %v1647_v32 = vadd.f32 %v4755_v48, %v4660_v55 }
 0x269   : > { %v2713_v39 = vmax.f32 %v2647_v28, 0.0 }
 0x26a   : > { %2722 = vst [vmem:[%s4891_s17] sm:$0xff] %v2690_v21  ;;  %v2537_v8 = vadd.f32 %v3225_v54, %v4850_v23  ;;  %v2712_v5 = vmax.f32 %v2642_v20, 0.0  ;;  %v2956_v36 = vpop.f32.mrb[136].mxu1  ;;  %v1667_v20 = vadd.f32 %v4755_v48, %v4676_v19 }
 0x26b   : > { %v2316_v41 = vpop.f32.mrb[4].mxu0  ;;  %2745 = vst [vmem:[%s4891_s17 + $0xb8] sm:$0xff] %v2713_v39  ;;  %v2657_v1 = vadd.f32 %v4884_v13, %v2956_v36  ;;  %v2651_v51 = vpop.f32.mrb[137].mxu1 }
 0x26c   : > { %v2691_v26 = vmax.f32 %v2537_v8, 0.0  ;;  %v3227_v29 = vadd.f32 %v2316_v41, %v1642_v45  ;;  %v2318_v62 = vpop.f32.mrb[5].mxu0  ;;  %2744 = vst [vmem:[%s4891_s17 + $0xb0] sm:$0xff] %v2712_v5  ;;  %v2652_v17 = vadd.f32 %v4875_v34, %v2651_v51  ;;  %v1652_v34 = vadd.f32 %v4755_v48, %v4664_v47 }
 0x26d   : > { %v2715_v53 = vmax.f32 %v2657_v1, 0.0 }
 0x26e   : > { %2723 = vst [vmem:[%s4891_s17 + $0x8] sm:$0xff] %v2691_v26  ;;  %v2542_v23 = vadd.f32 %v3227_v29, %v4861_v7  ;;  %v2714_v42 = vmax.f32 %v2652_v17, 0.0  ;;  %v2959_v2 = vpop.f32.mrb[138].mxu1 }
 0x26f   : > { %v2321_v14 = vpop.f32.mrb[6].mxu0  ;;  %2747 = vst [vmem:[%s4891_s17 + $0xc8] sm:$0xff] %v2715_v53  ;;  %v2667_v63 = vadd.f32 %v4906_v57, %v2959_v2  ;;  %v2661_v0 = vpop.f32.mrb[139].mxu1 }
 0x270   : > { %v2692_v50 = vmax.f32 %v2542_v23, 0.0  ;;  %v3229_v13 = vadd.f32 %v2321_v14, %v1647_v32  ;;  %v2323_v9 = vpop.f32.mrb[7].mxu0  ;;  %2746 = vst [vmem:[%s4891_s17 + $0xc0] sm:$0xff] %v2714_v42  ;;  %v2662_v55 = vadd.f32 %v4897_v18, %v2661_v0  ;;  %v1657_v18 = vadd.f32 %v4755_v48, %v4668_v46 }
 0x271   : > { %v2717_v22 = vmax.f32 %v2667_v63, 0.0 }
 0x272   : > { %2724 = vst [vmem:[%s4891_s17 + $0x10] sm:$0xff] %v2692_v50  ;;  %v2547_v7 = vadd.f32 %v3229_v13, %v4859_v27  ;;  %v2716_v11 = vmax.f32 %v2662_v55, 0.0  ;;  %v2962_v61 = vpop.f32.mrb[140].mxu1 }
 0x273   : > { %v2326_v60 = vpop.f32.mrb[8].mxu0  ;;  %2749 = vst [vmem:[%s4891_s17 + $0xd8] sm:$0xff] %v2717_v22  ;;  %v2677_v25 = vadd.f32 %v4924_v56, %v2962_v61  ;;  %v2671_v58 = vpop.f32.mrb[141].mxu1 }
 0x274   : > { %v2693_v59 = vmax.f32 %v2547_v7, 0.0  ;;  %v3231_v57 = vadd.f32 %v2326_v60, %v1652_v34  ;;  %v2328_v52 = vpop.f32.mrb[9].mxu0  ;;  %2748 = vst [vmem:[%s4891_s17 + $0xd0] sm:$0xff] %v2716_v11  ;;  %v2672_v47 = vadd.f32 %v4915_v31, %v2671_v58 }
 0x275   : > { %v2719_v24 = vmax.f32 %v2677_v25, 0.0 }
 0x276   : > { %2725 = vst [vmem:[%s4891_s17 + $0x18] sm:$0xff] %v2693_v59  ;;  %v2552_v27 = vadd.f32 %v3231_v57, %v4870_v30  ;;  %v2718_v16 = vmax.f32 %v2672_v47, 0.0  ;;  %v2965_v33 = vpop.f32.mrb[142].mxu1  ;;  %v1662_v30 = vadd.f32 %v4755_v48, %v4672_v37 }
 0x277   : > { %v2331_v44 = vpop.f32.mrb[10].mxu0  ;;  %2751 = vst [vmem:[%s4891_s17 + $0xe8] sm:$0xff] %v2719_v24  ;;  %v2687_v35 = vadd.f32 %v4942_v49, %v2965_v33  ;;  %v2681_v31 = vpop.f32.mrb[143].mxu1 }
 0x278   : > { %v2694_v15 = vmax.f32 %v2552_v27, 0.0  ;;  %v3233_v56 = vadd.f32 %v2331_v44, %v1657_v18  ;;  %v2333_v3 = vpop.f32.mrb[11].mxu0  ;;  %2750 = vst [vmem:[%s4891_s17 + $0xe0] sm:$0xff] %v2718_v16  ;;  %v2682_v46 = vadd.f32 %v4933_v43, %v2681_v31 }
 0x279   : > { %v2721_v21 = vmax.f32 %v2687_v35, 0.0 }
 0x27a   : > { %2726 = vst [vmem:[%s4891_s17 + $0x20] sm:$0xff] %v2694_v15  ;;  %v2557_v12 = vadd.f32 %v3233_v56, %v4868_v6  ;;  %v2720_v54 = vmax.f32 %v2682_v46, 0.0 }
 0x27b   : > { %v2336_v28 = vpop.f32.mrb[12].mxu0  ;;  %2753 = vst [vmem:[%s4891_s17 + $0xf8] sm:$0xff] %v2721_v21 }
 0x27c   : > { %v2695_v4 = vmax.f32 %v2557_v12, 0.0  ;;  %v3235_v49 = vadd.f32 %v2336_v28, %v1662_v30  ;;  %v2338_v40 = vpop.f32.mrb[13].mxu0  ;;  %2752 = vst [vmem:[%s4891_s17 + $0xf0] sm:$0xff] %v2720_v54 }
 0x27e   : > { %2727 = vst [vmem:[%s4891_s17 + $0x28] sm:$0xff] %v2695_v4  ;;  %v2562_v43 = vadd.f32 %v3235_v49, %v4879_v38 }
 0x27f   : > { %v2341_v37 = vpop.f32.mrb[14].mxu0 }
 0x280   : > { %v2696_v45 = vmax.f32 %v2562_v43, 0.0  ;;  %v3237_v8 = vadd.f32 %v2341_v37, %v1667_v20  ;;  %v2343_v6 = vpop.f32.mrb[15].mxu0 }
 0x282   : > { %2728 = vst [vmem:[%s4891_s17 + $0x30] sm:$0xff] %v2696_v45  ;;  %v2567_v39 = vadd.f32 %v3237_v8, %v4877_v10 }
 0x284   : > { %v2697_v5 = vmax.f32 %v2567_v39, 0.0 }
 0x286   : > { %2729 = vst [vmem:[%s4891_s17 + $0x38] sm:$0xff] %v2697_v5 }
 0x287 PF: > { %s14_s15 = sadd.s32 1, %s3408_s15  }
 0x288   : > { %p11_p4 = scmp.ge.s32.totalorder %s14_s15, 4  }
 0x28a   :  { %13 = sbr.rel (!%p11_p4) target bundleno = 1 (0x1), region = 71 }

</bundles_post_ra>
